<compile_context>
chip_gen: v7x
topology: tpu7x:2x2x1
jax: 0.10.0
libtpu: 0.0.40
codegen_flags: <defaults>
</compile_context>

<pallas_src>
from functools import partial

import jax
import jax.numpy as jnp
from jax import lax
from jax.experimental import pallas as pl
from jax.experimental.pallas import tpu as pltpu


def _lambda2d_kernel(x_ref, w_ref, b_ref, g_ref, out_ref, *, heads, kk, vv):
    """Fused LambdaLayer2D forward for one batch element.

    x_ref:   (1, C, N)         f32   input, spatial flattened (N = W*H on lanes)
    w_ref:   (kh+kk+vv, C)     f32   stacked 1x1-conv weights (BN folded)
    b_ref:   (kh+kk+vv, 1)     f32   stacked biases (zeros for the key rows)
    g_ref:   (N, kk*N)         bf16  batch-independent position-conv operator
    out_ref: (1, heads*vv, N)  f32   y = y_c + y_p, sublane/lane dense
    """
    kh = heads * kk
    n = x_ref.shape[-1]
    f32 = jnp.float32

    x = x_ref[0]                                                     # (C, N)

    # --- all three 1x1 convs (BN folded) as ONE small MXU matmul -------------
    proj = jnp.dot(w_ref[...], x, preferred_element_type=f32) + b_ref[...]
    q = proj[:kh]                                                    # (kh, N)
    keys = proj[kh:kh + kk]                                          # (kk, N)
    vmap = proj[kh + kk:]                                            # (vv, N)

    # --- softmax over the spatial axis (exp on EUP, approx reciprocal) -------
    keys = keys - jnp.max(keys, axis=-1, keepdims=True)
    e = jnp.exp(keys)
    sm = e * pl.reciprocal(jnp.sum(e, axis=-1, keepdims=True), approx=True)

    # --- content lambda: lam_c[v, k] = sum_n vmap[v, n] * sm[k, n] ------------
    lam_c = lax.dot_general(vmap, sm, (((1,), (1,)), ((), ())),
                            preferred_element_type=f32)              # (vv, kk)

    # --- position lambda: ONE lane-dense MXU matmul against the precomputed ---
    # operator (resident in VMEM, loaded once for the whole grid).
    # lam_p[v, k*N + n] = sum_{n'} vmap[v, n'] * G[n', k*N + n]
    lam_p = jnp.dot(vmap.astype(jnp.bfloat16), g_ref[...],
                    preferred_element_type=f32)                      # (vv, kk*N)

    # --- output: y[h*vv + v, n] = sum_k q[h,k,n] * (lam_c[v,k] + lam_p[v,k,n]) -
    # content half on the MXU, position half as a VPU reduce over aligned
    # 256-lane slices of the flat lam_p (no combined-lambda slab materialized).
    for h in range(heads):                       # heads is small; unrolled
        q_h = q[h * kk:(h + 1) * kk, :]                              # (kk, N)
        acc = jnp.dot(lam_c, q_h, preferred_element_type=f32)        # (vv, N)  y_c
        for k in range(kk):
            acc = acc + lam_p[:, k * n:(k + 1) * n] * q_h[k:k + 1, :]
        out_ref[0, pl.ds(h * vv, vv), :] = acc                       # dense rows


@partial(jax.jit, static_argnames=("heads", "m"))
def lambda_layer_2d(x, wq_eff, bq, wk, wv_eff, bv, embedding, *, heads, m):
    """x: (B, C, W, H) NCHW.  Returns (B, out_channels, W, H).  Assumes u == 1."""
    B, C, W, H = x.shape
    N = W * H
    kh = wq_eff.shape[0]              # k * heads
    kk = wk.shape[0]                  # k (u == 1)
    vv = wv_eff.shape[0]              # out_channels // heads
    assert kh == kk * heads
    pad = (m - 1) // 2
    f32 = jnp.float32

    xf = x.reshape(B, C, N).astype(f32)

    # Stacked projection weights / biases (weight plumbing only).
    w_all = jnp.concatenate([wq_eff, wk, wv_eff], axis=0).astype(f32)        # (R, C)
    b_all = jnp.concatenate(
        [bq.astype(f32), jnp.zeros((kk,), f32), bv.astype(f32)]
    ).reshape(-1, 1)                                                         # (R, 1)

    # ---- batch-independent position-conv operator ----------------------------
    # G[(i',j'), k*N + (i,j)] = emb[k, i'-i+pad, j'-j+pad] (0 outside the m x m
    # window).  Pure function of the embedding / spatial size: DMA'd into VMEM a
    # single time (constant index_map), so no per-batch HBM amplification.
    emb2 = embedding.reshape(kk, m, m).astype(f32)
    di = jnp.arange(W)[:, None] - jnp.arange(W)[None, :] + pad     # (i', i)
    dj = jnp.arange(H)[:, None] - jnp.arange(H)[None, :] + pad     # (j', j)
    vmask = (((di >= 0) & (di < m))[:, :, None, None]
             & ((dj >= 0) & (dj < m))[None, None, :, :])           # (i', i, j', j)
    dic = jnp.clip(di, 0, m - 1)
    djc = jnp.clip(dj, 0, m - 1)
    g6 = emb2[:, dic[:, :, None, None], djc[None, None, :, :]]     # (kk, i', i, j', j)
    g6 = jnp.where(vmask[None], g6, 0.0)
    g = jnp.transpose(g6, (1, 3, 0, 2, 4)).reshape(N, kk * N).astype(jnp.bfloat16)

    out = pl.pallas_call(
        partial(_lambda2d_kernel, heads=heads, kk=kk, vv=vv),
        out_shape=jax.ShapeDtypeStruct((B, heads * vv, N), f32),
        grid=(B,),
        in_specs=[
            pl.BlockSpec((1, C, N), lambda b: (b, 0, 0)),
            pl.BlockSpec((kh + kk + vv, C), lambda b: (0, 0)),
            pl.BlockSpec((kh + kk + vv, 1), lambda b: (0, 0)),
            pl.BlockSpec((N, kk * N), lambda b: (0, 0)),
        ],
        out_specs=pl.BlockSpec((1, heads * vv, N), lambda b: (b, 0, 0)),
        compiler_params=pltpu.CompilerParams(
            dimension_semantics=("parallel",),
            vmem_limit_bytes=32 * 1024 * 1024),
    )(xf, w_all, b_all, g)

    # (B, heads*vv, N) row-major == (B, heads*vv, W, H): free metadata reshape.
    return out.reshape(B, heads * vv, W, H)


def lambda_layer_2d_ref(x, wq_eff, bq, wk, wv_eff, bv, embedding, *, heads, m):
    """Pure-JAX f32 reference (mirrors the PyTorch forward with eval-mode BN)."""
    B, C, W, H = x.shape
    N = W * H
    kk = wk.shape[0]
    vv = wv_eff.shape[0]
    pad = (m - 1) // 2
    hi = jax.lax.Precision.HIGHEST
    xf = x.reshape(B, C, N)
    q = jnp.einsum('oc,bcn->bon', wq_eff, xf, precision=hi) + bq[None, :, None]
    keys = jnp.einsum('oc,bcn->bon', wk, xf, precision=hi)
    sm = jax.nn.softmax(keys, axis=-1)
    v = jnp.einsum('oc,bcn->bon', wv_eff, xf, precision=hi) + bv[None, :, None]
    lam_c = jnp.einsum('bkn,bvn->bkv', sm, v, precision=hi)
    q4 = q.reshape(B, heads, kk, N)
    y_c = jnp.einsum('bhkn,bkv->bhvn', q4, lam_c, precision=hi)
    inp = v.reshape(B * vv, 1, W, H)
    ker = embedding.reshape(kk, 1, m, m)
    lp = lax.conv_general_dilated(inp, ker, (1, 1), [(pad, pad), (pad, pad)],
                                  dimension_numbers=('NCHW', 'OIHW', 'NCHW'),
                                  precision=hi)
    lam_p = lp.reshape(B, vv, kk, N).transpose(0, 2, 1, 3)               # (B,K,V,N)
    y_p = jnp.einsum('bhkn,bkvn->bhvn', q4, lam_p, precision=hi)
    return (y_c + y_p).reshape(B, heads * vv, W, H)


if __name__ == "__main__":
    # small shapes consistent with the module defaults (u=1, m=23)
    B, C, W, H = 2, 4, 16, 16
    out_channels, heads, KK, U, M = 16, 4, 16, 1, 23
    VV = out_channels // heads
    eps = 1e-5

    key = jax.random.PRNGKey(0)
    ks = jax.random.split(key, 16)
    x = jax.random.normal(ks[0], (B, C, W, H), jnp.float32)

    # conv weights (1x1 convs -> plain (out, in) matrices)
    wq = 0.1 * jax.random.normal(ks[1], (KK * heads, C), jnp.float32)
    wk = 0.1 * jax.random.normal(ks[2], (KK * U, C), jnp.float32)
    wv = 0.1 * jax.random.normal(ks[3], (VV * U, C), jnp.float32)

    # BatchNorm params (eval mode: running stats), folded into weight + bias
    gq = 1.0 + 0.1 * jax.random.normal(ks[4], (KK * heads,), jnp.float32)
    betq = 0.1 * jax.random.normal(ks[5], (KK * heads,), jnp.float32)
    muq = 0.1 * jax.random.normal(ks[6], (KK * heads,), jnp.float32)
    varq = 1.0 + 0.1 * jnp.abs(jax.random.normal(ks[7], (KK * heads,), jnp.float32))
    gv = 1.0 + 0.1 * jax.random.normal(ks[8], (VV * U,), jnp.float32)
    betv = 0.1 * jax.random.normal(ks[9], (VV * U,), jnp.float32)
    muv = 0.1 * jax.random.normal(ks[10], (VV * U,), jnp.float32)
    varv = 1.0 + 0.1 * jnp.abs(jax.random.normal(ks[11], (VV * U,), jnp.float32))

    sq = gq / jnp.sqrt(varq + eps)
    wq_eff = wq * sq[:, None]
    bq = betq - muq * sq
    sv = gv / jnp.sqrt(varv + eps)
    wv_eff = wv * sv[:, None]
    bv = betv - muv * sv

    # positional embedding, shape (k, u, 1, m, m) as in the module
    embedding = jax.random.normal(ks[12], (KK, U, 1, M, M), jnp.float32)

    out = lambda_layer_2d(x, wq_eff, bq, wk, wv_eff, bv, embedding,
                          heads=heads, m=M)
    out = jax.block_until_ready(out)
    assert out.shape == (B, out_channels, W, H)

    ref = jax.block_until_ready(
        lambda_layer_2d_ref(x, wq_eff, bq, wk, wv_eff, bv, embedding,
                            heads=heads, m=M))
    err = float(jnp.max(jnp.abs(out - ref)))
    scale = float(jnp.max(jnp.abs(ref))) + 1e-6
    # bf16 operator on the 256-deep position contraction + default-precision
    # (single-pass bf16 MXU) projections -> slightly loosened bound
    assert err < 2e-2 * scale + 1e-2, f"mismatch: abs err {err} vs scale {scale}"

    print("KERNEL_OK")
</pallas_src>

<mosaic_0001>
module attributes {stable_mosaic.version = 11 : i64} {
  func.func @_lambda2d_kernel(%arg0: i32, %arg1: memref<1x4x256xf32, #tpu.memory_space<vmem>>, %arg2: memref<84x4xf32, #tpu.memory_space<vmem>>, %arg3: memref<84x1xf32, #tpu.memory_space<vmem>>, %arg4: memref<256x4096xbf16, #tpu.memory_space<vmem>>, %arg5: memref<1x16x256xf32, #tpu.memory_space<vmem>>) attributes {dimension_semantics = [#tpu.dimension_semantics<parallel>], iteration_bounds = array<i64: 2>, scalar_prefetch = 0 : i64, scratch_operands = 0 : i64, tpu.core_type = #tpu.core_type<tc>, window_params = [{transform_indices = @transform_0, window_bounds = array<i64: 1, 4, 256>}, {pipeline_mode = #tpu.pipeline_mode<synchronous>, transform_indices = @transform_1, window_bounds = array<i64: 84, 4>}, {pipeline_mode = #tpu.pipeline_mode<synchronous>, transform_indices = @transform_2, window_bounds = array<i64: 84, 1>}, {pipeline_mode = #tpu.pipeline_mode<synchronous>, transform_indices = @transform_3, window_bounds = array<i64: 256, 4096>}, {transform_indices = @transform_4, window_bounds = array<i64: 1, 16, 256>}]} {
    %c0 = arith.constant 0 : index
    %c0_0 = arith.constant 0 : index
    %c0_1 = arith.constant 0 : index
    %0 = vector.load %arg1[%c0, %c0_0, %c0_1] : memref<1x4x256xf32, #tpu.memory_space<vmem>>, vector<1x4x256xf32>
    %1 = vector.shape_cast %0 : vector<1x4x256xf32> to vector<4x256xf32>
    %c0_2 = arith.constant 0 : index
    %c0_3 = arith.constant 0 : index
    %2 = vector.load %arg2[%c0_2, %c0_3] : memref<84x4xf32, #tpu.memory_space<vmem>>, vector<84x4xf32>
    %cst = arith.constant dense<0.000000e+00> : vector<84x256xf32>
    %3 = tpu.matmul %2, %1, %cst {dimension_numbers = #tpu.dot_dimension_numbers<[1], [0], [0], [1], [0, 0, 1, 1], [], []>} : vector<84x4xf32>, vector<4x256xf32>, vector<84x256xf32> -> vector<84x256xf32>
    %c0_4 = arith.constant 0 : index
    %c0_5 = arith.constant 0 : index
    %4 = vector.load %arg3[%c0_4, %c0_5] : memref<84x1xf32, #tpu.memory_space<vmem>>, vector<84x1xf32>
    %5 = vector.broadcast %4 : vector<84x1xf32> to vector<84x256xf32>
    %6 = arith.addf %3, %5 : vector<84x256xf32>
    %7 = vector.extract_strided_slice %6 {offsets = [0, 0], sizes = [64, 256], strides = [1, 1]} : vector<84x256xf32> to vector<64x256xf32>
    %8 = vector.extract_strided_slice %6 {offsets = [64, 0], sizes = [16, 256], strides = [1, 1]} : vector<84x256xf32> to vector<16x256xf32>
    %9 = vector.extract_strided_slice %6 {offsets = [80, 0], sizes = [4, 256], strides = [1, 1]} : vector<84x256xf32> to vector<4x256xf32>
    %cst_6 = arith.constant dense<0xFF800000> : vector<16xf32>
    %10 = vector.multi_reduction <maximumf>, %8, %cst_6 [1] : vector<16x256xf32> to vector<16xf32>
    %11 = vector.shape_cast %10 : vector<16xf32> to vector<16x1xf32>
    %12 = vector.broadcast %11 : vector<16x1xf32> to vector<16x256xf32>
    %13 = arith.subf %8, %12 : vector<16x256xf32>
    %14 = math.exp %13 : vector<16x256xf32>
    %cst_7 = arith.constant dense<0.000000e+00> : vector<16xf32>
    %15 = vector.multi_reduction <add>, %14, %cst_7 [1] : vector<16x256xf32> to vector<16xf32>
    %16 = vector.shape_cast %15 : vector<16xf32> to vector<16x1xf32>
    %17 = tpu.reciprocal %16 {approx = true} : vector<16x1xf32> -> vector<16x1xf32>
    %18 = vector.broadcast %17 : vector<16x1xf32> to vector<16x256xf32>
    %19 = arith.mulf %14, %18 : vector<16x256xf32>
    %cst_8 = arith.constant dense<0.000000e+00> : vector<4x16xf32>
    %20 = tpu.matmul %9, %19, %cst_8 {dimension_numbers = #tpu.dot_dimension_numbers<[1], [1], [0], [0], [0, 0, 1, 0], [], []>} : vector<4x256xf32>, vector<16x256xf32>, vector<4x16xf32> -> vector<4x16xf32>
    %21 = arith.truncf %9 : vector<4x256xf32> to vector<4x256xbf16>
    %c0_9 = arith.constant 0 : index
    %c0_10 = arith.constant 0 : index
    %22 = vector.load %arg4[%c0_9, %c0_10] : memref<256x4096xbf16, #tpu.memory_space<vmem>>, vector<256x4096xbf16>
    %cst_11 = arith.constant dense<0.000000e+00> : vector<4x4096xf32>
    %23 = tpu.matmul %21, %22, %cst_11 {dimension_numbers = #tpu.dot_dimension_numbers<[1], [0], [0], [1], [0, 0, 1, 1], [], []>} : vector<4x256xbf16>, vector<256x4096xbf16>, vector<4x4096xf32> -> vector<4x4096xf32>
    %24 = vector.extract_strided_slice %7 {offsets = [0, 0], sizes = [16, 256], strides = [1, 1]} : vector<64x256xf32> to vector<16x256xf32>
    %cst_12 = arith.constant dense<0.000000e+00> : vector<4x256xf32>
    %25 = tpu.matmul %20, %24, %cst_12 {dimension_numbers = #tpu.dot_dimension_numbers<[1], [0], [0], [1], [0, 0, 1, 1], [], []>} : vector<4x16xf32>, vector<16x256xf32>, vector<4x256xf32> -> vector<4x256xf32>
    %26 = vector.extract_strided_slice %23 {offsets = [0, 0], sizes = [4, 256], strides = [1, 1]} : vector<4x4096xf32> to vector<4x256xf32>
    %27 = vector.extract_strided_slice %24 {offsets = [0, 0], sizes = [1, 256], strides = [1, 1]} : vector<16x256xf32> to vector<1x256xf32>
    %28 = vector.broadcast %27 : vector<1x256xf32> to vector<4x256xf32>
    %29 = arith.mulf %26, %28 : vector<4x256xf32>
    %30 = arith.addf %25, %29 : vector<4x256xf32>
    %31 = vector.extract_strided_slice %23 {offsets = [0, 256], sizes = [4, 256], strides = [1, 1]} : vector<4x4096xf32> to vector<4x256xf32>
    %32 = vector.extract_strided_slice %24 {offsets = [1, 0], sizes = [1, 256], strides = [1, 1]} : vector<16x256xf32> to vector<1x256xf32>
    %33 = vector.broadcast %32 : vector<1x256xf32> to vector<4x256xf32>
    %34 = arith.mulf %31, %33 : vector<4x256xf32>
    %35 = arith.addf %30, %34 : vector<4x256xf32>
    %36 = vector.extract_strided_slice %23 {offsets = [0, 512], sizes = [4, 256], strides = [1, 1]} : vector<4x4096xf32> to vector<4x256xf32>
    %37 = vector.extract_strided_slice %24 {offsets = [2, 0], sizes = [1, 256], strides = [1, 1]} : vector<16x256xf32> to vector<1x256xf32>
    %38 = vector.broadcast %37 : vector<1x256xf32> to vector<4x256xf32>
    %39 = arith.mulf %36, %38 : vector<4x256xf32>
    %40 = arith.addf %35, %39 : vector<4x256xf32>
    %41 = vector.extract_strided_slice %23 {offsets = [0, 768], sizes = [4, 256], strides = [1, 1]} : vector<4x4096xf32> to vector<4x256xf32>
    %42 = vector.extract_strided_slice %24 {offsets = [3, 0], sizes = [1, 256], strides = [1, 1]} : vector<16x256xf32> to vector<1x256xf32>
    %43 = vector.broadcast %42 : vector<1x256xf32> to vector<4x256xf32>
    %44 = arith.mulf %41, %43 : vector<4x256xf32>
    %45 = arith.addf %40, %44 : vector<4x256xf32>
    %46 = vector.extract_strided_slice %23 {offsets = [0, 1024], sizes = [4, 256], strides = [1, 1]} : vector<4x4096xf32> to vector<4x256xf32>
    %47 = vector.extract_strided_slice %24 {offsets = [4, 0], sizes = [1, 256], strides = [1, 1]} : vector<16x256xf32> to vector<1x256xf32>
    %48 = vector.broadcast %47 : vector<1x256xf32> to vector<4x256xf32>
    %49 = arith.mulf %46, %48 : vector<4x256xf32>
    %50 = arith.addf %45, %49 : vector<4x256xf32>
    %51 = vector.extract_strided_slice %23 {offsets = [0, 1280], sizes = [4, 256], strides = [1, 1]} : vector<4x4096xf32> to vector<4x256xf32>
    %52 = vector.extract_strided_slice %24 {offsets = [5, 0], sizes = [1, 256], strides = [1, 1]} : vector<16x256xf32> to vector<1x256xf32>
    %53 = vector.broadcast %52 : vector<1x256xf32> to vector<4x256xf32>
    %54 = arith.mulf %51, %53 : vector<4x256xf32>
    %55 = arith.addf %50, %54 : vector<4x256xf32>
    %56 = vector.extract_strided_slice %23 {offsets = [0, 1536], sizes = [4, 256], strides = [1, 1]} : vector<4x4096xf32> to vector<4x256xf32>
    %57 = vector.extract_strided_slice %24 {offsets = [6, 0], sizes = [1, 256], strides = [1, 1]} : vector<16x256xf32> to vector<1x256xf32>
    %58 = vector.broadcast %57 : vector<1x256xf32> to vector<4x256xf32>
    %59 = arith.mulf %56, %58 : vector<4x256xf32>
    %60 = arith.addf %55, %59 : vector<4x256xf32>
    %61 = vector.extract_strided_slice %23 {offsets = [0, 1792], sizes = [4, 256], strides = [1, 1]} : vector<4x4096xf32> to vector<4x256xf32>
    %62 = vector.extract_strided_slice %24 {offsets = [7, 0], sizes = [1, 256], strides = [1, 1]} : vector<16x256xf32> to vector<1x256xf32>
    %63 = vector.broadcast %62 : vector<1x256xf32> to vector<4x256xf32>
    %64 = arith.mulf %61, %63 : vector<4x256xf32>
    %65 = arith.addf %60, %64 : vector<4x256xf32>
    %66 = vector.extract_strided_slice %23 {offsets = [0, 2048], sizes = [4, 256], strides = [1, 1]} : vector<4x4096xf32> to vector<4x256xf32>
    %67 = vector.extract_strided_slice %24 {offsets = [8, 0], sizes = [1, 256], strides = [1, 1]} : vector<16x256xf32> to vector<1x256xf32>
    %68 = vector.broadcast %67 : vector<1x256xf32> to vector<4x256xf32>
    %69 = arith.mulf %66, %68 : vector<4x256xf32>
    %70 = arith.addf %65, %69 : vector<4x256xf32>
    %71 = vector.extract_strided_slice %23 {offsets = [0, 2304], sizes = [4, 256], strides = [1, 1]} : vector<4x4096xf32> to vector<4x256xf32>
    %72 = vector.extract_strided_slice %24 {offsets = [9, 0], sizes = [1, 256], strides = [1, 1]} : vector<16x256xf32> to vector<1x256xf32>
    %73 = vector.broadcast %72 : vector<1x256xf32> to vector<4x256xf32>
    %74 = arith.mulf %71, %73 : vector<4x256xf32>
    %75 = arith.addf %70, %74 : vector<4x256xf32>
    %76 = vector.extract_strided_slice %23 {offsets = [0, 2560], sizes = [4, 256], strides = [1, 1]} : vector<4x4096xf32> to vector<4x256xf32>
    %77 = vector.extract_strided_slice %24 {offsets = [10, 0], sizes = [1, 256], strides = [1, 1]} : vector<16x256xf32> to vector<1x256xf32>
    %78 = vector.broadcast %77 : vector<1x256xf32> to vector<4x256xf32>
    %79 = arith.mulf %76, %78 : vector<4x256xf32>
    %80 = arith.addf %75, %79 : vector<4x256xf32>
    %81 = vector.extract_strided_slice %23 {offsets = [0, 2816], sizes = [4, 256], strides = [1, 1]} : vector<4x4096xf32> to vector<4x256xf32>
    %82 = vector.extract_strided_slice %24 {offsets = [11, 0], sizes = [1, 256], strides = [1, 1]} : vector<16x256xf32> to vector<1x256xf32>
    %83 = vector.broadcast %82 : vector<1x256xf32> to vector<4x256xf32>
    %84 = arith.mulf %81, %83 : vector<4x256xf32>
    %85 = arith.addf %80, %84 : vector<4x256xf32>
    %86 = vector.extract_strided_slice %23 {offsets = [0, 3072], sizes = [4, 256], strides = [1, 1]} : vector<4x4096xf32> to vector<4x256xf32>
    %87 = vector.extract_strided_slice %24 {offsets = [12, 0], sizes = [1, 256], strides = [1, 1]} : vector<16x256xf32> to vector<1x256xf32>
    %88 = vector.broadcast %87 : vector<1x256xf32> to vector<4x256xf32>
    %89 = arith.mulf %86, %88 : vector<4x256xf32>
    %90 = arith.addf %85, %89 : vector<4x256xf32>
    %91 = vector.extract_strided_slice %23 {offsets = [0, 3328], sizes = [4, 256], strides = [1, 1]} : vector<4x4096xf32> to vector<4x256xf32>
    %92 = vector.extract_strided_slice %24 {offsets = [13, 0], sizes = [1, 256], strides = [1, 1]} : vector<16x256xf32> to vector<1x256xf32>
    %93 = vector.broadcast %92 : vector<1x256xf32> to vector<4x256xf32>
    %94 = arith.mulf %91, %93 : vector<4x256xf32>
    %95 = arith.addf %90, %94 : vector<4x256xf32>
    %96 = vector.extract_strided_slice %23 {offsets = [0, 3584], sizes = [4, 256], strides = [1, 1]} : vector<4x4096xf32> to vector<4x256xf32>
    %97 = vector.extract_strided_slice %24 {offsets = [14, 0], sizes = [1, 256], strides = [1, 1]} : vector<16x256xf32> to vector<1x256xf32>
    %98 = vector.broadcast %97 : vector<1x256xf32> to vector<4x256xf32>
    %99 = arith.mulf %96, %98 : vector<4x256xf32>
    %100 = arith.addf %95, %99 : vector<4x256xf32>
    %101 = vector.extract_strided_slice %23 {offsets = [0, 3840], sizes = [4, 256], strides = [1, 1]} : vector<4x4096xf32> to vector<4x256xf32>
    %102 = vector.extract_strided_slice %24 {offsets = [15, 0], sizes = [1, 256], strides = [1, 1]} : vector<16x256xf32> to vector<1x256xf32>
    %103 = vector.broadcast %102 : vector<1x256xf32> to vector<4x256xf32>
    %104 = arith.mulf %101, %103 : vector<4x256xf32>
    %105 = arith.addf %100, %104 : vector<4x256xf32>
    %c0_13 = arith.constant 0 : index
    %c0_14 = arith.constant 0 : index
    %c0_15 = arith.constant 0 : index
    %106 = vector.load %arg5[%c0_13, %c0_14, %c0_15] : memref<1x16x256xf32, #tpu.memory_space<vmem>>, vector<1x4x256xf32>
    %107 = vector.shape_cast %106 : vector<1x4x256xf32> to vector<4x256xf32>
    %108 = vector.shape_cast %105 : vector<4x256xf32> to vector<1x4x256xf32>
    tpu.vector_store %arg5[%c0_13, %c0_14, %c0_15], %108 {strides = array<i32>} : memref<1x16x256xf32, #tpu.memory_space<vmem>>, vector<1x4x256xf32>,
    %109 = vector.extract_strided_slice %7 {offsets = [16, 0], sizes = [16, 256], strides = [1, 1]} : vector<64x256xf32> to vector<16x256xf32>
    %cst_16 = arith.constant dense<0.000000e+00> : vector<4x256xf32>
    %110 = tpu.matmul %20, %109, %cst_16 {dimension_numbers = #tpu.dot_dimension_numbers<[1], [0], [0], [1], [0, 0, 1, 1], [], []>} : vector<4x16xf32>, vector<16x256xf32>, vector<4x256xf32> -> vector<4x256xf32>
    %111 = vector.extract_strided_slice %23 {offsets = [0, 0], sizes = [4, 256], strides = [1, 1]} : vector<4x4096xf32> to vector<4x256xf32>
    %112 = vector.extract_strided_slice %109 {offsets = [0, 0], sizes = [1, 256], strides = [1, 1]} : vector<16x256xf32> to vector<1x256xf32>
    %113 = vector.broadcast %112 : vector<1x256xf32> to vector<4x256xf32>
    %114 = arith.mulf %111, %113 : vector<4x256xf32>
    %115 = arith.addf %110, %114 : vector<4x256xf32>
    %116 = vector.extract_strided_slice %23 {offsets = [0, 256], sizes = [4, 256], strides = [1, 1]} : vector<4x4096xf32> to vector<4x256xf32>
    %117 = vector.extract_strided_slice %109 {offsets = [1, 0], sizes = [1, 256], strides = [1, 1]} : vector<16x256xf32> to vector<1x256xf32>
    %118 = vector.broadcast %117 : vector<1x256xf32> to vector<4x256xf32>
    %119 = arith.mulf %116, %118 : vector<4x256xf32>
    %120 = arith.addf %115, %119 : vector<4x256xf32>
    %121 = vector.extract_strided_slice %23 {offsets = [0, 512], sizes = [4, 256], strides = [1, 1]} : vector<4x4096xf32> to vector<4x256xf32>
    %122 = vector.extract_strided_slice %109 {offsets = [2, 0], sizes = [1, 256], strides = [1, 1]} : vector<16x256xf32> to vector<1x256xf32>
    %123 = vector.broadcast %122 : vector<1x256xf32> to vector<4x256xf32>
    %124 = arith.mulf %121, %123 : vector<4x256xf32>
    %125 = arith.addf %120, %124 : vector<4x256xf32>
    %126 = vector.extract_strided_slice %23 {offsets = [0, 768], sizes = [4, 256], strides = [1, 1]} : vector<4x4096xf32> to vector<4x256xf32>
    %127 = vector.extract_strided_slice %109 {offsets = [3, 0], sizes = [1, 256], strides = [1, 1]} : vector<16x256xf32> to vector<1x256xf32>
    %128 = vector.broadcast %127 : vector<1x256xf32> to vector<4x256xf32>
    %129 = arith.mulf %126, %128 : vector<4x256xf32>
    %130 = arith.addf %125, %129 : vector<4x256xf32>
    %131 = vector.extract_strided_slice %23 {offsets = [0, 1024], sizes = [4, 256], strides = [1, 1]} : vector<4x4096xf32> to vector<4x256xf32>
    %132 = vector.extract_strided_slice %109 {offsets = [4, 0], sizes = [1, 256], strides = [1, 1]} : vector<16x256xf32> to vector<1x256xf32>
    %133 = vector.broadcast %132 : vector<1x256xf32> to vector<4x256xf32>
    %134 = arith.mulf %131, %133 : vector<4x256xf32>
    %135 = arith.addf %130, %134 : vector<4x256xf32>
    %136 = vector.extract_strided_slice %23 {offsets = [0, 1280], sizes = [4, 256], strides = [1, 1]} : vector<4x4096xf32> to vector<4x256xf32>
    %137 = vector.extract_strided_slice %109 {offsets = [5, 0], sizes = [1, 256], strides = [1, 1]} : vector<16x256xf32> to vector<1x256xf32>
    %138 = vector.broadcast %137 : vector<1x256xf32> to vector<4x256xf32>
    %139 = arith.mulf %136, %138 : vector<4x256xf32>
    %140 = arith.addf %135, %139 : vector<4x256xf32>
    %141 = vector.extract_strided_slice %23 {offsets = [0, 1536], sizes = [4, 256], strides = [1, 1]} : vector<4x4096xf32> to vector<4x256xf32>
    %142 = vector.extract_strided_slice %109 {offsets = [6, 0], sizes = [1, 256], strides = [1, 1]} : vector<16x256xf32> to vector<1x256xf32>
    %143 = vector.broadcast %142 : vector<1x256xf32> to vector<4x256xf32>
    %144 = arith.mulf %141, %143 : vector<4x256xf32>
    %145 = arith.addf %140, %144 : vector<4x256xf32>
    %146 = vector.extract_strided_slice %23 {offsets = [0, 1792], sizes = [4, 256], strides = [1, 1]} : vector<4x4096xf32> to vector<4x256xf32>
    %147 = vector.extract_strided_slice %109 {offsets = [7, 0], sizes = [1, 256], strides = [1, 1]} : vector<16x256xf32> to vector<1x256xf32>
    %148 = vector.broadcast %147 : vector<1x256xf32> to vector<4x256xf32>
    %149 = arith.mulf %146, %148 : vector<4x256xf32>
    %150 = arith.addf %145, %149 : vector<4x256xf32>
    %151 = vector.extract_strided_slice %23 {offsets = [0, 2048], sizes = [4, 256], strides = [1, 1]} : vector<4x4096xf32> to vector<4x256xf32>
    %152 = vector.extract_strided_slice %109 {offsets = [8, 0], sizes = [1, 256], strides = [1, 1]} : vector<16x256xf32> to vector<1x256xf32>
    %153 = vector.broadcast %152 : vector<1x256xf32> to vector<4x256xf32>
    %154 = arith.mulf %151, %153 : vector<4x256xf32>
    %155 = arith.addf %150, %154 : vector<4x256xf32>
    %156 = vector.extract_strided_slice %23 {offsets = [0, 2304], sizes = [4, 256], strides = [1, 1]} : vector<4x4096xf32> to vector<4x256xf32>
    %157 = vector.extract_strided_slice %109 {offsets = [9, 0], sizes = [1, 256], strides = [1, 1]} : vector<16x256xf32> to vector<1x256xf32>
    %158 = vector.broadcast %157 : vector<1x256xf32> to vector<4x256xf32>
    %159 = arith.mulf %156, %158 : vector<4x256xf32>
    %160 = arith.addf %155, %159 : vector<4x256xf32>
    %161 = vector.extract_strided_slice %23 {offsets = [0, 2560], sizes = [4, 256], strides = [1, 1]} : vector<4x4096xf32> to vector<4x256xf32>
    %162 = vector.extract_strided_slice %109 {offsets = [10, 0], sizes = [1, 256], strides = [1, 1]} : vector<16x256xf32> to vector<1x256xf32>
    %163 = vector.broadcast %162 : vector<1x256xf32> to vector<4x256xf32>
    %164 = arith.mulf %161, %163 : vector<4x256xf32>
    %165 = arith.addf %160, %164 : vector<4x256xf32>
    %166 = vector.extract_strided_slice %23 {offsets = [0, 2816], sizes = [4, 256], strides = [1, 1]} : vector<4x4096xf32> to vector<4x256xf32>
    %167 = vector.extract_strided_slice %109 {offsets = [11, 0], sizes = [1, 256], strides = [1, 1]} : vector<16x256xf32> to vector<1x256xf32>
    %168 = vector.broadcast %167 : vector<1x256xf32> to vector<4x256xf32>
    %169 = arith.mulf %166, %168 : vector<4x256xf32>
    %170 = arith.addf %165, %169 : vector<4x256xf32>
    %171 = vector.extract_strided_slice %23 {offsets = [0, 3072], sizes = [4, 256], strides = [1, 1]} : vector<4x4096xf32> to vector<4x256xf32>
    %172 = vector.extract_strided_slice %109 {offsets = [12, 0], sizes = [1, 256], strides = [1, 1]} : vector<16x256xf32> to vector<1x256xf32>
    %173 = vector.broadcast %172 : vector<1x256xf32> to vector<4x256xf32>
    %174 = arith.mulf %171, %173 : vector<4x256xf32>
    %175 = arith.addf %170, %174 : vector<4x256xf32>
    %176 = vector.extract_strided_slice %23 {offsets = [0, 3328], sizes = [4, 256], strides = [1, 1]} : vector<4x4096xf32> to vector<4x256xf32>
    %177 = vector.extract_strided_slice %109 {offsets = [13, 0], sizes = [1, 256], strides = [1, 1]} : vector<16x256xf32> to vector<1x256xf32>
    %178 = vector.broadcast %177 : vector<1x256xf32> to vector<4x256xf32>
    %179 = arith.mulf %176, %178 : vector<4x256xf32>
    %180 = arith.addf %175, %179 : vector<4x256xf32>
    %181 = vector.extract_strided_slice %23 {offsets = [0, 3584], sizes = [4, 256], strides = [1, 1]} : vector<4x4096xf32> to vector<4x256xf32>
    %182 = vector.extract_strided_slice %109 {offsets = [14, 0], sizes = [1, 256], strides = [1, 1]} : vector<16x256xf32> to vector<1x256xf32>
    %183 = vector.broadcast %182 : vector<1x256xf32> to vector<4x256xf32>
    %184 = arith.mulf %181, %183 : vector<4x256xf32>
    %185 = arith.addf %180, %184 : vector<4x256xf32>
    %186 = vector.extract_strided_slice %23 {offsets = [0, 3840], sizes = [4, 256], strides = [1, 1]} : vector<4x4096xf32> to vector<4x256xf32>
    %187 = vector.extract_strided_slice %109 {offsets = [15, 0], sizes = [1, 256], strides = [1, 1]} : vector<16x256xf32> to vector<1x256xf32>
    %188 = vector.broadcast %187 : vector<1x256xf32> to vector<4x256xf32>
    %189 = arith.mulf %186, %188 : vector<4x256xf32>
    %190 = arith.addf %185, %189 : vector<4x256xf32>
    %c0_17 = arith.constant 0 : index
    %c4 = arith.constant 4 : index
    %c0_18 = arith.constant 0 : index
    %191 = vector.load %arg5[%c0_17, %c4, %c0_18] : memref<1x16x256xf32, #tpu.memory_space<vmem>>, vector<1x4x256xf32>
    %192 = vector.shape_cast %191 : vector<1x4x256xf32> to vector<4x256xf32>
    %193 = vector.shape_cast %190 : vector<4x256xf32> to vector<1x4x256xf32>
    tpu.vector_store %arg5[%c0_17, %c4, %c0_18], %193 {strides = array<i32>} : memref<1x16x256xf32, #tpu.memory_space<vmem>>, vector<1x4x256xf32>,
    %194 = vector.extract_strided_slice %7 {offsets = [32, 0], sizes = [16, 256], strides = [1, 1]} : vector<64x256xf32> to vector<16x256xf32>
    %cst_19 = arith.constant dense<0.000000e+00> : vector<4x256xf32>
    %195 = tpu.matmul %20, %194, %cst_19 {dimension_numbers = #tpu.dot_dimension_numbers<[1], [0], [0], [1], [0, 0, 1, 1], [], []>} : vector<4x16xf32>, vector<16x256xf32>, vector<4x256xf32> -> vector<4x256xf32>
    %196 = vector.extract_strided_slice %23 {offsets = [0, 0], sizes = [4, 256], strides = [1, 1]} : vector<4x4096xf32> to vector<4x256xf32>
    %197 = vector.extract_strided_slice %194 {offsets = [0, 0], sizes = [1, 256], strides = [1, 1]} : vector<16x256xf32> to vector<1x256xf32>
    %198 = vector.broadcast %197 : vector<1x256xf32> to vector<4x256xf32>
    %199 = arith.mulf %196, %198 : vector<4x256xf32>
    %200 = arith.addf %195, %199 : vector<4x256xf32>
    %201 = vector.extract_strided_slice %23 {offsets = [0, 256], sizes = [4, 256], strides = [1, 1]} : vector<4x4096xf32> to vector<4x256xf32>
    %202 = vector.extract_strided_slice %194 {offsets = [1, 0], sizes = [1, 256], strides = [1, 1]} : vector<16x256xf32> to vector<1x256xf32>
    %203 = vector.broadcast %202 : vector<1x256xf32> to vector<4x256xf32>
    %204 = arith.mulf %201, %203 : vector<4x256xf32>
    %205 = arith.addf %200, %204 : vector<4x256xf32>
    %206 = vector.extract_strided_slice %23 {offsets = [0, 512], sizes = [4, 256], strides = [1, 1]} : vector<4x4096xf32> to vector<4x256xf32>
    %207 = vector.extract_strided_slice %194 {offsets = [2, 0], sizes = [1, 256], strides = [1, 1]} : vector<16x256xf32> to vector<1x256xf32>
    %208 = vector.broadcast %207 : vector<1x256xf32> to vector<4x256xf32>
    %209 = arith.mulf %206, %208 : vector<4x256xf32>
    %210 = arith.addf %205, %209 : vector<4x256xf32>
    %211 = vector.extract_strided_slice %23 {offsets = [0, 768], sizes = [4, 256], strides = [1, 1]} : vector<4x4096xf32> to vector<4x256xf32>
    %212 = vector.extract_strided_slice %194 {offsets = [3, 0], sizes = [1, 256], strides = [1, 1]} : vector<16x256xf32> to vector<1x256xf32>
    %213 = vector.broadcast %212 : vector<1x256xf32> to vector<4x256xf32>
    %214 = arith.mulf %211, %213 : vector<4x256xf32>
    %215 = arith.addf %210, %214 : vector<4x256xf32>
    %216 = vector.extract_strided_slice %23 {offsets = [0, 1024], sizes = [4, 256], strides = [1, 1]} : vector<4x4096xf32> to vector<4x256xf32>
    %217 = vector.extract_strided_slice %194 {offsets = [4, 0], sizes = [1, 256], strides = [1, 1]} : vector<16x256xf32> to vector<1x256xf32>
    %218 = vector.broadcast %217 : vector<1x256xf32> to vector<4x256xf32>
    %219 = arith.mulf %216, %218 : vector<4x256xf32>
    %220 = arith.addf %215, %219 : vector<4x256xf32>
    %221 = vector.extract_strided_slice %23 {offsets = [0, 1280], sizes = [4, 256], strides = [1, 1]} : vector<4x4096xf32> to vector<4x256xf32>
    %222 = vector.extract_strided_slice %194 {offsets = [5, 0], sizes = [1, 256], strides = [1, 1]} : vector<16x256xf32> to vector<1x256xf32>
    %223 = vector.broadcast %222 : vector<1x256xf32> to vector<4x256xf32>
    %224 = arith.mulf %221, %223 : vector<4x256xf32>
    %225 = arith.addf %220, %224 : vector<4x256xf32>
    %226 = vector.extract_strided_slice %23 {offsets = [0, 1536], sizes = [4, 256], strides = [1, 1]} : vector<4x4096xf32> to vector<4x256xf32>
    %227 = vector.extract_strided_slice %194 {offsets = [6, 0], sizes = [1, 256], strides = [1, 1]} : vector<16x256xf32> to vector<1x256xf32>
    %228 = vector.broadcast %227 : vector<1x256xf32> to vector<4x256xf32>
    %229 = arith.mulf %226, %228 : vector<4x256xf32>
    %230 = arith.addf %225, %229 : vector<4x256xf32>
    %231 = vector.extract_strided_slice %23 {offsets = [0, 1792], sizes = [4, 256], strides = [1, 1]} : vector<4x4096xf32> to vector<4x256xf32>
    %232 = vector.extract_strided_slice %194 {offsets = [7, 0], sizes = [1, 256], strides = [1, 1]} : vector<16x256xf32> to vector<1x256xf32>
    %233 = vector.broadcast %232 : vector<1x256xf32> to vector<4x256xf32>
    %234 = arith.mulf %231, %233 : vector<4x256xf32>
    %235 = arith.addf %230, %234 : vector<4x256xf32>
    %236 = vector.extract_strided_slice %23 {offsets = [0, 2048], sizes = [4, 256], strides = [1, 1]} : vector<4x4096xf32> to vector<4x256xf32>
    %237 = vector.extract_strided_slice %194 {offsets = [8, 0], sizes = [1, 256], strides = [1, 1]} : vector<16x256xf32> to vector<1x256xf32>
    %238 = vector.broadcast %237 : vector<1x256xf32> to vector<4x256xf32>
    %239 = arith.mulf %236, %238 : vector<4x256xf32>
    %240 = arith.addf %235, %239 : vector<4x256xf32>
    %241 = vector.extract_strided_slice %23 {offsets = [0, 2304], sizes = [4, 256], strides = [1, 1]} : vector<4x4096xf32> to vector<4x256xf32>
    %242 = vector.extract_strided_slice %194 {offsets = [9, 0], sizes = [1, 256], strides = [1, 1]} : vector<16x256xf32> to vector<1x256xf32>
    %243 = vector.broadcast %242 : vector<1x256xf32> to vector<4x256xf32>
    %244 = arith.mulf %241, %243 : vector<4x256xf32>
    %245 = arith.addf %240, %244 : vector<4x256xf32>
    %246 = vector.extract_strided_slice %23 {offsets = [0, 2560], sizes = [4, 256], strides = [1, 1]} : vector<4x4096xf32> to vector<4x256xf32>
    %247 = vector.extract_strided_slice %194 {offsets = [10, 0], sizes = [1, 256], strides = [1, 1]} : vector<16x256xf32> to vector<1x256xf32>
    %248 = vector.broadcast %247 : vector<1x256xf32> to vector<4x256xf32>
    %249 = arith.mulf %246, %248 : vector<4x256xf32>
    %250 = arith.addf %245, %249 : vector<4x256xf32>
    %251 = vector.extract_strided_slice %23 {offsets = [0, 2816], sizes = [4, 256], strides = [1, 1]} : vector<4x4096xf32> to vector<4x256xf32>
    %252 = vector.extract_strided_slice %194 {offsets = [11, 0], sizes = [1, 256], strides = [1, 1]} : vector<16x256xf32> to vector<1x256xf32>
    %253 = vector.broadcast %252 : vector<1x256xf32> to vector<4x256xf32>
    %254 = arith.mulf %251, %253 : vector<4x256xf32>
    %255 = arith.addf %250, %254 : vector<4x256xf32>
    %256 = vector.extract_strided_slice %23 {offsets = [0, 3072], sizes = [4, 256], strides = [1, 1]} : vector<4x4096xf32> to vector<4x256xf32>
    %257 = vector.extract_strided_slice %194 {offsets = [12, 0], sizes = [1, 256], strides = [1, 1]} : vector<16x256xf32> to vector<1x256xf32>
    %258 = vector.broadcast %257 : vector<1x256xf32> to vector<4x256xf32>
    %259 = arith.mulf %256, %258 : vector<4x256xf32>
    %260 = arith.addf %255, %259 : vector<4x256xf32>
    %261 = vector.extract_strided_slice %23 {offsets = [0, 3328], sizes = [4, 256], strides = [1, 1]} : vector<4x4096xf32> to vector<4x256xf32>
    %262 = vector.extract_strided_slice %194 {offsets = [13, 0], sizes = [1, 256], strides = [1, 1]} : vector<16x256xf32> to vector<1x256xf32>
    %263 = vector.broadcast %262 : vector<1x256xf32> to vector<4x256xf32>
    %264 = arith.mulf %261, %263 : vector<4x256xf32>
    %265 = arith.addf %260, %264 : vector<4x256xf32>
    %266 = vector.extract_strided_slice %23 {offsets = [0, 3584], sizes = [4, 256], strides = [1, 1]} : vector<4x4096xf32> to vector<4x256xf32>
    %267 = vector.extract_strided_slice %194 {offsets = [14, 0], sizes = [1, 256], strides = [1, 1]} : vector<16x256xf32> to vector<1x256xf32>
    %268 = vector.broadcast %267 : vector<1x256xf32> to vector<4x256xf32>
    %269 = arith.mulf %266, %268 : vector<4x256xf32>
    %270 = arith.addf %265, %269 : vector<4x256xf32>
    %271 = vector.extract_strided_slice %23 {offsets = [0, 3840], sizes = [4, 256], strides = [1, 1]} : vector<4x4096xf32> to vector<4x256xf32>
    %272 = vector.extract_strided_slice %194 {offsets = [15, 0], sizes = [1, 256], strides = [1, 1]} : vector<16x256xf32> to vector<1x256xf32>
    %273 = vector.broadcast %272 : vector<1x256xf32> to vector<4x256xf32>
    %274 = arith.mulf %271, %273 : vector<4x256xf32>
    %275 = arith.addf %270, %274 : vector<4x256xf32>
    %c0_20 = arith.constant 0 : index
    %c8 = arith.constant 8 : index
    %c0_21 = arith.constant 0 : index
    %276 = vector.load %arg5[%c0_20, %c8, %c0_21] : memref<1x16x256xf32, #tpu.memory_space<vmem>>, vector<1x4x256xf32>
    %277 = vector.shape_cast %276 : vector<1x4x256xf32> to vector<4x256xf32>
    %278 = vector.shape_cast %275 : vector<4x256xf32> to vector<1x4x256xf32>
    tpu.vector_store %arg5[%c0_20, %c8, %c0_21], %278 {strides = array<i32>} : memref<1x16x256xf32, #tpu.memory_space<vmem>>, vector<1x4x256xf32>,
    %279 = vector.extract_strided_slice %7 {offsets = [48, 0], sizes = [16, 256], strides = [1, 1]} : vector<64x256xf32> to vector<16x256xf32>
    %cst_22 = arith.constant dense<0.000000e+00> : vector<4x256xf32>
    %280 = tpu.matmul %20, %279, %cst_22 {dimension_numbers = #tpu.dot_dimension_numbers<[1], [0], [0], [1], [0, 0, 1, 1], [], []>} : vector<4x16xf32>, vector<16x256xf32>, vector<4x256xf32> -> vector<4x256xf32>
    %281 = vector.extract_strided_slice %23 {offsets = [0, 0], sizes = [4, 256], strides = [1, 1]} : vector<4x4096xf32> to vector<4x256xf32>
    %282 = vector.extract_strided_slice %279 {offsets = [0, 0], sizes = [1, 256], strides = [1, 1]} : vector<16x256xf32> to vector<1x256xf32>
    %283 = vector.broadcast %282 : vector<1x256xf32> to vector<4x256xf32>
    %284 = arith.mulf %281, %283 : vector<4x256xf32>
    %285 = arith.addf %280, %284 : vector<4x256xf32>
    %286 = vector.extract_strided_slice %23 {offsets = [0, 256], sizes = [4, 256], strides = [1, 1]} : vector<4x4096xf32> to vector<4x256xf32>
    %287 = vector.extract_strided_slice %279 {offsets = [1, 0], sizes = [1, 256], strides = [1, 1]} : vector<16x256xf32> to vector<1x256xf32>
    %288 = vector.broadcast %287 : vector<1x256xf32> to vector<4x256xf32>
    %289 = arith.mulf %286, %288 : vector<4x256xf32>
    %290 = arith.addf %285, %289 : vector<4x256xf32>
    %291 = vector.extract_strided_slice %23 {offsets = [0, 512], sizes = [4, 256], strides = [1, 1]} : vector<4x4096xf32> to vector<4x256xf32>
    %292 = vector.extract_strided_slice %279 {offsets = [2, 0], sizes = [1, 256], strides = [1, 1]} : vector<16x256xf32> to vector<1x256xf32>
    %293 = vector.broadcast %292 : vector<1x256xf32> to vector<4x256xf32>
    %294 = arith.mulf %291, %293 : vector<4x256xf32>
    %295 = arith.addf %290, %294 : vector<4x256xf32>
    %296 = vector.extract_strided_slice %23 {offsets = [0, 768], sizes = [4, 256], strides = [1, 1]} : vector<4x4096xf32> to vector<4x256xf32>
    %297 = vector.extract_strided_slice %279 {offsets = [3, 0], sizes = [1, 256], strides = [1, 1]} : vector<16x256xf32> to vector<1x256xf32>
    %298 = vector.broadcast %297 : vector<1x256xf32> to vector<4x256xf32>
    %299 = arith.mulf %296, %298 : vector<4x256xf32>
    %300 = arith.addf %295, %299 : vector<4x256xf32>
    %301 = vector.extract_strided_slice %23 {offsets = [0, 1024], sizes = [4, 256], strides = [1, 1]} : vector<4x4096xf32> to vector<4x256xf32>
    %302 = vector.extract_strided_slice %279 {offsets = [4, 0], sizes = [1, 256], strides = [1, 1]} : vector<16x256xf32> to vector<1x256xf32>
    %303 = vector.broadcast %302 : vector<1x256xf32> to vector<4x256xf32>
    %304 = arith.mulf %301, %303 : vector<4x256xf32>
    %305 = arith.addf %300, %304 : vector<4x256xf32>
    %306 = vector.extract_strided_slice %23 {offsets = [0, 1280], sizes = [4, 256], strides = [1, 1]} : vector<4x4096xf32> to vector<4x256xf32>
    %307 = vector.extract_strided_slice %279 {offsets = [5, 0], sizes = [1, 256], strides = [1, 1]} : vector<16x256xf32> to vector<1x256xf32>
    %308 = vector.broadcast %307 : vector<1x256xf32> to vector<4x256xf32>
    %309 = arith.mulf %306, %308 : vector<4x256xf32>
    %310 = arith.addf %305, %309 : vector<4x256xf32>
    %311 = vector.extract_strided_slice %23 {offsets = [0, 1536], sizes = [4, 256], strides = [1, 1]} : vector<4x4096xf32> to vector<4x256xf32>
    %312 = vector.extract_strided_slice %279 {offsets = [6, 0], sizes = [1, 256], strides = [1, 1]} : vector<16x256xf32> to vector<1x256xf32>
    %313 = vector.broadcast %312 : vector<1x256xf32> to vector<4x256xf32>
    %314 = arith.mulf %311, %313 : vector<4x256xf32>
    %315 = arith.addf %310, %314 : vector<4x256xf32>
    %316 = vector.extract_strided_slice %23 {offsets = [0, 1792], sizes = [4, 256], strides = [1, 1]} : vector<4x4096xf32> to vector<4x256xf32>
    %317 = vector.extract_strided_slice %279 {offsets = [7, 0], sizes = [1, 256], strides = [1, 1]} : vector<16x256xf32> to vector<1x256xf32>
    %318 = vector.broadcast %317 : vector<1x256xf32> to vector<4x256xf32>
    %319 = arith.mulf %316, %318 : vector<4x256xf32>
    %320 = arith.addf %315, %319 : vector<4x256xf32>
    %321 = vector.extract_strided_slice %23 {offsets = [0, 2048], sizes = [4, 256], strides = [1, 1]} : vector<4x4096xf32> to vector<4x256xf32>
    %322 = vector.extract_strided_slice %279 {offsets = [8, 0], sizes = [1, 256], strides = [1, 1]} : vector<16x256xf32> to vector<1x256xf32>
    %323 = vector.broadcast %322 : vector<1x256xf32> to vector<4x256xf32>
    %324 = arith.mulf %321, %323 : vector<4x256xf32>
    %325 = arith.addf %320, %324 : vector<4x256xf32>
    %326 = vector.extract_strided_slice %23 {offsets = [0, 2304], sizes = [4, 256], strides = [1, 1]} : vector<4x4096xf32> to vector<4x256xf32>
    %327 = vector.extract_strided_slice %279 {offsets = [9, 0], sizes = [1, 256], strides = [1, 1]} : vector<16x256xf32> to vector<1x256xf32>
    %328 = vector.broadcast %327 : vector<1x256xf32> to vector<4x256xf32>
    %329 = arith.mulf %326, %328 : vector<4x256xf32>
    %330 = arith.addf %325, %329 : vector<4x256xf32>
    %331 = vector.extract_strided_slice %23 {offsets = [0, 2560], sizes = [4, 256], strides = [1, 1]} : vector<4x4096xf32> to vector<4x256xf32>
    %332 = vector.extract_strided_slice %279 {offsets = [10, 0], sizes = [1, 256], strides = [1, 1]} : vector<16x256xf32> to vector<1x256xf32>
    %333 = vector.broadcast %332 : vector<1x256xf32> to vector<4x256xf32>
    %334 = arith.mulf %331, %333 : vector<4x256xf32>
    %335 = arith.addf %330, %334 : vector<4x256xf32>
    %336 = vector.extract_strided_slice %23 {offsets = [0, 2816], sizes = [4, 256], strides = [1, 1]} : vector<4x4096xf32> to vector<4x256xf32>
    %337 = vector.extract_strided_slice %279 {offsets = [11, 0], sizes = [1, 256], strides = [1, 1]} : vector<16x256xf32> to vector<1x256xf32>
    %338 = vector.broadcast %337 : vector<1x256xf32> to vector<4x256xf32>
    %339 = arith.mulf %336, %338 : vector<4x256xf32>
    %340 = arith.addf %335, %339 : vector<4x256xf32>
    %341 = vector.extract_strided_slice %23 {offsets = [0, 3072], sizes = [4, 256], strides = [1, 1]} : vector<4x4096xf32> to vector<4x256xf32>
    %342 = vector.extract_strided_slice %279 {offsets = [12, 0], sizes = [1, 256], strides = [1, 1]} : vector<16x256xf32> to vector<1x256xf32>
    %343 = vector.broadcast %342 : vector<1x256xf32> to vector<4x256xf32>
    %344 = arith.mulf %341, %343 : vector<4x256xf32>
    %345 = arith.addf %340, %344 : vector<4x256xf32>
    %346 = vector.extract_strided_slice %23 {offsets = [0, 3328], sizes = [4, 256], strides = [1, 1]} : vector<4x4096xf32> to vector<4x256xf32>
    %347 = vector.extract_strided_slice %279 {offsets = [13, 0], sizes = [1, 256], strides = [1, 1]} : vector<16x256xf32> to vector<1x256xf32>
    %348 = vector.broadcast %347 : vector<1x256xf32> to vector<4x256xf32>
    %349 = arith.mulf %346, %348 : vector<4x256xf32>
    %350 = arith.addf %345, %349 : vector<4x256xf32>
    %351 = vector.extract_strided_slice %23 {offsets = [0, 3584], sizes = [4, 256], strides = [1, 1]} : vector<4x4096xf32> to vector<4x256xf32>
    %352 = vector.extract_strided_slice %279 {offsets = [14, 0], sizes = [1, 256], strides = [1, 1]} : vector<16x256xf32> to vector<1x256xf32>
    %353 = vector.broadcast %352 : vector<1x256xf32> to vector<4x256xf32>
    %354 = arith.mulf %351, %353 : vector<4x256xf32>
    %355 = arith.addf %350, %354 : vector<4x256xf32>
    %356 = vector.extract_strided_slice %23 {offsets = [0, 3840], sizes = [4, 256], strides = [1, 1]} : vector<4x4096xf32> to vector<4x256xf32>
    %357 = vector.extract_strided_slice %279 {offsets = [15, 0], sizes = [1, 256], strides = [1, 1]} : vector<16x256xf32> to vector<1x256xf32>
    %358 = vector.broadcast %357 : vector<1x256xf32> to vector<4x256xf32>
    %359 = arith.mulf %356, %358 : vector<4x256xf32>
    %360 = arith.addf %355, %359 : vector<4x256xf32>
    %c0_23 = arith.constant 0 : index
    %c12 = arith.constant 12 : index
    %c0_24 = arith.constant 0 : index
    %361 = vector.load %arg5[%c0_23, %c12, %c0_24] : memref<1x16x256xf32, #tpu.memory_space<vmem>>, vector<1x4x256xf32>
    %362 = vector.shape_cast %361 : vector<1x4x256xf32> to vector<4x256xf32>
    %363 = vector.shape_cast %360 : vector<4x256xf32> to vector<1x4x256xf32>
    tpu.vector_store %arg5[%c0_23, %c12, %c0_24], %363 {strides = array<i32>} : memref<1x16x256xf32, #tpu.memory_space<vmem>>, vector<1x4x256xf32>,
    return
  }
  func.func @transform_0(%arg0: i32) -> (i32, i32, i32) {
    %c0_i32 = arith.constant 0 : i32
    %c0_i32_0 = arith.constant 0 : i32
    %c0_i32_1 = arith.constant 0 : i32
    return %arg0, %c0_i32, %c0_i32_0 : i32, i32, i32
  }
  func.func @transform_1(%arg0: i32) -> (i32, i32) {
    %c0_i32 = arith.constant 0 : i32
    %c0_i32_0 = arith.constant 0 : i32
    %c0_i32_1 = arith.constant 0 : i32
    return %c0_i32, %c0_i32_0 : i32, i32
  }
  func.func @transform_2(%arg0: i32) -> (i32, i32) {
    %c0_i32 = arith.constant 0 : i32
    %c0_i32_0 = arith.constant 0 : i32
    %c0_i32_1 = arith.constant 0 : i32
    return %c0_i32, %c0_i32_0 : i32, i32
  }
  func.func @transform_3(%arg0: i32) -> (i32, i32) {
    %c0_i32 = arith.constant 0 : i32
    %c0_i32_0 = arith.constant 0 : i32
    %c0_i32_1 = arith.constant 0 : i32
    return %c0_i32, %c0_i32_0 : i32, i32
  }
  func.func @transform_4(%arg0: i32) -> (i32, i32, i32) {
    %c0_i32 = arith.constant 0 : i32
    %c0_i32_0 = arith.constant 0 : i32
    %c0_i32_1 = arith.constant 0 : i32
    return %arg0, %c0_i32, %c0_i32_0 : i32, i32, i32
  }
}

</mosaic_0001>

<bundles_post_ra>
// kernel: lambda_layer_2d.1
= control target key start
LH: loop header
LB: loop body
LE: loop exit
PB: predicated region body
PF: predicated region fallthrough
CT: control target
= control target key end

     0   :  { %s6023_s15 = smov 0   ;;  %s8524_s0 = inlined_call_operand.vmem [shape: f32[2,4,256], index: 0, kind: input, shape index: {}]   ;;  %s8525_s1 = inlined_call_operand.vmem [shape: f32[84,4], index: 1, kind: input, shape index: {}]   ;;  %s8526_s2 = inlined_call_operand.vmem [shape: f32[84,1], index: 2, kind: input, shape index: {}]   ;;  %s8527_s3 = inlined_call_operand.vmem [shape: bf16[256,4096], index: 3, kind: input, shape index: {}]   ;;  %s8528_s4 = inlined_call_operand.vmem [shape: f32[2,16,256], index: 4, kind: output, shape index: {}]  }
   0x1 LB: > { %s5401_s16 = sadd.s32 4294967295, %s5994_s15   ;;  %p5405_p0 = scmp.ge.s32.totalorder %s5994_s15, 1  ;;  %s5994_s15 = sphi %s6023_s15, %s14_s15  }
   0x2   : > { %p162_p1 = scmp.lt.s32.totalorder %s5994_s15, 3 }
   0x4   : > { %p163_p2 = pnand %p5405_p0, %p162_p1 }
   0x6   : > { %166 = sbr.rel (%p163_p2) target bundleno = 1367 (0x557), region = 36 }
   0xd   : > { %p188_p3 = scmp.lt.s32.totalorder %s5401_s16, 1  ;;  %v8529_v0 = vmov 0.0   ;;  %v5997_v1 = vmov 0   ;;  %v218_v2 = vld [vmem:[%s8526_s2 + $0x40] sm:$0xff]  ;;  %v219_v3 = vld [vmem:[%s8526_s2 + $0x48] sm:$0xff]  ;;  %vm312_vm0 = vcmask 1043456  }
   0xe   : > { %381 = vmatprep.mubr.f32.mxu0 %v8529_v0  ;;  %5973 = vset.pattern.permute.xlu0 %v5997_v1  ;;  %v199_v6 = vld [vmem:[%s8525_s1] sm:$0xff]  ;;  %vm278_vm1 = vcmask 31744   ;;  %v200_v7 = vld [vmem:[%s8525_s1 + $0x8] sm:$0xff]  ;;  %v201_v8 = vld [vmem:[%s8525_s1 + $0x10] sm:$0xff]  ;;  %vm4288_vm2 = vcmask 130048  }
   0xf   : > { %s8715_s16 = smov (!%p188_p3, %s5401_s16), 1  ;;  %5974 = vset.pattern.permute.xlu1 %v5997_v1  ;;  %263 = vperm.xlu0 %5973, %v218_v2   ;;  %v202_v9 = vld [vmem:[%s8525_s1 + $0x18] sm:$0xff]  ;;  %v203_v10 = vld [vmem:[%s8525_s1 + $0x20] sm:$0xff]  ;;  %v204_v11 = vld [vmem:[%s8525_s1 + $0x28] sm:$0xff] }
  0x10   : > { %s5941_s19 = sshll.u32 %s8715_s16, 3  ;;  %v205_v12 = vld [vmem:[%s8525_s1 + $0x30] sm:$0xff]  ;;  %v206_v13 = vld [vmem:[%s8525_s1 + $0x38] sm:$0xff]  ;;  %v207_v14 = vld [vmem:[%s8525_s1 + $0x40] sm:$0xff]  ;;  %s5942_s7 = sshll.u32 %s8715_s16, 5 }
  0x11   : > { %s192_s22 = scalar_lea.vmem %s8524_s0, %s5941_s19  ;;  %v208_v15 = vld [vmem:[%s8525_s1 + $0x48] sm:$0xff]  ;;  %v209_v16 = vld [vmem:[%s8525_s1 + $0x50] sm:$0xf]  ;;  %v550_v45 = vld [vmem:[%s8527_s3] sm:$0xff]  ;;  %s8481_s9 = scalar_lea.vmem %s8528_s4, %s5942_s7 }
  0x12   : > { %v198_v4 = vld [vmem:[%s192_s22] sm:$0xff] }
  0x13   : > { %v277_v5 = vcombine.high %v198_v4, %v198_v4  ;;  %268 = vperm.xlu0 %5973, %v219_v3   ;;  %v566_v46 = vld [vmem:[%s8527_s3 + $0x80] sm:$0xff] }
  0x14   : > { %v582_v47 = vld [vmem:[%s8527_s3 + $0x100] sm:$0xff]  ;;  %v5423_v48 = vcombine.low %v550_v45, %v566_v46  ;;  %v5424_v49 = vcombine.high %v550_v45, %v566_v46 }
  0x15   : > { %5410 = vmatprep.subr.msk.mxu0 %vm312_vm0, %v277_v5  ;;  %v598_v50 = vld [vmem:[%s8527_s3 + $0x180] sm:$0xff] }
  0x16   : > { %5411 = vmatpush1.msk.msra.mxu0 %vm312_vm0, %v198_v4  ;;  %v5456_v51 = vcombine.high %v582_v47, %v598_v50  ;;  %v614_v52 = vld [vmem:[%s8527_s3 + $0x200] sm:$0xff]  ;;  %v5455_v54 = vcombine.low %v582_v47, %v598_v50 }
  0x17   : > { %5412 = vmatmul.mubr.msk.f32.vlgmr.msra.gmra.mrb[0].mxu0 %vm278_vm1, %v199_v6  ;;  %v630_v53 = vld [vmem:[%s8527_s3 + $0x280] sm:$0xff]  ;;  %3622 = vmatprep.subr.bf16.mxu0 %v5424_v49 }
  0x18   : > { %387 = vmatprep.mubr.f32.mxu0 %v8529_v0  ;;  %3623 = vmatpush1.bf16.msra.mxu0 %v5423_v48  ;;  %v5488_v55 = vcombine.high %v614_v52, %v630_v53  ;;  %v646_v56 = vld [vmem:[%s8527_s3 + $0x300] sm:$0xff]  ;;  %v5487_v58 = vcombine.low %v614_v52, %v630_v53 }
  0x19   : > { %3624 = vmatprep.subr.bf16.mxu0 %v5456_v51  ;;  %v662_v57 = vld [vmem:[%s8527_s3 + $0x380] sm:$0xff] }
  0x1a   : > { %v5520_v59 = vcombine.high %v646_v56, %v662_v57  ;;  %v678_v60 = vld [vmem:[%s8527_s3 + $0x400] sm:$0xff]  ;;  %v5519_v62 = vcombine.low %v646_v56, %v662_v57 }
  0x1b   : > { %5413 = vmatmul.mubr.msk.f32.gmra.mrb[2].mxu0 %vm278_vm1, %v200_v7  ;;  %v694_v61 = vld [vmem:[%s8527_s3 + $0x480] sm:$0xff] }
  0x1c   : > { %393 = vmatprep.mubr.f32.mxu0 %v8529_v0  ;;  %3625 = vmatpush1.bf16.msra.mxu0 %v5455_v54  ;;  %v5552_v63 = vcombine.high %v678_v60, %v694_v61  ;;  %v710_v1 = vld [vmem:[%s8527_s3 + $0x500] sm:$0xff]  ;;  %v5551_v3 = vcombine.low %v678_v60, %v694_v61 }
  0x1d   : > { %3626 = vmatprep.subr.bf16.mxu0 %v5488_v55  ;;  %v726_v2 = vld [vmem:[%s8527_s3 + $0x580] sm:$0xff] }
  0x1e   : > { %v5584_v4 = vcombine.high %v710_v1, %v726_v2  ;;  %v742_v5 = vld [vmem:[%s8527_s3 + $0x600] sm:$0xff]  ;;  %v5583_v7 = vcombine.low %v710_v1, %v726_v2 }
  0x1f   : > { %5414 = vmatmul.mubr.msk.f32.gmra.mrb[4].mxu0 %vm278_vm1, %v201_v8  ;;  %v758_v6 = vld [vmem:[%s8527_s3 + $0x680] sm:$0xff] }
  0x20   : > { %399 = vmatprep.mubr.f32.mxu0 %v8529_v0  ;;  %3627 = vmatpush1.bf16.msra.mxu0 %v5487_v58  ;;  %v5616_v8 = vcombine.high %v742_v5, %v758_v6  ;;  %v902_v45 = vld [vmem:[%s8527_s3 + $0xb00] sm:$0xff] }
  0x21   : > { %3628 = vmatprep.subr.bf16.mxu0 %v5520_v59  ;;  %v918_v46 = vld [vmem:[%s8527_s3 + $0xb80] sm:$0xff] }
  0x22   : > { %v5776_v48 = vcombine.high %v902_v45, %v918_v46  ;;  %v934_v49 = vld [vmem:[%s8527_s3 + $0xc00] sm:$0xff]  ;;  %v5775_v51 = vcombine.low %v902_v45, %v918_v46  ;;  %v212_v45 = vld [vmem:[%s8526_s2 + $0x10] sm:$0xff] }
  0x23   : > { %5415 = vmatmul.mubr.msk.f32.gmra.mrb[6].mxu0 %vm278_vm1, %v202_v9  ;;  %v774_v9 = vld [vmem:[%s8527_s3 + $0x700] sm:$0xff]  ;;  %v216_v46 = vld [vmem:[%s8526_s2 + $0x30] sm:$0xff] }
  0x24   : > { %405 = vmatprep.mubr.f32.mxu0 %v8529_v0  ;;  %3629 = vmatpush1.bf16.msra.mxu0 %v5519_v62  ;;  %v950_v50 = vld [vmem:[%s8527_s3 + $0xc80] sm:$0xff] }
  0x25   : > { %3630 = vmatprep.subr.bf16.mxu0 %v5552_v63  ;;  %v5808_v52 = vcombine.high %v934_v49, %v950_v50  ;;  %v5807_v53 = vcombine.low %v934_v49, %v950_v50  ;;  %v215_v49 = vld [vmem:[%s8526_s2 + $0x28] sm:$0xff] }
  0x27   : > { %5416 = vmatmul.mubr.msk.f32.gmra.mrb[8].mxu0 %vm278_vm1, %v203_v10  ;;  %v790_v10 = vld [vmem:[%s8527_s3 + $0x780] sm:$0xff] }
  0x28   : > { %411 = vmatprep.mubr.f32.mxu0 %v8529_v0  ;;  %3631 = vmatpush1.bf16.msra.mxu0 %v5551_v3 }
  0x29   : > { %3632 = vmatprep.subr.bf16.mxu0 %v5584_v4  ;;  %v982_v4 = vld [vmem:[%s8527_s3 + $0xd80] sm:$0xff] }
  0x2b   : > { %5417 = vmatmul.mubr.msk.f32.gmra.mrb[10].mxu0 %vm278_vm1, %v204_v11  ;;  %v5615_v11 = vcombine.low %v742_v5, %v758_v6 }
  0x2c   : > { %417 = vmatprep.mubr.f32.mxu0 %v8529_v0  ;;  %3633 = vmatpush1.bf16.msra.mxu0 %v5583_v7  ;;  %v998_v7 = vld [vmem:[%s8527_s3 + $0xe00] sm:$0xff] }
  0x2d   : > { %3634 = vmatprep.subr.bf16.mxu0 %v5616_v8  ;;  %v1014_v8 = vld [vmem:[%s8527_s3 + $0xe80] sm:$0xff] }
  0x2f   : > { %5418 = vmatmul.mubr.msk.f32.gmra.mrb[12].mxu0 %vm278_vm1, %v205_v12  ;;  %v5648_v12 = vcombine.high %v774_v9, %v790_v10 }
  0x30   : > { %423 = vmatprep.mubr.f32.mxu0 %v8529_v0  ;;  %3635 = vmatpush1.bf16.msra.mxu0 %v5615_v11  ;;  %v220_v11 = vld [vmem:[%s8526_s2 + $0x50] sm:$0xf] }
  0x31   : > { %3636 = vmatprep.subr.bf16.mxu0 %v5648_v12 }
  0x33   : > { %5419 = vmatmul.mubr.msk.f32.gmra.mrb[14].mxu0 %vm278_vm1, %v206_v13  ;;  %v806_v13 = vld [vmem:[%s8527_s3 + $0x800] sm:$0xff] }
  0x34   : > { %429 = vmatprep.mubr.f32.mxu0 %v8529_v0 }
  0x37   : > { %5420 = vmatmul.mubr.msk.f32.gmra.mrb[16].mxu0 %vm278_vm1, %v207_v14  ;;  %v822_v14 = vld [vmem:[%s8527_s3 + $0x880] sm:$0xff] }
  0x38   : > { %435 = vmatprep.mubr.f32.mxu0 %v8529_v0 }
  0x3b   : > { %5421 = vmatmul.mubr.msk.f32.gmra.mrb[18].mxu0 %vm278_vm1, %v208_v15  ;;  %v5647_v15 = vcombine.low %v774_v9, %v790_v10  ;;  %v5872_v9 = vcombine.high %v998_v7, %v1014_v8  ;;  %v5871_v10 = vcombine.low %v998_v7, %v1014_v8 }
  0x3c   : > { %441 = vmatprep.mubr.f32.mxu0 %v8529_v0  ;;  %v783_v0 = vld [vmem:[%s8527_s3 + $0x748] sm:$0xff] }
  0x3d   : > { %3637 = vmatpush1.bf16.msra.mxu0 %v5647_v15  ;;  %v1030_v15 = vld [vmem:[%s8527_s3 + $0xf00] sm:$0xff] }
  0x3f   : > { %5422 = vmatmul.mubr.msk.f32.gmra.mrb[20].mxu0 %vm278_vm1, %v209_v16  ;;  %v5680_v16 = vcombine.high %v806_v13, %v822_v14 }
  0x41   : > { %3638 = vmatprep.subr.bf16.mxu0 %v5680_v16  ;;  %v1046_v16 = vld [vmem:[%s8527_s3 + $0xf80] sm:$0xff] }
  0x8e   : > { %v264_v33 = vpop.permute.xlu0 %263 }
  0x92   : > { %v269_v38 = vpop.permute.xlu0 %268 }
  0xea   : > { %v6098_v17 = vpop.f32.mrb[0].mxu0 }
  0xeb   : > { %v6100_v18 = vpop.f32.mrb[1].mxu0 }
  0xee   : > { %v6102_v19 = vpop.f32.mrb[2].mxu0 }
  0xef   : > { %v6104_v20 = vpop.f32.mrb[3].mxu0 }
  0xf2   : > { %v6106_v21 = vpop.f32.mrb[4].mxu0 }
  0xf3   : > { %v6108_v22 = vpop.f32.mrb[5].mxu0 }
  0xf6   : > { %v6110_v23 = vpop.f32.mrb[6].mxu0 }
  0xf7   : > { %v6112_v24 = vpop.f32.mrb[7].mxu0 }
  0xfa   : > { %v6114_v25 = vpop.f32.mrb[8].mxu0 }
  0xfb   : > { %v6116_v26 = vpop.f32.mrb[9].mxu0 }
  0xfe   : > { %v6118_v27 = vpop.f32.mrb[10].mxu0 }
  0xff   : > { %v6120_v28 = vpop.f32.mrb[11].mxu0 }
 0x102   : > { %v6122_v29 = vpop.f32.mrb[12].mxu0 }
 0x103   : > { %v6124_v30 = vpop.f32.mrb[13].mxu0 }
 0x106   : > { %v6126_v31 = vpop.f32.mrb[14].mxu0 }
 0x107   : > { %v6128_v32 = vpop.f32.mrb[15].mxu0 }
 0x10a   : > { %v431_v34 = vpop.f32.mrb[16].mxu0 }
 0x10b   : > { %v6130_v35 = vadd.f32 %v431_v34, %v264_v33  ;;  %v433_v36 = vpop.f32.mrb[17].mxu0  ;;  %v854_v34 = vld [vmem:[%s8527_s3 + $0x980] sm:$0xff] }
 0x10c   : > { %v6132_v37 = vadd.f32 %v433_v36, %v264_v33  ;;  %v838_v33 = vld [vmem:[%s8527_s3 + $0x900] sm:$0xff]  ;;  %v5679_v36 = vcombine.low %v806_v13, %v822_v14  ;;  %v213_v13 = vld [vmem:[%s8526_s2 + $0x18] sm:$0xff] }
 0x10e   : > { %v437_v39 = vpop.f32.mrb[18].mxu0  ;;  %v448_v40 = vmax.f32 %v6130_v35, %v6132_v37  ;;  %3639 = vmatpush1.bf16.msra.mxu0 %v5679_v36  ;;  %v210_v36 = vld [vmem:[%s8526_s2] sm:$0xff] }
 0x10f   : > { %v6136_v41 = vadd.f32 %v437_v39, %v269_v38  ;;  %v439_v42 = vpop.f32.mrb[19].mxu0  ;;  %v870_v39 = vld [vmem:[%s8527_s3 + $0xa00] sm:$0xff] }
 0x110   : > { %v6138_v43 = vadd.f32 %v439_v42, %v269_v38  ;;  %449 = vmax.xlane.f32.xlu1 %v448_v40  ;;  %v5712_v38 = vcombine.high %v838_v33, %v854_v34  ;;  %v886_v40 = vld [vmem:[%s8527_s3 + $0xa80] sm:$0xff]  ;;  %v5711_v42 = vcombine.low %v838_v33, %v854_v34  ;;  %v5904_v33 = vcombine.high %v1030_v15, %v1046_v16 }
 0x111   : > { %v5743_v47 = vcombine.low %v870_v39, %v886_v40  ;;  %v5903_v34 = vcombine.low %v1030_v15, %v1046_v16 }
 0x112   : > { %v451_v44 = vmax.f32 %v6136_v41, %v6138_v43  ;;  %3640 = vmatprep.subr.bf16.mxu0 %v5712_v38  ;;  %v443_v12 = vpop.f32.mrb[20].mxu0  ;;  %v552_v38 = vld [vmem:[%s8527_s3 + $0x10] sm:$0xff] }
 0x113   : > { %3641 = vmatpush1.bf16.msra.mxu0 %v5711_v42  ;;  %v445_v14 = vpop.f32.mrb[21].mxu0 }
 0x114   : > { %452 = vmax.xlane.f32.xlu1 %v451_v44  ;;  %v5744_v44 = vcombine.high %v870_v39, %v886_v40  ;;  %v568_v39 = vld [vmem:[%s8527_s3 + $0x90] sm:$0xff] }
 0x115   : > { %v5428_v40 = vcombine.high %v552_v38, %v568_v39  ;;  %v5427_v42 = vcombine.low %v552_v38, %v568_v39  ;;  %v583_v38 = vld [vmem:[%s8527_s3 + $0x108] sm:$0xff] }
 0x116   : > { %3642 = vmatprep.subr.bf16.mxu0 %v5744_v44  ;;  %v211_v44 = vld [vmem:[%s8526_s2 + $0x8] sm:$0xff] }
 0x117   : > { %3643 = vmatpush1.bf16.msra.mxu0 %v5743_v47  ;;  %v217_v47 = vld [vmem:[%s8526_s2 + $0x38] sm:$0xff]  ;;  %v599_v39 = vld [vmem:[%s8527_s3 + $0x188] sm:$0xff] }
 0x118   : > { %3644 = vmatprep.subr.bf16.mxu0 %v5776_v48  ;;  %v214_v48 = vld [vmem:[%s8526_s2 + $0x20] sm:$0xff] }
 0x11b   : > { %3645 = vmatpush1.bf16.msra.mxu0 %v5775_v51 }
 0x11c   : > { %3646 = vmatprep.subr.bf16.mxu0 %v5808_v52 }
 0x11f   : > { %3647 = vmatpush1.bf16.msra.mxu0 %v5807_v53 }
 0x19d   : > { %v450_v54 = vpop.xlane.xlu1 %449 }
 0x19e   : > { %v454_v55 = vsub.f32 %v6130_v35, %v450_v54  ;;  %v455_v56 = vsub.f32 %v6132_v37, %v450_v54 }
 0x1a0   : > { %v458_v57 = vmul.f32 1.442695, %v454_v55  ;;  %v460_v58 = vmul.f32 1.442695, %v455_v56  ;;  %v584_v55 = vld [vmem:[%s8527_s3 + $0x110] sm:$0xff] }
 0x1a1   : > { %v453_v59 = vpop.xlane.xlu1 %452  ;;  %v600_v56 = vld [vmem:[%s8527_s3 + $0x190] sm:$0xff] }
 0x1a2   : > { %5976 = vpow2.f32 %v458_v57  ;;  %v456_v60 = vsub.f32 %v6136_v41, %v453_v59  ;;  %v457_v61 = vsub.f32 %v6138_v43, %v453_v59  ;;  %v966_v43 = vld [vmem:[%s8527_s3 + $0xd00] sm:$0xff] }
 0x1a3   : > { %5978 = vpow2.f32 %v460_v58  ;;  %v5840_v5 = vcombine.high %v966_v43, %v982_v4  ;;  %v5839_v6 = vcombine.low %v966_v43, %v982_v4  ;;  %v5459_v4 = vcombine.low %v584_v55, %v600_v56 }
 0x1a4   : > { %v462_v62 = vmul.f32 1.442695, %v456_v60  ;;  %v464_v63 = vmul.f32 1.442695, %v457_v61  ;;  %v5460_v60 = vcombine.high %v584_v55, %v600_v56  ;;  %v616_v61 = vld [vmem:[%s8527_s3 + $0x210] sm:$0xff] }
 0x1a5   : > { %3648 = vmatprep.subr.bf16.mxu0 %v5840_v5 }
 0x1a6   : > { %5980 = vpow2.f32 %v462_v62  ;;  %3649 = vmatpush1.bf16.msra.mxu0 %v5839_v6  ;;  %v632_v62 = vld [vmem:[%s8527_s3 + $0x290] sm:$0xff] }
 0x1a7   : > { %5982 = vpow2.f32 %v464_v63  ;;  %3650 = vmatprep.subr.bf16.mxu0 %v5872_v9  ;;  %v5492_v5 = vcombine.high %v616_v61, %v632_v62 }
 0x1aa   : > { %3651 = vmatpush1.bf16.msra.mxu0 %v5871_v10 }
 0x1ab   : > { %3652 = vmatprep.subr.bf16.mxu0 %v5904_v33 }
 0x1ac   : > { %v6224_v1 = vpop.eup %5976 }
 0x1ad   : > { %v6226_v2 = vpop.eup %5978 }
 0x1ae   : > { %v466_v35 = vadd.f32 %v6226_v2, %v6224_v1  ;;  %3653 = vmatpush1.bf16.msra.mxu0 %v5903_v34 }
 0x1af   : > { %3704 = vmatprep.subr.bf16.mxu0 %v5428_v40 }
 0x1b0   : > { %v6230_v37 = vpop.eup %5980  ;;  %467 = vadd.xlane.f32.xlu0 %v466_v35  ;;  %v551_v35 = vld [vmem:[%s8527_s3 + $0x8] sm:$0xff] }
 0x1b1   : > { %v6232_v3 = vpop.eup %5982 }
 0x1b2   : > { %v469_v41 = vadd.f32 %v6232_v3, %v6230_v37 }
 0x1b4   : > { %470 = vadd.xlane.f32.xlu1 %v469_v41  ;;  %v567_v41 = vld [vmem:[%s8527_s3 + $0x88] sm:$0xff] }
 0x1c5   : > { %273 = vperm.xlu1 %5974, %v220_v11   ;;  %v648_v11 = vld [vmem:[%s8527_s3 + $0x310] sm:$0xff] }
 0x1c6   : > { %238 = vperm.xlu0 %5973, %v213_v13   ;;  %v5426_v13 = vcombine.high %v551_v35, %v567_v41 }
 0x1c9   : > { %223 = vperm.xlu1 %5974, %v210_v36  }
 0x1cd   : > { %228 = vperm.xlu1 %5974, %v211_v44   ;;  %v5425_v44 = vcombine.low %v551_v35, %v567_v41  ;;  %v647_v41 = vld [vmem:[%s8527_s3 + $0x308] sm:$0xff] }
 0x1d1   : > { %233 = vperm.xlu1 %5974, %v212_v45   ;;  %v712_v45 = vld [vmem:[%s8527_s3 + $0x510] sm:$0xff] }
 0x1d5   : > { %253 = vperm.xlu1 %5974, %v216_v46   ;;  %v728_v46 = vld [vmem:[%s8527_s3 + $0x590] sm:$0xff] }
 0x1d6   : > { %v5588_v56 = vcombine.high %v712_v45, %v728_v46  ;;  %v5587_v35 = vcombine.low %v712_v45, %v728_v46  ;;  %v856_v45 = vld [vmem:[%s8527_s3 + $0x990] sm:$0xff] }
 0x1d9   : > { %258 = vperm.xlu1 %5974, %v217_v47   ;;  %v5458_v47 = vcombine.high %v583_v38, %v599_v39 }
 0x1dd   : > { %243 = vperm.xlu1 %5974, %v214_v48  }
 0x1e1   : > { %248 = vperm.xlu1 %5974, %v215_v49  }
 0x23d   : > { %v468_v50 = vpop.xlane.xlu0 %467 }
 0x23e   : > { %5984 = vrcp.f32 %v468_v50  ;;  %v615_v50 = vld [vmem:[%s8527_s3 + $0x208] sm:$0xff] }
 0x241   : > { %v471_v51 = vpop.xlane.xlu1 %470 }
 0x242   : > { %5986 = vrcp.f32 %v471_v51  ;;  %v631_v51 = vld [vmem:[%s8527_s3 + $0x288] sm:$0xff] }
 0x245   : > { %v274_v52 = vpop.permute.xlu1 %273  ;;  %v239_v48 = vpop.permute.xlu0 %238 }
 0x246   : > { %v6287_v53 = vadd.f32 %v443_v12, %v274_v52  ;;  %v446_v54 = vadd.f32 %v445_v14, %v274_v52  ;;  %v664_v12 = vld [vmem:[%s8527_s3 + $0x390] sm:$0xff] }
 0x247   : > { %v5524_v34 = vcombine.high %v648_v11, %v664_v12  ;;  %v5523_v36 = vcombine.low %v648_v11, %v664_v12  ;;  %v679_v11 = vld [vmem:[%s8527_s3 + $0x408] sm:$0xff] }
 0x248   : > { %v6297_v57 = vpack.c.bf16 %v6287_v53, %v6287_v53  ;;  %v6299_v58 = vpack.c.bf16 %v446_v54, %v446_v54  ;;  %542 = vmatprep.mubr.f32.mxu1 %v446_v54  ;;  %v5985_v63 = vpop.eup %5984  ;;  %v695_v12 = vld [vmem:[%s8527_s3 + $0x488] sm:$0xff] }
 0x249   : > { %v224_v59 = vpop.permute.xlu1 %223  ;;  %v475_v7 = vmul.f32 %v5985_v63, %v6226_v2  ;;  %v474_v9 = vmul.f32 %v5985_v63, %v6224_v1  ;;  %v5491_v1 = vcombine.low %v616_v61, %v632_v62  ;;  %v5457_v61 = vcombine.low %v583_v38, %v599_v39  ;;  %v711_v38 = vld [vmem:[%s8527_s3 + $0x508] sm:$0xff] }
 0x24a   : > { %3654 = vmatprep.mubr.bf16.mxu0 %v6299_v58  ;;  %v6336_v16 = vadd.f32 %v6100_v18, %v224_v59  ;;  %v5490_v62 = vcombine.high %v615_v50, %v631_v51  ;;  %v727_v39 = vld [vmem:[%s8527_s3 + $0x588] sm:$0xff] }
 0x24b   : > { %3655 = vmatmul.mubr.bf16.vlgmr.msra.gmra.mrb[24].mxu0 %v6297_v57  ;;  %v5586_v46 = vcombine.high %v711_v38, %v727_v39 }
 0x24c   : > { %v5987_v43 = vpop.eup %5986  ;;  %3705 = vmatpush1.bf16.msra.mxu0 %v5427_v42  ;;  %3736 = vmatprep.mubr.bf16.mxu0 %v6299_v58 }
 0x24d   : > { %v229_v6 = vpop.permute.xlu1 %228  ;;  %3706 = vmatprep.subr.bf16.mxu0 %v5460_v60  ;;  %v477_v8 = vmul.f32 %v5987_v43, %v6232_v3  ;;  %v476_v10 = vmul.f32 %v5987_v43, %v6230_v37  ;;  %v6333_v37 = vadd.f32 %v6098_v17, %v224_v59 }
 0x24e   : > { %v6327_v14 = vadd.f32 %v6102_v19, %v229_v6  ;;  %v6330_v2 = vadd.f32 %v6104_v20, %v229_v6  ;;  %v680_v19 = vld [vmem:[%s8527_s3 + $0x410] sm:$0xff] }
 0x24f   : > { %v5943_v3 = vpack.c.bf16 %v477_v8, %v475_v7  ;;  %v5945_v15 = vpack.c.bf16 %v476_v10, %v474_v9  ;;  %v696_v20 = vld [vmem:[%s8527_s3 + $0x490] sm:$0xff] }
 0x250   : > { %8541 = vst [vmem:[#allocation2_spill] sm:$0xff] %v6327_v14  ;;  %8542 = vst [vmem:[#allocation3_spill] sm:$0xff] %v6330_v2  ;;  %3707 = vmatpush1.bf16.msra.mxu0 %v5459_v4  ;;  %v5556_v42 = vcombine.high %v680_v19, %v696_v20  ;;  %v5555_v49 = vcombine.low %v680_v19, %v696_v20  ;;  %v776_v6 = vld [vmem:[%s8527_s3 + $0x710] sm:$0xff]  ;;  %v5554_v20 = vcombine.high %v679_v11, %v695_v12 }
 0x251   : > { %5944 = vmatprep.subr.bf16.mxu1 %v5943_v3  ;;  %v234_v33 = vpop.permute.xlu1 %233  ;;  %3708 = vmatprep.subr.bf16.mxu0 %v5492_v5  ;;  %v5489_v5 = vcombine.low %v615_v50, %v631_v51  ;;  %v792_v7 = vld [vmem:[%s8527_s3 + $0x790] sm:$0xff]  ;;  %v5585_v51 = vcombine.low %v711_v38, %v727_v39 }
 0x252   : > { %5946 = vmatpush1.bf16.xpose.msra.mxu1 %v5945_v15  ;;  %v6367_v52 = vadd.f32 %v6106_v21, %v234_v33  ;;  %v6370_v54 = vadd.f32 %v6108_v22, %v234_v33  ;;  %v744_v21 = vld [vmem:[%s8527_s3 + $0x610] sm:$0xff]  ;;  %v5652_v3 = vcombine.high %v776_v6, %v792_v7 }
 0x253   : > { %3663 = vmatprep.subr.bf16.mxu1 %v5426_v13  ;;  %v760_v22 = vld [vmem:[%s8527_s3 + $0x690] sm:$0xff] }
 0x254   : > { %3709 = vmatpush1.bf16.msra.mxu0 %v5491_v1  ;;  %v5620_v43 = vcombine.high %v744_v21, %v760_v22  ;;  %v5619_v10 = vcombine.low %v744_v21, %v760_v22  ;;  %v808_v1 = vld [vmem:[%s8527_s3 + $0x810] sm:$0xff]  ;;  %v775_v22 = vld [vmem:[%s8527_s3 + $0x708] sm:$0xff] }
 0x255   : > { %v254_v40 = vpop.permute.xlu1 %253  ;;  %3710 = vmatprep.subr.bf16.mxu0 %v5524_v34  ;;  %v824_v33 = vld [vmem:[%s8527_s3 + $0x890] sm:$0xff] }
 0x256   : > { %v6396_v63 = vadd.f32 %v6122_v29, %v254_v40  ;;  %v984_v38 = vld [vmem:[%s8527_s3 + $0xd90] sm:$0xff] }
 0x258   : > { %3711 = vmatpush1.bf16.msra.mxu0 %v5523_v36  ;;  %v5651_v36 = vcombine.low %v776_v6, %v792_v7  ;;  %v807_v6 = vld [vmem:[%s8527_s3 + $0x808] sm:$0xff] }
 0x259   : > { %543 = vmatmul.mubr.f32.vlgmr.msra.gmra.mrb[0].mxu1 %v6287_v53  ;;  %v259_v55 = vpop.permute.xlu1 %258  ;;  %3712 = vmatprep.subr.bf16.mxu0 %v5556_v42  ;;  %v6387_v53 = vadd.f32 %v6110_v23, %v239_v48  ;;  %v663_v23 = vld [vmem:[%s8527_s3 + $0x388] sm:$0xff]  ;;  %v5553_v42 = vcombine.low %v679_v11, %v695_v12  ;;  %v936_v11 = vld [vmem:[%s8527_s3 + $0xc10] sm:$0xff] }
 0x25a   : > { %v6374_v59 = vadd.f32 %v6126_v31, %v259_v55  ;;  %v6377_v60 = vadd.f32 %v6128_v32, %v259_v55  ;;  %3664 = vmatpush1.bf16.msra.mxu1 %v5425_v44  ;;  %3695 = vmatprep.mubr.bf16.mxu1 %v6299_v58  ;;  %v6390_v31 = vadd.f32 %v6112_v24, %v239_v48  ;;  %v840_v44 = vld [vmem:[%s8527_s3 + $0x910] sm:$0xff]  ;;  %v743_v48 = vld [vmem:[%s8527_s3 + $0x608] sm:$0xff] }
 0x25b   : > { %8545 = vst [vmem:[#allocation6_spill] sm:$0xff] %v6387_v53  ;;  %v6393_v32 = vadd.f32 %v6124_v30, %v254_v40  ;;  %3665 = vmatprep.subr.bf16.mxu1 %v5458_v47  ;;  %v5522_v9 = vcombine.high %v647_v41, %v663_v23  ;;  %v5521_v15 = vcombine.low %v647_v41, %v663_v23  ;;  %v872_v55 = vld [vmem:[%s8527_s3 + $0xa10] sm:$0xff]  ;;  %v823_v7 = vld [vmem:[%s8527_s3 + $0x888] sm:$0xff] }
 0x25c   : > { %8543 = vst [vmem:[#allocation4_spill] sm:$0xff] %v6374_v59  ;;  %8544 = vst [vmem:[#allocation5_spill] sm:$0xff] %v6377_v60  ;;  %3713 = vmatpush1.bf16.msra.mxu0 %v5555_v49  ;;  %v5683_v47 = vcombine.low %v808_v1, %v824_v33  ;;  %v759_v49 = vld [vmem:[%s8527_s3 + $0x688] sm:$0xff]  ;;  %v5716_v50 = vcombine.high %v840_v44, %v856_v45  ;;  %v5715_v21 = vcombine.low %v840_v44, %v856_v45  ;;  %v904_v23 = vld [vmem:[%s8527_s3 + $0xb10] sm:$0xff] }
 0x25d   : > { %8546 = vst [vmem:[#allocation7_spill] sm:$0xff] %v6390_v31  ;;  %v244_v24 = vpop.permute.xlu1 %243  ;;  %3714 = vmatprep.subr.bf16.mxu0 %v5588_v56  ;;  %v888_v56 = vld [vmem:[%s8527_s3 + $0xa90] sm:$0xff]  ;;  %v5617_v41 = vcombine.low %v743_v48, %v759_v49  ;;  %v887_v44 = vld [vmem:[%s8527_s3 + $0xa88] sm:$0xff] }
 0x25e   : > { %3666 = vmatpush1.bf16.msra.mxu1 %v5457_v61  ;;  %v6443_v40 = vadd.f32 %v6114_v25, %v244_v24  ;;  %v5618_v61 = vcombine.high %v743_v48, %v759_v49  ;;  %v952_v12 = vld [vmem:[%s8527_s3 + $0xc90] sm:$0xff] }
 0x25f   : > { %3667 = vmatprep.subr.bf16.mxu1 %v5490_v62  ;;  %v791_v62 = vld [vmem:[%s8527_s3 + $0x788] sm:$0xff]  ;;  %v1016_v48 = vld [vmem:[%s8527_s3 + $0xe90] sm:$0xff] }
 0x260   : > { %3715 = vmatpush1.bf16.msra.mxu0 %v5587_v35  ;;  %v5748_v35 = vcombine.high %v872_v55, %v888_v56 }
 0x261   : > { %v249_v13 = vpop.permute.xlu1 %248  ;;  %3716 = vmatprep.subr.bf16.mxu0 %v5620_v43  ;;  %v5650_v43 = vcombine.high %v775_v22, %v791_v62 }
 0x262   : > { %3668 = vmatpush1.bf16.msra.mxu1 %v5489_v5  ;;  %v6431_v34 = vadd.f32 %v6118_v27, %v249_v13  ;;  %v6434_v19 = vadd.f32 %v6120_v28, %v249_v13  ;;  %v6446_v27 = vadd.f32 %v6116_v26, %v244_v24  ;;  %v5684_v28 = vcombine.high %v808_v1, %v824_v33  ;;  %v920_v24 = vld [vmem:[%s8527_s3 + $0xb90] sm:$0xff]  ;;  %v855_v1 = vld [vmem:[%s8527_s3 + $0x988] sm:$0xff] }
 0x263   : > { %3669 = vmatprep.subr.bf16.mxu1 %v5522_v9  ;;  %v5747_v5 = vcombine.low %v872_v55, %v888_v56  ;;  %v5780_v9 = vcombine.high %v904_v23, %v920_v24  ;;  %v5682_v13 = vcombine.high %v807_v6, %v823_v7  ;;  %v5812_v33 = vcombine.high %v936_v11, %v952_v12  ;;  %v919_v55 = vld [vmem:[%s8527_s3 + $0xb88] sm:$0xff] }
 0x264   : > { %8547 = vst [vmem:[#allocation8_spill] sm:$0xff] %v6431_v34  ;;  %8548 = vst [vmem:[#allocation9_spill] sm:$0xff] %v6434_v19  ;;  %3717 = vmatpush1.bf16.msra.mxu0 %v5619_v10  ;;  %v5649_v10 = vcombine.low %v775_v22, %v791_v62  ;;  %v1048_v22 = vld [vmem:[%s8527_s3 + $0xf90] sm:$0xff] }
 0x265   : > { %3718 = vmatprep.subr.bf16.mxu0 %v5652_v3  ;;  %v5779_v3 = vcombine.low %v904_v23, %v920_v24  ;;  %v951_v23 = vld [vmem:[%s8527_s3 + $0xc88] sm:$0xff] }
 0x266   : > { %3670 = vmatpush1.bf16.msra.mxu1 %v5521_v15  ;;  %v839_v15 = vld [vmem:[%s8527_s3 + $0x908] sm:$0xff] }
 0x267   : > { %3671 = vmatprep.subr.bf16.mxu1 %v5554_v20  ;;  %v5681_v20 = vcombine.low %v807_v6, %v823_v7  ;;  %v5714_v39 = vcombine.high %v839_v15, %v855_v1  ;;  %v570_v6 = vld [vmem:[%s8527_s3 + $0xa0] sm:$0xff] }
 0x268   : > { %3719 = vmatpush1.bf16.msra.mxu0 %v5651_v36  ;;  %v968_v36 = vld [vmem:[%s8527_s3 + $0xd10] sm:$0xff] }
 0x269   : > { %3720 = vmatprep.subr.bf16.mxu0 %v5684_v28  ;;  %v5811_v28 = vcombine.low %v936_v11, %v952_v12  ;;  %v5844_v45 = vcombine.high %v968_v36, %v984_v38  ;;  %v983_v11 = vld [vmem:[%s8527_s3 + $0xd88] sm:$0xff] }
 0x26a   : > { %3672 = vmatpush1.bf16.msra.mxu1 %v5553_v42  ;;  %v871_v42 = vld [vmem:[%s8527_s3 + $0xa08] sm:$0xff] }
 0x26b   : > { %3673 = vmatprep.subr.bf16.mxu1 %v5586_v46  ;;  %v5713_v46 = vcombine.low %v839_v15, %v855_v1  ;;  %v5746_v49 = vcombine.high %v871_v42, %v887_v44  ;;  %v602_v15 = vld [vmem:[%s8527_s3 + $0x1a0] sm:$0xff] }
 0x26c   : > { %3721 = vmatpush1.bf16.msra.mxu0 %v5683_v47  ;;  %v1000_v47 = vld [vmem:[%s8527_s3 + $0xe10] sm:$0xff] }
 0x26d   : > { %3722 = vmatprep.subr.bf16.mxu0 %v5716_v50  ;;  %v5843_v50 = vcombine.low %v968_v36, %v984_v38  ;;  %v5876_v56 = vcombine.high %v1000_v47, %v1016_v48  ;;  %v1015_v36 = vld [vmem:[%s8527_s3 + $0xe88] sm:$0xff] }
 0x26e   : > { %3674 = vmatpush1.bf16.msra.mxu1 %v5585_v51  ;;  %v903_v51 = vld [vmem:[%s8527_s3 + $0xb08] sm:$0xff] }
 0x26f   : > { %3675 = vmatprep.subr.bf16.mxu1 %v5618_v61  ;;  %v5745_v61 = vcombine.low %v871_v42, %v887_v44  ;;  %v5778_v62 = vcombine.high %v903_v51, %v919_v55  ;;  %v634_v42 = vld [vmem:[%s8527_s3 + $0x2a0] sm:$0xff] }
 0x270   : > { %3723 = vmatpush1.bf16.msra.mxu0 %v5715_v21  ;;  %v1032_v21 = vld [vmem:[%s8527_s3 + $0xf10] sm:$0xff] }
 0x271   : > { %3724 = vmatprep.subr.bf16.mxu0 %v5748_v35  ;;  %v5875_v35 = vcombine.low %v1000_v47, %v1016_v48  ;;  %v5908_v24 = vcombine.high %v1032_v21, %v1048_v22  ;;  %v1047_v47 = vld [vmem:[%s8527_s3 + $0xf88] sm:$0xff] }
 0x272   : > { %3676 = vmatpush1.bf16.msra.mxu1 %v5617_v41  ;;  %v935_v41 = vld [vmem:[%s8527_s3 + $0xc08] sm:$0xff] }
 0x273   : > { %3677 = vmatprep.subr.bf16.mxu1 %v5650_v43  ;;  %v5777_v43 = vcombine.low %v903_v51, %v919_v55  ;;  %v5810_v7 = vcombine.high %v935_v41, %v951_v23  ;;  %v666_v51 = vld [vmem:[%s8527_s3 + $0x3a0] sm:$0xff] }
 0x274   : > { %3725 = vmatpush1.bf16.msra.mxu0 %v5747_v5  ;;  %v554_v5 = vld [vmem:[%s8527_s3 + $0x20] sm:$0xff] }
 0x275   : > { %3726 = vmatprep.subr.bf16.mxu0 %v5780_v9  ;;  %v5907_v9 = vcombine.low %v1032_v21, %v1048_v22  ;;  %v5432_v12 = vcombine.high %v554_v5, %v570_v6  ;;  %v569_v21 = vld [vmem:[%s8527_s3 + $0x98] sm:$0xff] }
 0x276   : > { %3678 = vmatpush1.bf16.msra.mxu1 %v5649_v10  ;;  %v967_v10 = vld [vmem:[%s8527_s3 + $0xd08] sm:$0xff] }
 0x277   : > { %3679 = vmatprep.subr.bf16.mxu1 %v5682_v13  ;;  %v5809_v13 = vcombine.low %v935_v41, %v951_v23  ;;  %v5842_v1 = vcombine.high %v967_v10, %v983_v11  ;;  %v698_v41 = vld [vmem:[%s8527_s3 + $0x4a0] sm:$0xff] }
 0x278   : > { %3727 = vmatpush1.bf16.msra.mxu0 %v5779_v3  ;;  %v586_v3 = vld [vmem:[%s8527_s3 + $0x120] sm:$0xff] }
 0x279   : > { %3728 = vmatprep.subr.bf16.mxu0 %v5812_v33  ;;  %v5431_v33 = vcombine.low %v554_v5, %v570_v6  ;;  %v5464_v38 = vcombine.high %v586_v3, %v602_v15  ;;  %v601_v5 = vld [vmem:[%s8527_s3 + $0x198] sm:$0xff] }
 0x27a   : > { %3680 = vmatpush1.bf16.msra.mxu1 %v5681_v20  ;;  %v999_v20 = vld [vmem:[%s8527_s3 + $0xe08] sm:$0xff] }
 0x27b   : > { %3681 = vmatprep.subr.bf16.mxu1 %v5714_v39  ;;  %v5841_v39 = vcombine.low %v967_v10, %v983_v11  ;;  %v5874_v44 = vcombine.high %v999_v20, %v1015_v36  ;;  %v730_v10 = vld [vmem:[%s8527_s3 + $0x5a0] sm:$0xff] }
 0x27c   : > { %3729 = vmatpush1.bf16.msra.mxu0 %v5811_v28  ;;  %v618_v28 = vld [vmem:[%s8527_s3 + $0x220] sm:$0xff] }
 0x27d   : > { %3730 = vmatprep.subr.bf16.mxu0 %v5844_v45  ;;  %v5463_v45 = vcombine.low %v586_v3, %v602_v15  ;;  %v5496_v48 = vcombine.high %v618_v28, %v634_v42  ;;  %v633_v3 = vld [vmem:[%s8527_s3 + $0x298] sm:$0xff] }
 0x27e   : > { %3682 = vmatpush1.bf16.msra.mxu1 %v5713_v46  ;;  %v1031_v46 = vld [vmem:[%s8527_s3 + $0xf08] sm:$0xff] }
 0x27f   : > { %3683 = vmatprep.subr.bf16.mxu1 %v5746_v49  ;;  %v5873_v49 = vcombine.low %v999_v20, %v1015_v36  ;;  %v5906_v55 = vcombine.high %v1031_v46, %v1047_v47  ;;  %v762_v20 = vld [vmem:[%s8527_s3 + $0x6a0] sm:$0xff] }
 0x280   : > { %3731 = vmatpush1.bf16.msra.mxu0 %v5843_v50  ;;  %v650_v50 = vld [vmem:[%s8527_s3 + $0x320] sm:$0xff] }
 0x281   : > { %3732 = vmatprep.subr.bf16.mxu0 %v5876_v56  ;;  %v5495_v56 = vcombine.low %v618_v28, %v634_v42  ;;  %v5528_v22 = vcombine.high %v650_v50, %v666_v51  ;;  %v665_v28 = vld [vmem:[%s8527_s3 + $0x398] sm:$0xff] }
 0x282   : > { %3684 = vmatpush1.bf16.msra.mxu1 %v5745_v61  ;;  %v553_v61 = vld [vmem:[%s8527_s3 + $0x18] sm:$0xff] }
 0x283   : > { %3685 = vmatprep.subr.bf16.mxu1 %v5778_v62  ;;  %v5905_v62 = vcombine.low %v1031_v46, %v1047_v47  ;;  %v5430_v23 = vcombine.high %v553_v61, %v569_v21  ;;  %v794_v46 = vld [vmem:[%s8527_s3 + $0x7a0] sm:$0xff] }
 0x284   : > { %3733 = vmatpush1.bf16.msra.mxu0 %v5875_v35  ;;  %v682_v35 = vld [vmem:[%s8527_s3 + $0x420] sm:$0xff] }
 0x285   : > { %3734 = vmatprep.subr.bf16.mxu0 %v5908_v24  ;;  %v5527_v24 = vcombine.low %v650_v50, %v666_v51  ;;  %v5560_v6 = vcombine.high %v682_v35, %v698_v41  ;;  %v697_v50 = vld [vmem:[%s8527_s3 + $0x498] sm:$0xff] }
 0x286   : > { %3686 = vmatpush1.bf16.msra.mxu1 %v5777_v43  ;;  %v585_v43 = vld [vmem:[%s8527_s3 + $0x118] sm:$0xff] }
 0x287   : > { %3687 = vmatprep.subr.bf16.mxu1 %v5810_v7  ;;  %v5429_v7 = vcombine.low %v553_v61, %v569_v21  ;;  %v5462_v11 = vcombine.high %v585_v43, %v601_v5  ;;  %v826_v61 = vld [vmem:[%s8527_s3 + $0x8a0] sm:$0xff] }
 0x288   : > { %3735 = vmatpush1.bf16.msra.mxu0 %v5907_v9  ;;  %v714_v9 = vld [vmem:[%s8527_s3 + $0x520] sm:$0xff] }
 0x289   : > { %3786 = vmatprep.subr.bf16.mxu0 %v5432_v12  ;;  %v5559_v12 = vcombine.low %v682_v35, %v698_v41  ;;  %v5592_v15 = vcombine.high %v714_v9, %v730_v10  ;;  %v729_v35 = vld [vmem:[%s8527_s3 + $0x598] sm:$0xff] }
 0x28a   : > { %3688 = vmatpush1.bf16.msra.mxu1 %v5809_v13  ;;  %v617_v13 = vld [vmem:[%s8527_s3 + $0x218] sm:$0xff] }
 0x28b   : > { %3737 = vmatmul.mubr.bf16.vlgmr.msra.gmra.mrb[28].mxu0 %v6297_v57  ;;  %3689 = vmatprep.subr.bf16.mxu1 %v5842_v1  ;;  %v5461_v1 = vcombine.low %v585_v43, %v601_v5  ;;  %v5494_v36 = vcombine.high %v617_v13, %v633_v3  ;;  %v858_v43 = vld [vmem:[%s8527_s3 + $0x9a0] sm:$0xff] }
 0x28c   : > { %3787 = vmatpush1.bf16.msra.mxu0 %v5431_v33  ;;  %3818 = vmatprep.mubr.bf16.mxu0 %v6299_v58  ;;  %v746_v33 = vld [vmem:[%s8527_s3 + $0x620] sm:$0xff] }
 0x28d   : > { %3788 = vmatprep.subr.bf16.mxu0 %v5464_v38  ;;  %v5591_v38 = vcombine.low %v714_v9, %v730_v10  ;;  %v5624_v42 = vcombine.high %v746_v33, %v762_v20  ;;  %v761_v9 = vld [vmem:[%s8527_s3 + $0x698] sm:$0xff] }
 0x28e   : > { %3690 = vmatpush1.bf16.msra.mxu1 %v5841_v39  ;;  %v649_v39 = vld [vmem:[%s8527_s3 + $0x318] sm:$0xff] }
 0x28f   : > { %3691 = vmatprep.subr.bf16.mxu1 %v5874_v44  ;;  %v5493_v44 = vcombine.low %v617_v13, %v633_v3  ;;  %v5526_v47 = vcombine.high %v649_v39, %v665_v28  ;;  %v890_v13 = vld [vmem:[%s8527_s3 + $0xaa0] sm:$0xff] }
 0x290   : > { %3789 = vmatpush1.bf16.msra.mxu0 %v5463_v45  ;;  %v778_v45 = vld [vmem:[%s8527_s3 + $0x720] sm:$0xff] }
 0x291   : > { %3790 = vmatprep.subr.bf16.mxu0 %v5496_v48  ;;  %v5623_v48 = vcombine.low %v746_v33, %v762_v20  ;;  %v5656_v51 = vcombine.high %v778_v45, %v794_v46  ;;  %v793_v33 = vld [vmem:[%s8527_s3 + $0x798] sm:$0xff] }
 0x292   : > { %3692 = vmatpush1.bf16.msra.mxu1 %v5873_v49  ;;  %v681_v49 = vld [vmem:[%s8527_s3 + $0x418] sm:$0xff] }
 0x293   : > { %3693 = vmatprep.subr.bf16.mxu1 %v5906_v55  ;;  %v5525_v55 = vcombine.low %v649_v39, %v665_v28  ;;  %v5558_v21 = vcombine.high %v681_v49, %v697_v50  ;;  %v922_v39 = vld [vmem:[%s8527_s3 + $0xba0] sm:$0xff] }
 0x294   : > { %3791 = vmatpush1.bf16.msra.mxu0 %v5495_v56  ;;  %v810_v56 = vld [vmem:[%s8527_s3 + $0x820] sm:$0xff] }
 0x295   : > { %3792 = vmatprep.subr.bf16.mxu0 %v5528_v22  ;;  %v5655_v22 = vcombine.low %v778_v45, %v794_v46  ;;  %v5688_v41 = vcombine.high %v810_v56, %v826_v61  ;;  %v825_v45 = vld [vmem:[%s8527_s3 + $0x898] sm:$0xff] }
 0x296   : > { %3694 = vmatpush1.bf16.msra.mxu1 %v5905_v62  ;;  %v713_v62 = vld [vmem:[%s8527_s3 + $0x518] sm:$0xff] }
 0x297   : > { %3745 = vmatprep.subr.bf16.mxu1 %v5430_v23  ;;  %v5557_v23 = vcombine.low %v681_v49, %v697_v50  ;;  %v5590_v5 = vcombine.high %v713_v62, %v729_v35  ;;  %v954_v49 = vld [vmem:[%s8527_s3 + $0xca0] sm:$0xff] }
 0x298   : > { %3793 = vmatpush1.bf16.msra.mxu0 %v5527_v24  ;;  %v842_v24 = vld [vmem:[%s8527_s3 + $0x920] sm:$0xff] }
 0x299   : > { %3696 = vmatmul.mubr.bf16.vlgmr.msra.gmra.mrb[4].mxu1 %v6297_v57  ;;  %3794 = vmatprep.subr.bf16.mxu0 %v5560_v6  ;;  %v5687_v6 = vcombine.low %v810_v56, %v826_v61  ;;  %v5720_v10 = vcombine.high %v842_v24, %v858_v43  ;;  %v857_v56 = vld [vmem:[%s8527_s3 + $0x998] sm:$0xff] }
 0x29a   : > { %3746 = vmatpush1.bf16.msra.mxu1 %v5429_v7  ;;  %3777 = vmatprep.mubr.bf16.mxu1 %v6299_v58  ;;  %v745_v7 = vld [vmem:[%s8527_s3 + $0x618] sm:$0xff] }
 0x29b   : > { %3747 = vmatprep.subr.bf16.mxu1 %v5462_v11  ;;  %v5589_v11 = vcombine.low %v713_v62, %v729_v35  ;;  %v5622_v3 = vcombine.high %v745_v7, %v761_v9  ;;  %v986_v62 = vld [vmem:[%s8527_s3 + $0xda0] sm:$0xff] }
 0x29c   : > { %3795 = vmatpush1.bf16.msra.mxu0 %v5559_v12  ;;  %v874_v12 = vld [vmem:[%s8527_s3 + $0xa20] sm:$0xff] }
 0x29d   : > { %3796 = vmatprep.subr.bf16.mxu0 %v5592_v15  ;;  %v5719_v15 = vcombine.low %v842_v24, %v858_v43  ;;  %v5752_v20 = vcombine.high %v874_v12, %v890_v13  ;;  %v889_v24 = vld [vmem:[%s8527_s3 + $0xa98] sm:$0xff] }
 0x29e   : > { %3748 = vmatpush1.bf16.msra.mxu1 %v5461_v1  ;;  %v777_v1 = vld [vmem:[%s8527_s3 + $0x718] sm:$0xff] }
 0x29f   : > { %3749 = vmatprep.subr.bf16.mxu1 %v5494_v36  ;;  %v5621_v36 = vcombine.low %v745_v7, %v761_v9  ;;  %v5654_v28 = vcombine.high %v777_v1, %v793_v33  ;;  %v1018_v7 = vld [vmem:[%s8527_s3 + $0xea0] sm:$0xff] }
 0x2a0   : > { %3797 = vmatpush1.bf16.msra.mxu0 %v5591_v38  ;;  %v906_v38 = vld [vmem:[%s8527_s3 + $0xb20] sm:$0xff] }
 0x2a1   : > { %3798 = vmatprep.subr.bf16.mxu0 %v5624_v42  ;;  %v5751_v42 = vcombine.low %v874_v12, %v890_v13  ;;  %v5784_v46 = vcombine.high %v906_v38, %v922_v39  ;;  %v921_v12 = vld [vmem:[%s8527_s3 + $0xb98] sm:$0xff] }
 0x2a2   : > { %3750 = vmatpush1.bf16.msra.mxu1 %v5493_v44  ;;  %v809_v44 = vld [vmem:[%s8527_s3 + $0x818] sm:$0xff] }
 0x2a3   : > { %3751 = vmatprep.subr.bf16.mxu1 %v5526_v47  ;;  %v5653_v47 = vcombine.low %v777_v1, %v793_v33  ;;  %v5686_v50 = vcombine.high %v809_v44, %v825_v45  ;;  %v1050_v1 = vld [vmem:[%s8527_s3 + $0xfa0] sm:$0xff] }
 0x2a4   : > { %3799 = vmatpush1.bf16.msra.mxu0 %v5623_v48  ;;  %v938_v48 = vld [vmem:[%s8527_s3 + $0xc20] sm:$0xff] }
 0x2a5   : > { %3800 = vmatprep.subr.bf16.mxu0 %v5656_v51  ;;  %v5783_v51 = vcombine.low %v906_v38, %v922_v39  ;;  %v5816_v61 = vcombine.high %v938_v48, %v954_v49  ;;  %v953_v38 = vld [vmem:[%s8527_s3 + $0xc98] sm:$0xff] }
 0x2a6   : > { %3752 = vmatpush1.bf16.msra.mxu1 %v5525_v55  ;;  %v841_v55 = vld [vmem:[%s8527_s3 + $0x918] sm:$0xff] }
 0x2a7   : > { %3753 = vmatprep.subr.bf16.mxu1 %v5558_v21  ;;  %v5685_v21 = vcombine.low %v809_v44, %v825_v45  ;;  %v5718_v35 = vcombine.high %v841_v55, %v857_v56  ;;  %v572_v44 = vld [vmem:[%s8527_s3 + $0xb0] sm:$0xff] }
 0x2a8   : > { %3801 = vmatpush1.bf16.msra.mxu0 %v5655_v22  ;;  %v970_v22 = vld [vmem:[%s8527_s3 + $0xd20] sm:$0xff] }
 0x2a9   : > { %3802 = vmatprep.subr.bf16.mxu0 %v5688_v41  ;;  %v5815_v41 = vcombine.low %v938_v48, %v954_v49  ;;  %v5848_v43 = vcombine.high %v970_v22, %v986_v62  ;;  %v985_v48 = vld [vmem:[%s8527_s3 + $0xd98] sm:$0xff] }
 0x2aa   : > { %3754 = vmatpush1.bf16.msra.mxu1 %v5557_v23  ;;  %v873_v23 = vld [vmem:[%s8527_s3 + $0xa18] sm:$0xff] }
 0x2ab   : > { %3755 = vmatprep.subr.bf16.mxu1 %v5590_v5  ;;  %v5717_v5 = vcombine.low %v841_v55, %v857_v56  ;;  %v5750_v9 = vcombine.high %v873_v23, %v889_v24  ;;  %v604_v55 = vld [vmem:[%s8527_s3 + $0x1b0] sm:$0xff] }
 0x2ac   : > { %3803 = vmatpush1.bf16.msra.mxu0 %v5687_v6  ;;  %v1002_v6 = vld [vmem:[%s8527_s3 + $0xe20] sm:$0xff] }
 0x2ad   : > { %3804 = vmatprep.subr.bf16.mxu0 %v5720_v10  ;;  %v5847_v10 = vcombine.low %v970_v22, %v986_v62  ;;  %v5880_v13 = vcombine.high %v1002_v6, %v1018_v7  ;;  %v1017_v22 = vld [vmem:[%s8527_s3 + $0xe98] sm:$0xff] }
 0x2ae   : > { %3756 = vmatpush1.bf16.msra.mxu1 %v5589_v11  ;;  %v905_v11 = vld [vmem:[%s8527_s3 + $0xb18] sm:$0xff] }
 0x2af   : > { %3757 = vmatprep.subr.bf16.mxu1 %v5622_v3  ;;  %v5749_v3 = vcombine.low %v873_v23, %v889_v24  ;;  %v5782_v33 = vcombine.high %v905_v11, %v921_v12  ;;  %v636_v23 = vld [vmem:[%s8527_s3 + $0x2b0] sm:$0xff] }
 0x2b0   : > { %3805 = vmatpush1.bf16.msra.mxu0 %v5719_v15  ;;  %v1034_v15 = vld [vmem:[%s8527_s3 + $0xf20] sm:$0xff] }
 0x2b1   : > { %3806 = vmatprep.subr.bf16.mxu0 %v5752_v20  ;;  %v5879_v20 = vcombine.low %v1002_v6, %v1018_v7  ;;  %v5912_v39 = vcombine.high %v1034_v15, %v1050_v1  ;;  %v1049_v6 = vld [vmem:[%s8527_s3 + $0xf98] sm:$0xff] }
 0x2b2   : > { %3758 = vmatpush1.bf16.msra.mxu1 %v5621_v36  ;;  %v937_v36 = vld [vmem:[%s8527_s3 + $0xc18] sm:$0xff] }
 0x2b3   : > { %3759 = vmatprep.subr.bf16.mxu1 %v5654_v28  ;;  %v5781_v28 = vcombine.low %v905_v11, %v921_v12  ;;  %v5814_v45 = vcombine.high %v937_v36, %v953_v38  ;;  %v668_v11 = vld [vmem:[%s8527_s3 + $0x3b0] sm:$0xff] }
 0x2b4   : > { %3807 = vmatpush1.bf16.msra.mxu0 %v5751_v42  ;;  %v556_v42 = vld [vmem:[%s8527_s3 + $0x30] sm:$0xff] }
 0x2b5   : > { %3808 = vmatprep.subr.bf16.mxu0 %v5784_v46  ;;  %v5911_v46 = vcombine.low %v1034_v15, %v1050_v1  ;;  %v5436_v49 = vcombine.high %v556_v42, %v572_v44  ;;  %v571_v15 = vld [vmem:[%s8527_s3 + $0xa8] sm:$0xff] }
 0x2b6   : > { %3760 = vmatpush1.bf16.msra.mxu1 %v5653_v47  ;;  %v969_v47 = vld [vmem:[%s8527_s3 + $0xd18] sm:$0xff] }
 0x2b7   : > { %3761 = vmatprep.subr.bf16.mxu1 %v5686_v50  ;;  %v5813_v50 = vcombine.low %v937_v36, %v953_v38  ;;  %v5846_v56 = vcombine.high %v969_v47, %v985_v48  ;;  %v700_v36 = vld [vmem:[%s8527_s3 + $0x4b0] sm:$0xff] }
 0x2b8   : > { %3809 = vmatpush1.bf16.msra.mxu0 %v5783_v51  ;;  %v588_v51 = vld [vmem:[%s8527_s3 + $0x130] sm:$0xff] }
 0x2b9   : > { %3810 = vmatprep.subr.bf16.mxu0 %v5816_v61  ;;  %v5435_v61 = vcombine.low %v556_v42, %v572_v44  ;;  %v5468_v62 = vcombine.high %v588_v51, %v604_v55  ;;  %v603_v42 = vld [vmem:[%s8527_s3 + $0x1a8] sm:$0xff] }
 0x2ba   : > { %3762 = vmatpush1.bf16.msra.mxu1 %v5685_v21  ;;  %v1001_v21 = vld [vmem:[%s8527_s3 + $0xe18] sm:$0xff] }
 0x2bb   : > { %3763 = vmatprep.subr.bf16.mxu1 %v5718_v35  ;;  %v5845_v35 = vcombine.low %v969_v47, %v985_v48  ;;  %v5878_v24 = vcombine.high %v1001_v21, %v1017_v22  ;;  %v732_v47 = vld [vmem:[%s8527_s3 + $0x5b0] sm:$0xff] }
 0x2bc   : > { %3811 = vmatpush1.bf16.msra.mxu0 %v5815_v41  ;;  %v620_v41 = vld [vmem:[%s8527_s3 + $0x230] sm:$0xff] }
 0x2bd   : > { %3812 = vmatprep.subr.bf16.mxu0 %v5848_v43  ;;  %v5467_v43 = vcombine.low %v588_v51, %v604_v55  ;;  %v5500_v7 = vcombine.high %v620_v41, %v636_v23  ;;  %v635_v51 = vld [vmem:[%s8527_s3 + $0x2a8] sm:$0xff] }
 0x2be   : > { %3764 = vmatpush1.bf16.msra.mxu1 %v5717_v5  ;;  %v1033_v5 = vld [vmem:[%s8527_s3 + $0xf18] sm:$0xff] }
 0x2bf   : > { %3765 = vmatprep.subr.bf16.mxu1 %v5750_v9  ;;  %v5877_v9 = vcombine.low %v1001_v21, %v1017_v22  ;;  %v5910_v12 = vcombine.high %v1033_v5, %v1049_v6  ;;  %v764_v21 = vld [vmem:[%s8527_s3 + $0x6b0] sm:$0xff] }
 0x2c0   : > { %3813 = vmatpush1.bf16.msra.mxu0 %v5847_v10  ;;  %v652_v10 = vld [vmem:[%s8527_s3 + $0x330] sm:$0xff] }
 0x2c1   : > { %3814 = vmatprep.subr.bf16.mxu0 %v5880_v13  ;;  %v5499_v13 = vcombine.low %v620_v41, %v636_v23  ;;  %v5532_v1 = vcombine.high %v652_v10, %v668_v11  ;;  %v667_v41 = vld [vmem:[%s8527_s3 + $0x3a8] sm:$0xff] }
 0x2c2   : > { %3766 = vmatpush1.bf16.msra.mxu1 %v5749_v3  ;;  %v555_v3 = vld [vmem:[%s8527_s3 + $0x28] sm:$0xff] }
 0x2c3   : > { %3767 = vmatprep.subr.bf16.mxu1 %v5782_v33  ;;  %v5909_v33 = vcombine.low %v1033_v5, %v1049_v6  ;;  %v5434_v38 = vcombine.high %v555_v3, %v571_v15  ;;  %v796_v5 = vld [vmem:[%s8527_s3 + $0x7b0] sm:$0xff] }
 0x2c4   : > { %3815 = vmatpush1.bf16.msra.mxu0 %v5879_v20  ;;  %v684_v20 = vld [vmem:[%s8527_s3 + $0x430] sm:$0xff] }
 0x2c5   : > { %3816 = vmatprep.subr.bf16.mxu0 %v5912_v39  ;;  %v5531_v39 = vcombine.low %v652_v10, %v668_v11  ;;  %v5564_v44 = vcombine.high %v684_v20, %v700_v36  ;;  %v699_v10 = vld [vmem:[%s8527_s3 + $0x4a8] sm:$0xff] }
 0x2c6   : > { %3768 = vmatpush1.bf16.msra.mxu1 %v5781_v28  ;;  %v587_v28 = vld [vmem:[%s8527_s3 + $0x128] sm:$0xff] }
 0x2c7   : > { %3769 = vmatprep.subr.bf16.mxu1 %v5814_v45  ;;  %v5433_v45 = vcombine.low %v555_v3, %v571_v15  ;;  %v5466_v48 = vcombine.high %v587_v28, %v603_v42  ;;  %v828_v3 = vld [vmem:[%s8527_s3 + $0x8b0] sm:$0xff] }
 0x2c8   : > { %3817 = vmatpush1.bf16.msra.mxu0 %v5911_v46  ;;  %v716_v46 = vld [vmem:[%s8527_s3 + $0x530] sm:$0xff] }
 0x2c9   : > { %3868 = vmatprep.subr.bf16.mxu0 %v5436_v49  ;;  %v5563_v49 = vcombine.low %v684_v20, %v700_v36  ;;  %v5596_v55 = vcombine.high %v716_v46, %v732_v47  ;;  %v731_v20 = vld [vmem:[%s8527_s3 + $0x5a8] sm:$0xff] }
 0x2ca   : > { %3770 = vmatpush1.bf16.msra.mxu1 %v5813_v50  ;;  %v619_v50 = vld [vmem:[%s8527_s3 + $0x228] sm:$0xff] }
 0x2cb   : > { %3819 = vmatmul.mubr.bf16.vlgmr.msra.gmra.mrb[32].mxu0 %v6297_v57  ;;  %3771 = vmatprep.subr.bf16.mxu1 %v5846_v56  ;;  %v5465_v56 = vcombine.low %v587_v28, %v603_v42  ;;  %v5498_v22 = vcombine.high %v619_v50, %v635_v51  ;;  %v860_v28 = vld [vmem:[%s8527_s3 + $0x9b0] sm:$0xff] }
 0x2cc   : > { %3869 = vmatpush1.bf16.msra.mxu0 %v5435_v61  ;;  %3900 = vmatprep.mubr.bf16.mxu0 %v6299_v58  ;;  %v748_v61 = vld [vmem:[%s8527_s3 + $0x630] sm:$0xff] }
 0x2cd   : > { %3870 = vmatprep.subr.bf16.mxu0 %v5468_v62  ;;  %v5595_v62 = vcombine.low %v716_v46, %v732_v47  ;;  %v5628_v23 = vcombine.high %v748_v61, %v764_v21  ;;  %v763_v46 = vld [vmem:[%s8527_s3 + $0x6a8] sm:$0xff] }
 0x2ce   : > { %3772 = vmatpush1.bf16.msra.mxu1 %v5845_v35  ;;  %v651_v35 = vld [vmem:[%s8527_s3 + $0x328] sm:$0xff] }
 0x2cf   : > { %3773 = vmatprep.subr.bf16.mxu1 %v5878_v24  ;;  %v5497_v24 = vcombine.low %v619_v50, %v635_v51  ;;  %v5530_v6 = vcombine.high %v651_v35, %v667_v41  ;;  %v892_v50 = vld [vmem:[%s8527_s3 + $0xab0] sm:$0xff] }
 0x2d0   : > { %3871 = vmatpush1.bf16.msra.mxu0 %v5467_v43  ;;  %v780_v43 = vld [vmem:[%s8527_s3 + $0x730] sm:$0xff] }
 0x2d1   : > { %3872 = vmatprep.subr.bf16.mxu0 %v5500_v7  ;;  %v5627_v7 = vcombine.low %v748_v61, %v764_v21  ;;  %v5660_v11 = vcombine.high %v780_v43, %v796_v5  ;;  %v795_v61 = vld [vmem:[%s8527_s3 + $0x7a8] sm:$0xff] }
 0x2d2   : > { %3774 = vmatpush1.bf16.msra.mxu1 %v5877_v9  ;;  %v683_v9 = vld [vmem:[%s8527_s3 + $0x428] sm:$0xff] }
 0x2d3   : > { %3775 = vmatprep.subr.bf16.mxu1 %v5910_v12  ;;  %v5529_v12 = vcombine.low %v651_v35, %v667_v41  ;;  %v5562_v15 = vcombine.high %v683_v9, %v699_v10  ;;  %v924_v35 = vld [vmem:[%s8527_s3 + $0xbb0] sm:$0xff] }
 0x2d4   : > { %3873 = vmatpush1.bf16.msra.mxu0 %v5499_v13  ;;  %v812_v13 = vld [vmem:[%s8527_s3 + $0x830] sm:$0xff] }
 0x2d5   : > { %3874 = vmatprep.subr.bf16.mxu0 %v5532_v1  ;;  %v5659_v1 = vcombine.low %v780_v43, %v796_v5  ;;  %v5692_v36 = vcombine.high %v812_v13, %v828_v3  ;;  %v827_v43 = vld [vmem:[%s8527_s3 + $0x8a8] sm:$0xff] }
 0x2d6   : > { %3776 = vmatpush1.bf16.msra.mxu1 %v5909_v33  ;;  %v715_v33 = vld [vmem:[%s8527_s3 + $0x528] sm:$0xff] }
 0x2d7   : > { %3827 = vmatprep.subr.bf16.mxu1 %v5434_v38  ;;  %v5561_v38 = vcombine.low %v683_v9, %v699_v10  ;;  %v5594_v42 = vcombine.high %v715_v33, %v731_v20  ;;  %v956_v9 = vld [vmem:[%s8527_s3 + $0xcb0] sm:$0xff] }
 0x2d8   : > { %3875 = vmatpush1.bf16.msra.mxu0 %v5531_v39  ;;  %v844_v39 = vld [vmem:[%s8527_s3 + $0x930] sm:$0xff] }
 0x2d9   : > { %3778 = vmatmul.mubr.bf16.vlgmr.msra.gmra.mrb[8].mxu1 %v6297_v57  ;;  %3876 = vmatprep.subr.bf16.mxu0 %v5564_v44  ;;  %v5691_v44 = vcombine.low %v812_v13, %v828_v3  ;;  %v5724_v47 = vcombine.high %v844_v39, %v860_v28  ;;  %v859_v13 = vld [vmem:[%s8527_s3 + $0x9a8] sm:$0xff] }
 0x2da   : > { %3828 = vmatpush1.bf16.msra.mxu1 %v5433_v45  ;;  %3859 = vmatprep.mubr.bf16.mxu1 %v6299_v58  ;;  %v747_v45 = vld [vmem:[%s8527_s3 + $0x628] sm:$0xff] }
 0x2db   : > { %3829 = vmatprep.subr.bf16.mxu1 %v5466_v48  ;;  %v5593_v48 = vcombine.low %v715_v33, %v731_v20  ;;  %v5626_v51 = vcombine.high %v747_v45, %v763_v46  ;;  %v988_v33 = vld [vmem:[%s8527_s3 + $0xdb0] sm:$0xff] }
 0x2dc   : > { %3877 = vmatpush1.bf16.msra.mxu0 %v5563_v49  ;;  %v876_v49 = vld [vmem:[%s8527_s3 + $0xa30] sm:$0xff] }
 0x2dd   : > { %3878 = vmatprep.subr.bf16.mxu0 %v5596_v55  ;;  %v5723_v55 = vcombine.low %v844_v39, %v860_v28  ;;  %v5756_v21 = vcombine.high %v876_v49, %v892_v50  ;;  %v891_v39 = vld [vmem:[%s8527_s3 + $0xaa8] sm:$0xff] }
 0x2de   : > { %3830 = vmatpush1.bf16.msra.mxu1 %v5465_v56  ;;  %v779_v56 = vld [vmem:[%s8527_s3 + $0x728] sm:$0xff] }
 0x2df   : > { %3831 = vmatprep.subr.bf16.mxu1 %v5498_v22  ;;  %v5625_v22 = vcombine.low %v747_v45, %v763_v46  ;;  %v5658_v41 = vcombine.high %v779_v56, %v795_v61  ;;  %v1020_v45 = vld [vmem:[%s8527_s3 + $0xeb0] sm:$0xff] }
 0x2e0   : > { %3879 = vmatpush1.bf16.msra.mxu0 %v5595_v62  ;;  %v908_v62 = vld [vmem:[%s8527_s3 + $0xb30] sm:$0xff] }
 0x2e1   : > { %3880 = vmatprep.subr.bf16.mxu0 %v5628_v23  ;;  %v5755_v23 = vcombine.low %v876_v49, %v892_v50  ;;  %v5788_v5 = vcombine.high %v908_v62, %v924_v35  ;;  %v923_v49 = vld [vmem:[%s8527_s3 + $0xba8] sm:$0xff] }
 0x2e2   : > { %3832 = vmatpush1.bf16.msra.mxu1 %v5497_v24  ;;  %v811_v24 = vld [vmem:[%s8527_s3 + $0x828] sm:$0xff] }
 0x2e3   : > { %3833 = vmatprep.subr.bf16.mxu1 %v5530_v6  ;;  %v5657_v6 = vcombine.low %v779_v56, %v795_v61  ;;  %v5690_v10 = vcombine.high %v811_v24, %v827_v43  ;;  %v1052_v56 = vld [vmem:[%s8527_s3 + $0xfb0] sm:$0xff] }
 0x2e4   : > { %3881 = vmatpush1.bf16.msra.mxu0 %v5627_v7  ;;  %v940_v7 = vld [vmem:[%s8527_s3 + $0xc30] sm:$0xff] }
 0x2e5   : > { %3882 = vmatprep.subr.bf16.mxu0 %v5660_v11  ;;  %v5787_v11 = vcombine.low %v908_v62, %v924_v35  ;;  %v5820_v3 = vcombine.high %v940_v7, %v956_v9  ;;  %v955_v62 = vld [vmem:[%s8527_s3 + $0xca8] sm:$0xff] }
 0x2e6   : > { %3834 = vmatpush1.bf16.msra.mxu1 %v5529_v12  ;;  %v843_v12 = vld [vmem:[%s8527_s3 + $0x928] sm:$0xff] }
 0x2e7   : > { %3835 = vmatprep.subr.bf16.mxu1 %v5562_v15  ;;  %v5689_v15 = vcombine.low %v811_v24, %v827_v43  ;;  %v5722_v20 = vcombine.high %v843_v12, %v859_v13  ;;  %v574_v24 = vld [vmem:[%s8527_s3 + $0xc0] sm:$0xff] }
 0x2e8   : > { %3883 = vmatpush1.bf16.msra.mxu0 %v5659_v1  ;;  %v972_v1 = vld [vmem:[%s8527_s3 + $0xd30] sm:$0xff] }
 0x2e9   : > { %3884 = vmatprep.subr.bf16.mxu0 %v5692_v36  ;;  %v5819_v36 = vcombine.low %v940_v7, %v956_v9  ;;  %v5852_v28 = vcombine.high %v972_v1, %v988_v33  ;;  %v987_v7 = vld [vmem:[%s8527_s3 + $0xda8] sm:$0xff] }
 0x2ea   : > { %3836 = vmatpush1.bf16.msra.mxu1 %v5561_v38  ;;  %v875_v38 = vld [vmem:[%s8527_s3 + $0xa28] sm:$0xff] }
 0x2eb   : > { %3837 = vmatprep.subr.bf16.mxu1 %v5594_v42  ;;  %v5721_v42 = vcombine.low %v843_v12, %v859_v13  ;;  %v5754_v46 = vcombine.high %v875_v38, %v891_v39  ;;  %v606_v12 = vld [vmem:[%s8527_s3 + $0x1c0] sm:$0xff] }
 0x2ec   : > { %3885 = vmatpush1.bf16.msra.mxu0 %v5691_v44  ;;  %v1004_v44 = vld [vmem:[%s8527_s3 + $0xe30] sm:$0xff] }
 0x2ed   : > { %3886 = vmatprep.subr.bf16.mxu0 %v5724_v47  ;;  %v5851_v47 = vcombine.low %v972_v1, %v988_v33  ;;  %v5884_v50 = vcombine.high %v1004_v44, %v1020_v45  ;;  %v1019_v1 = vld [vmem:[%s8527_s3 + $0xea8] sm:$0xff] }
 0x2ee   : > { %3838 = vmatpush1.bf16.msra.mxu1 %v5593_v48  ;;  %v907_v48 = vld [vmem:[%s8527_s3 + $0xb28] sm:$0xff] }
 0x2ef   : > { %3839 = vmatprep.subr.bf16.mxu1 %v5626_v51  ;;  %v5753_v51 = vcombine.low %v875_v38, %v891_v39  ;;  %v5786_v61 = vcombine.high %v907_v48, %v923_v49  ;;  %v638_v38 = vld [vmem:[%s8527_s3 + $0x2c0] sm:$0xff] }
 0x2f0   : > { %3887 = vmatpush1.bf16.msra.mxu0 %v5723_v55  ;;  %v1036_v55 = vld [vmem:[%s8527_s3 + $0xf30] sm:$0xff] }
 0x2f1   : > { %3888 = vmatprep.subr.bf16.mxu0 %v5756_v21  ;;  %v5883_v21 = vcombine.low %v1004_v44, %v1020_v45  ;;  %v5916_v35 = vcombine.high %v1036_v55, %v1052_v56  ;;  %v1051_v44 = vld [vmem:[%s8527_s3 + $0xfa8] sm:$0xff] }
 0x2f2   : > { %3840 = vmatpush1.bf16.msra.mxu1 %v5625_v22  ;;  %v939_v22 = vld [vmem:[%s8527_s3 + $0xc28] sm:$0xff] }
 0x2f3   : > { %3841 = vmatprep.subr.bf16.mxu1 %v5658_v41  ;;  %v5785_v41 = vcombine.low %v907_v48, %v923_v49  ;;  %v5818_v43 = vcombine.high %v939_v22, %v955_v62  ;;  %v670_v48 = vld [vmem:[%s8527_s3 + $0x3c0] sm:$0xff] }
 0x2f4   : > { %3889 = vmatpush1.bf16.msra.mxu0 %v5755_v23  ;;  %v558_v23 = vld [vmem:[%s8527_s3 + $0x40] sm:$0xff] }
 0x2f5   : > { %3890 = vmatprep.subr.bf16.mxu0 %v5788_v5  ;;  %v5915_v5 = vcombine.low %v1036_v55, %v1052_v56  ;;  %v5440_v9 = vcombine.high %v558_v23, %v574_v24  ;;  %v573_v55 = vld [vmem:[%s8527_s3 + $0xb8] sm:$0xff] }
 0x2f6   : > { %3842 = vmatpush1.bf16.msra.mxu1 %v5657_v6  ;;  %v971_v6 = vld [vmem:[%s8527_s3 + $0xd28] sm:$0xff] }
 0x2f7   : > { %3843 = vmatprep.subr.bf16.mxu1 %v5690_v10  ;;  %v5817_v10 = vcombine.low %v939_v22, %v955_v62  ;;  %v5850_v13 = vcombine.high %v971_v6, %v987_v7  ;;  %v702_v22 = vld [vmem:[%s8527_s3 + $0x4c0] sm:$0xff]  ;;  %v4278_v62 = vlaneseq }
 0x2f8   : > { %3891 = vmatpush1.bf16.msra.mxu0 %v5787_v11  ;;  %v590_v11 = vld [vmem:[%s8527_s3 + $0x140] sm:$0xff] }
 0x2f9   : > { %3892 = vmatprep.subr.bf16.mxu0 %v5820_v3  ;;  %v5439_v3 = vcombine.low %v558_v23, %v574_v24  ;;  %v5472_v33 = vcombine.high %v590_v11, %v606_v12  ;;  %v589_v23 = vld [vmem:[%s8527_s3 + $0x138] sm:$0xff] }
 0x2fa   : > { %3844 = vmatpush1.bf16.msra.mxu1 %v5689_v15  ;;  %v1003_v15 = vld [vmem:[%s8527_s3 + $0xe28] sm:$0xff]  ;;  %v605_v24 = vld [vmem:[%s8527_s3 + $0x1b8] sm:$0xff] }
 0x2fb   : > { %3845 = vmatprep.subr.bf16.mxu1 %v5722_v20  ;;  %v5849_v20 = vcombine.low %v971_v6, %v987_v7  ;;  %v5882_v39 = vcombine.high %v1003_v15, %v1019_v1  ;;  %v718_v6 = vld [vmem:[%s8527_s3 + $0x540] sm:$0xff] }
 0x2fc   : > { %3893 = vmatpush1.bf16.msra.mxu0 %v5819_v36  ;;  %v622_v36 = vld [vmem:[%s8527_s3 + $0x240] sm:$0xff] }
 0x2fd   : > { %3894 = vmatprep.subr.bf16.mxu0 %v5852_v28  ;;  %v5471_v28 = vcombine.low %v590_v11, %v606_v12  ;;  %v5504_v45 = vcombine.high %v622_v36, %v638_v38  ;;  %v734_v7 = vld [vmem:[%s8527_s3 + $0x5c0] sm:$0xff]  ;;  %v621_v12 = vld [vmem:[%s8527_s3 + $0x238] sm:$0xff] }
 0x2fe   : > { %3846 = vmatpush1.bf16.msra.mxu1 %v5721_v42  ;;  %v1035_v42 = vld [vmem:[%s8527_s3 + $0xf28] sm:$0xff] }
 0x2ff   : > { %3847 = vmatprep.subr.bf16.mxu1 %v5754_v46  ;;  %v5881_v46 = vcombine.low %v1003_v15, %v1019_v1  ;;  %v5914_v49 = vcombine.high %v1035_v42, %v1051_v44  ;;  %v5469_v15 = vcombine.low %v589_v23, %v605_v24  ;;  %v750_v1 = vld [vmem:[%s8527_s3 + $0x640] sm:$0xff] }
 0x300   : > { %3895 = vmatpush1.bf16.msra.mxu0 %v5851_v47  ;;  %v654_v47 = vld [vmem:[%s8527_s3 + $0x340] sm:$0xff] }
 0x301   : > { %3896 = vmatprep.subr.bf16.mxu0 %v5884_v50  ;;  %v5503_v50 = vcombine.low %v622_v36, %v638_v38  ;;  %v5536_v56 = vcombine.high %v654_v47, %v670_v48  ;;  %v5599_v38 = vcombine.low %v718_v6, %v734_v7 }
 0x302   : > { %3848 = vmatpush1.bf16.msra.mxu1 %v5753_v51  ;;  %v557_v51 = vld [vmem:[%s8527_s3 + $0x38] sm:$0xff] }
 0x303   : > { %3849 = vmatprep.subr.bf16.mxu1 %v5786_v61  ;;  %v5913_v61 = vcombine.low %v1035_v42, %v1051_v44 }
 0x304   : > { %3897 = vmatpush1.bf16.msra.mxu0 %v5883_v21  ;;  %v686_v21 = vld [vmem:[%s8527_s3 + $0x440] sm:$0xff] }
 0x305   : > { %3898 = vmatprep.subr.bf16.mxu0 %v5916_v35  ;;  %v5438_v35 = vcombine.high %v557_v51, %v573_v55  ;;  %v5567_v11 = vcombine.low %v686_v21, %v702_v22 }
 0x306   : > { %3850 = vmatpush1.bf16.msra.mxu1 %v5785_v41  ;;  %v5535_v41 = vcombine.low %v654_v47, %v670_v48 }
 0x307   : > { %3851 = vmatprep.subr.bf16.mxu1 %v5818_v43  ;;  %v5568_v43 = vcombine.high %v686_v21, %v702_v22 }
 0x308   : > { %3899 = vmatpush1.bf16.msra.mxu0 %v5915_v5  ;;  %v5437_v5 = vcombine.low %v557_v51, %v573_v55  ;;  %v782_v51 = vld [vmem:[%s8527_s3 + $0x740] sm:$0xff] }
 0x309   : > { %3950 = vmatprep.subr.bf16.mxu0 %v5440_v9  ;;  %v6996_v9 = vshrl.u32 %v4278_v62, 7  ;;  %v798_v55 = vld [vmem:[%s8527_s3 + $0x7c0] sm:$0xff] }
 0x30a   : > { %3852 = vmatpush1.bf16.msra.mxu1 %v5817_v10  ;;  %v5470_v10 = vcombine.high %v589_v23, %v605_v24 }
 0x30b   : > { %3901 = vmatmul.mubr.bf16.vlgmr.msra.gmra.mrb[36].mxu0 %v6297_v57  ;;  %3853 = vmatprep.subr.bf16.mxu1 %v5850_v13  ;;  %v637_v13 = vld [vmem:[%s8527_s3 + $0x2b8] sm:$0xff] }
 0x30c   : > { %3951 = vmatpush1.bf16.msra.mxu0 %v5439_v3  ;;  %3982 = vmatprep.mubr.bf16.mxu0 %v6299_v58  ;;  %v5600_v3 = vcombine.high %v718_v6, %v734_v7  ;;  %v5502_v36 = vcombine.high %v621_v12, %v637_v13 }
 0x30d   : > { %3952 = vmatprep.subr.bf16.mxu0 %v5472_v33  ;;  %v766_v33 = vld [vmem:[%s8527_s3 + $0x6c0] sm:$0xff] }
 0x30e   : > { %3854 = vmatpush1.bf16.msra.mxu1 %v5849_v20  ;;  %v7013_v20 = vsub.s32 0, %v6996_v9  ;;  %v5631_v24 = vcombine.low %v750_v1, %v766_v33 }
 0x30f   : > { %3855 = vmatprep.subr.bf16.mxu1 %v5882_v39  ;;  %v653_v39 = vld [vmem:[%s8527_s3 + $0x338] sm:$0xff] }
 0x310   : > { %3953 = vmatpush1.bf16.msra.mxu0 %v5471_v28  ;;  %v669_v28 = vld [vmem:[%s8527_s3 + $0x3b8] sm:$0xff]  ;;  %v4281_v42 = vrot.slane %v6333_v37, %v7013_v20  ;;  %v4285_v44 = vrot.slane %v6336_v16, %v7013_v20  ;;  %v4552_v47 = vrot.slane %v6370_v54, %v7013_v20  ;;  %v5080_v48 = vrot.slane %v6396_v63, %v7013_v20 }
 0x311   : > { %3954 = vmatprep.subr.bf16.mxu0 %v5504_v45  ;;  %v5632_v45 = vcombine.high %v750_v1, %v766_v33  ;;  %v4821_v21 = vrot.slane %v6446_v27, %v7013_v20  ;;  %v5534_v62 = vcombine.high %v653_v39, %v669_v28  ;;  %v5533_v1 = vcombine.low %v653_v39, %v669_v28  ;;  %v814_v33 = vld [vmem:[%s8527_s3 + $0x840] sm:$0xff]  ;;  %v733_v39 = vld [vmem:[%s8527_s3 + $0x5b8] sm:$0xff] }
 0x312   : > { %3856 = vmatpush1.bf16.msra.mxu1 %v5881_v46  ;;  %v4548_v46 = vrot.slane %v6367_v52, %v7013_v20 }
 0x313   : > { %3857 = vmatprep.subr.bf16.mxu1 %v5914_v49 }
 0x314   : > { %3955 = vmatpush1.bf16.msra.mxu0 %v5503_v50  ;;  %v5501_v50 = vcombine.low %v621_v12, %v637_v13  ;;  %v5664_v12 = vcombine.high %v782_v51, %v798_v55 }
 0x315   : > { %3956 = vmatprep.subr.bf16.mxu0 %v5536_v56  ;;  %v5084_v56 = vrot.slane %v6393_v32, %v7013_v20 }
 0x316   : > { %3858 = vmatpush1.bf16.msra.mxu1 %v5913_v61  ;;  %v4817_v61 = vrot.slane %v6443_v40, %v7013_v20 }
 0x317   : > { %3909 = vmatprep.subr.bf16.mxu1 %v5438_v35 }
 0x318   : > { %3957 = vmatpush1.bf16.msra.mxu0 %v5535_v41 }
 0x319   : > { %3860 = vmatmul.mubr.bf16.vlgmr.msra.gmra.mrb[12].mxu1 %v6297_v57  ;;  %3958 = vmatprep.subr.bf16.mxu0 %v5568_v43  ;;  %v685_v43 = vld [vmem:[%s8527_s3 + $0x438] sm:$0xff] }
 0x31a   : > { %3910 = vmatpush1.bf16.msra.mxu1 %v5437_v5  ;;  %3941 = vmatprep.mubr.bf16.mxu1 %v6299_v58  ;;  %v701_v5 = vld [vmem:[%s8527_s3 + $0x4b8] sm:$0xff] }
 0x31b   : > { %3911 = vmatprep.subr.bf16.mxu1 %v5470_v10 }
 0x31c   : > { %3959 = vmatpush1.bf16.msra.mxu0 %v5567_v11 }
 0x31d   : > { %3960 = vmatprep.subr.bf16.mxu0 %v5600_v3 }
 0x31e   : > { %v3656_v49 = vpop.f32.mrb[24].mxu0  ;;  %3912 = vmatpush1.bf16.msra.mxu1 %v5469_v15 }
 0x31f   : > { %v3658_v22 = vpop.f32.mrb[25].mxu0  ;;  %3913 = vmatprep.subr.bf16.mxu1 %v5502_v36  ;;  %v7043_v35 = vmul.f32 %v4281_v42, %v3656_v49  ;;  %v7045_v41 = vmul.f32 %v4548_v46, %v3656_v49  ;;  %v7047_v23 = vmul.f32 %v5080_v48, %v3656_v49  ;;  %v7061_v3 = vmul.f32 %v4817_v61, %v3656_v49  ;;  %v830_v36 = vld [vmem:[%s8527_s3 + $0x8c0] sm:$0xff] }
 0x320   : > { %3961 = vmatpush1.bf16.msra.mxu0 %v5599_v38  ;;  %v3660_v6 = vpop.f32.mrb[26].mxu0  ;;  %v7055_v7 = vmul.f32 %v4285_v44, %v3658_v22  ;;  %v7057_v10 = vmul.f32 %v4552_v47, %v3658_v22  ;;  %v7059_v11 = vmul.f32 %v5084_v56, %v3658_v22  ;;  %v7063_v15 = vmul.f32 %v4821_v21, %v3658_v22  ;;  %v717_v44 = vld [vmem:[%s8527_s3 + $0x538] sm:$0xff]  ;;  %v846_v46 = vld [vmem:[%s8527_s3 + $0x940] sm:$0xff] }
 0x321   : > { %8549 = vst [vmem:[#allocation10_spill] sm:$0xff] %v7047_v23  ;;  %3962 = vmatprep.subr.bf16.mxu0 %v5632_v45  ;;  %v3661_v13 = vpop.f32.mrb[27].mxu0  ;;  %8551 = vst [vmem:[#allocation12_spill] sm:$0xff] %v7061_v3  ;;  %v5566_v38 = vcombine.high %v685_v43, %v701_v5  ;;  %v5663_v42 = vcombine.low %v782_v51, %v798_v55  ;;  %v5696_v28 = vcombine.high %v814_v33, %v830_v36  ;;  %v862_v47 = vld [vmem:[%s8527_s3 + $0x9c0] sm:$0xff]  ;;  %v765_v51 = vld [vmem:[%s8527_s3 + $0x6b8] sm:$0xff] }
 0x322   : > { %8550 = vst [vmem:[#allocation11_spill] sm:$0xff] %v7059_v11  ;;  %8552 = vst [vmem:[#allocation13_spill] sm:$0xff] %v7063_v15  ;;  %3914 = vmatpush1.bf16.msra.mxu1 %v5501_v50  ;;  %v5565_v45 = vcombine.low %v685_v43, %v701_v5  ;;  %v5598_v48 = vcombine.high %v717_v44, %v733_v39  ;;  %v5695_v49 = vcombine.low %v814_v33, %v830_v36  ;;  %v749_v50 = vld [vmem:[%s8527_s3 + $0x638] sm:$0xff]  ;;  %v878_v61 = vld [vmem:[%s8527_s3 + $0xa40] sm:$0xff] }
 0x323   : > { %3915 = vmatprep.subr.bf16.mxu1 %v5534_v62  ;;  %v5728_v55 = vcombine.high %v846_v46, %v862_v47  ;;  %v5597_v56 = vcombine.low %v717_v44, %v733_v39  ;;  %v894_v21 = vld [vmem:[%s8527_s3 + $0xac0] sm:$0xff]  ;;  %v5630_v22 = vcombine.high %v749_v50, %v765_v51  ;;  %v781_v43 = vld [vmem:[%s8527_s3 + $0x738] sm:$0xff]  ;;  %v5629_v13 = vcombine.low %v749_v50, %v765_v51 }
 0x324   : > { %3963 = vmatpush1.bf16.msra.mxu0 %v5631_v24  ;;  %v5727_v24 = vcombine.low %v846_v46, %v862_v47  ;;  %v797_v5 = vld [vmem:[%s8527_s3 + $0x7b8] sm:$0xff]  ;;  %v926_v33 = vld [vmem:[%s8527_s3 + $0xbc0] sm:$0xff] }
 0x325   : > { %3964 = vmatprep.subr.bf16.mxu0 %v5664_v12  ;;  %v5760_v12 = vcombine.high %v878_v61, %v894_v21  ;;  %v5662_v36 = vcombine.high %v781_v43, %v797_v5  ;;  %v829_v44 = vld [vmem:[%s8527_s3 + $0x8b8] sm:$0xff]  ;;  %v958_v46 = vld [vmem:[%s8527_s3 + $0xcc0] sm:$0xff] }
 0x326   : > { %3916 = vmatpush1.bf16.msra.mxu1 %v5533_v1  ;;  %v910_v1 = vld [vmem:[%s8527_s3 + $0xb40] sm:$0xff]  ;;  %v861_v50 = vld [vmem:[%s8527_s3 + $0x9b8] sm:$0xff] }
 0x327   : > { %3917 = vmatprep.subr.bf16.mxu1 %v5566_v38  ;;  %v5759_v38 = vcombine.low %v878_v61, %v894_v21  ;;  %v5792_v39 = vcombine.high %v910_v1, %v926_v33  ;;  %v990_v61 = vld [vmem:[%s8527_s3 + $0xdc0] sm:$0xff] }
 0x328   : > { %3965 = vmatpush1.bf16.msra.mxu0 %v5663_v42  ;;  %v813_v42 = vld [vmem:[%s8527_s3 + $0x838] sm:$0xff] }
 0x329   : > { %3966 = vmatprep.subr.bf16.mxu0 %v5696_v28  ;;  %v5661_v28 = vcombine.low %v781_v43, %v797_v5  ;;  %v5694_v47 = vcombine.high %v813_v42, %v829_v44  ;;  %v893_v43 = vld [vmem:[%s8527_s3 + $0xab8] sm:$0xff] }
 0x32a   : > { %3918 = vmatpush1.bf16.msra.mxu1 %v5565_v45  ;;  %v942_v45 = vld [vmem:[%s8527_s3 + $0xc40] sm:$0xff] }
 0x32b   : > { %3919 = vmatprep.subr.bf16.mxu1 %v5598_v48  ;;  %v5791_v48 = vcombine.low %v910_v1, %v926_v33  ;;  %v5824_v51 = vcombine.high %v942_v45, %v958_v46 }
 0x32c   : > { %3967 = vmatpush1.bf16.msra.mxu0 %v5695_v49  ;;  %v7095_v62 = vpop.f32.mrb[0].mxu1  ;;  %v845_v49 = vld [vmem:[%s8527_s3 + $0x938] sm:$0xff] }
 0x32d   : > { %v546_v6 = vpop.f32.mrb[1].mxu1  ;;  %3968 = vmatprep.subr.bf16.mxu0 %v5728_v55  ;;  %v5693_v55 = vcombine.low %v813_v42, %v829_v44  ;;  %v5726_v21 = vcombine.high %v845_v49, %v861_v50 }
 0x32e   : > { %3920 = vmatpush1.bf16.msra.mxu1 %v5597_v56  ;;  %v974_v56 = vld [vmem:[%s8527_s3 + $0xd40] sm:$0xff]  ;;  %v5725_v6 = vcombine.low %v845_v49, %v861_v50 }
 0x32f   : > { %3921 = vmatprep.subr.bf16.mxu1 %v5630_v22  ;;  %v5823_v22 = vcombine.low %v942_v45, %v958_v46  ;;  %v5856_v5 = vcombine.high %v974_v56, %v990_v61  ;;  %v5855_v33 = vcombine.low %v974_v56, %v990_v61 }
 0x330   : > { %3969 = vmatpush1.bf16.msra.mxu0 %v5727_v24  ;;  %v877_v24 = vld [vmem:[%s8527_s3 + $0xa38] sm:$0xff] }
 0x331   : > { %3970 = vmatprep.subr.bf16.mxu0 %v5760_v12  ;;  %v1006_v12 = vld [vmem:[%s8527_s3 + $0xe40] sm:$0xff]  ;;  %v5758_v1 = vcombine.high %v877_v24, %v893_v43  ;;  %v5757_v44 = vcombine.low %v877_v24, %v893_v43 }
 0x332   : > { %3922 = vmatpush1.bf16.msra.mxu1 %v5629_v13  ;;  %v1022_v13 = vld [vmem:[%s8527_s3 + $0xec0] sm:$0xff] }
 0x333   : > { %3923 = vmatprep.subr.bf16.mxu1 %v5662_v36  ;;  %v909_v36 = vld [vmem:[%s8527_s3 + $0xb38] sm:$0xff]  ;;  %v5888_v42 = vcombine.high %v1006_v12, %v1022_v13  ;;  %v5887_v46 = vcombine.low %v1006_v12, %v1022_v13 }
 0x334   : > { %3971 = vmatpush1.bf16.msra.mxu0 %v5759_v38  ;;  %v925_v38 = vld [vmem:[%s8527_s3 + $0xbb8] sm:$0xff] }
 0x335   : > { %3972 = vmatprep.subr.bf16.mxu0 %v5792_v39  ;;  %v1038_v39 = vld [vmem:[%s8527_s3 + $0xf40] sm:$0xff]  ;;  %v5790_v45 = vcombine.high %v909_v36, %v925_v38  ;;  %v5789_v50 = vcombine.low %v909_v36, %v925_v38 }
 0x336   : > { %3924 = vmatpush1.bf16.msra.mxu1 %v5661_v28  ;;  %v1054_v28 = vld [vmem:[%s8527_s3 + $0xfc0] sm:$0xff] }
 0x337   : > { %3925 = vmatprep.subr.bf16.mxu1 %v5694_v47  ;;  %v941_v47 = vld [vmem:[%s8527_s3 + $0xc38] sm:$0xff]  ;;  %v5920_v49 = vcombine.high %v1038_v39, %v1054_v28  ;;  %v5919_v61 = vcombine.low %v1038_v39, %v1054_v28 }
 0x338   : > { %3973 = vmatpush1.bf16.msra.mxu0 %v5791_v48  ;;  %v957_v48 = vld [vmem:[%s8527_s3 + $0xcb8] sm:$0xff] }
 0x339   : > { %3974 = vmatprep.subr.bf16.mxu0 %v5824_v51  ;;  %v560_v51 = vld [vmem:[%s8527_s3 + $0x50] sm:$0xff]  ;;  %v5822_v56 = vcombine.high %v941_v47, %v957_v48  ;;  %v5821_v43 = vcombine.low %v941_v47, %v957_v48 }
 0x33a   : > { %3926 = vmatpush1.bf16.msra.mxu1 %v5693_v55  ;;  %v576_v55 = vld [vmem:[%s8527_s3 + $0xd0] sm:$0xff] }
 0x33b   : > { %3927 = vmatprep.subr.bf16.mxu1 %v5726_v21  ;;  %v973_v21 = vld [vmem:[%s8527_s3 + $0xd38] sm:$0xff]  ;;  %v5444_v24 = vcombine.high %v560_v51, %v576_v55  ;;  %v5443_v13 = vcombine.low %v560_v51, %v576_v55 }
 0x33c   : > { %3975 = vmatpush1.bf16.msra.mxu0 %v5823_v22  ;;  %v989_v22 = vld [vmem:[%s8527_s3 + $0xdb8] sm:$0xff] }
 0x33d   : > { %3976 = vmatprep.subr.bf16.mxu0 %v5856_v5  ;;  %v592_v5 = vld [vmem:[%s8527_s3 + $0x150] sm:$0xff]  ;;  %v5854_v12 = vcombine.high %v973_v21, %v989_v22  ;;  %v5853_v38 = vcombine.low %v973_v21, %v989_v22 }
 0x33e   : > { %3928 = vmatpush1.bf16.msra.mxu1 %v5725_v6  ;;  %v608_v6 = vld [vmem:[%s8527_s3 + $0x1d0] sm:$0xff] }
 0x33f   : > { %3929 = vmatprep.subr.bf16.mxu1 %v5758_v1  ;;  %v1005_v1 = vld [vmem:[%s8527_s3 + $0xe38] sm:$0xff]  ;;  %v5476_v36 = vcombine.high %v592_v5, %v608_v6  ;;  %v5475_v28 = vcombine.low %v592_v5, %v608_v6 }
 0x340   : > { %3977 = vmatpush1.bf16.msra.mxu0 %v5855_v33  ;;  %v1021_v33 = vld [vmem:[%s8527_s3 + $0xeb8] sm:$0xff] }
 0x341   : > { %3978 = vmatprep.subr.bf16.mxu0 %v5888_v42  ;;  %v624_v42 = vld [vmem:[%s8527_s3 + $0x250] sm:$0xff]  ;;  %v5886_v39 = vcombine.high %v1005_v1, %v1021_v33  ;;  %v5885_v48 = vcombine.low %v1005_v1, %v1021_v33 }
 0x342   : > { %3930 = vmatpush1.bf16.msra.mxu1 %v5757_v44  ;;  %v640_v44 = vld [vmem:[%s8527_s3 + $0x2d0] sm:$0xff] }
 0x343   : > { %3931 = vmatprep.subr.bf16.mxu1 %v5790_v45  ;;  %v1037_v45 = vld [vmem:[%s8527_s3 + $0xf38] sm:$0xff]  ;;  %v5508_v47 = vcombine.high %v624_v42, %v640_v44  ;;  %v5507_v55 = vcombine.low %v624_v42, %v640_v44 }
 0x344   : > { %3979 = vmatpush1.bf16.msra.mxu0 %v5887_v46  ;;  %v1053_v46 = vld [vmem:[%s8527_s3 + $0xfb8] sm:$0xff] }
 0x345   : > { %3980 = vmatprep.subr.bf16.mxu0 %v5920_v49  ;;  %v656_v49 = vld [vmem:[%s8527_s3 + $0x350] sm:$0xff]  ;;  %v5918_v51 = vcombine.high %v1037_v45, %v1053_v46  ;;  %v5917_v22 = vcombine.low %v1037_v45, %v1053_v46  ;;  %v7239_v45 = vsub.s32 2, %v6996_v9 }
 0x346   : > { %3932 = vmatpush1.bf16.msra.mxu1 %v5789_v50  ;;  %v672_v50 = vld [vmem:[%s8527_s3 + $0x3d0] sm:$0xff] }
 0x347   : > { %3933 = vmatprep.subr.bf16.mxu1 %v5822_v56  ;;  %v559_v56 = vld [vmem:[%s8527_s3 + $0x48] sm:$0xff]  ;;  %v5540_v21 = vcombine.high %v656_v49, %v672_v50  ;;  %v5539_v6 = vcombine.low %v656_v49, %v672_v50  ;;  %v768_v49 = vld [vmem:[%s8527_s3 + $0x6d0] sm:$0xff]  ;;  %v4378_v50 = vrot.slane %v6333_v37, %v7239_v45 }
 0x348   : > { %3981 = vmatpush1.bf16.msra.mxu0 %v5919_v61  ;;  %v575_v61 = vld [vmem:[%s8527_s3 + $0xc8] sm:$0xff] }
 0x349   : > { %4032 = vmatprep.subr.bf16.mxu0 %v5444_v24  ;;  %v688_v24 = vld [vmem:[%s8527_s3 + $0x450] sm:$0xff]  ;;  %v5442_v5 = vcombine.high %v559_v56, %v575_v61  ;;  %v5441_v33 = vcombine.low %v559_v56, %v575_v61  ;;  %v671_v56 = vld [vmem:[%s8527_s3 + $0x3c8] sm:$0xff]  ;;  %v4641_v61 = vrot.slane %v6367_v52, %v7239_v45 }
 0x34a   : > { %3934 = vmatpush1.bf16.msra.mxu1 %v5821_v43  ;;  %v704_v43 = vld [vmem:[%s8527_s3 + $0x4d0] sm:$0xff] }
 0x34b   : > { %3983 = vmatmul.mubr.bf16.vlgmr.msra.gmra.mrb[40].mxu0 %v6297_v57  ;;  %3935 = vmatprep.subr.bf16.mxu1 %v5854_v12  ;;  %v591_v12 = vld [vmem:[%s8527_s3 + $0x148] sm:$0xff]  ;;  %v5572_v1 = vcombine.high %v688_v24, %v704_v43  ;;  %v5571_v44 = vcombine.low %v688_v24, %v704_v43  ;;  %v4910_v43 = vrot.slane %v6443_v40, %v7239_v45 }
 0x34c   : > { %4033 = vmatpush1.bf16.msra.mxu0 %v5443_v13  ;;  %4064 = vmatprep.mubr.bf16.mxu0 %v6299_v58  ;;  %v607_v13 = vld [vmem:[%s8527_s3 + $0x1c8] sm:$0xff] }
 0x34d   : > { %4034 = vmatprep.subr.bf16.mxu0 %v5476_v36  ;;  %v720_v36 = vld [vmem:[%s8527_s3 + $0x550] sm:$0xff]  ;;  %v5474_v42 = vcombine.high %v591_v12, %v607_v13 }
 0x34e   : > { %3936 = vmatpush1.bf16.msra.mxu1 %v5853_v38  ;;  %v736_v38 = vld [vmem:[%s8527_s3 + $0x5d0] sm:$0xff] }
 0x34f   : > { %3937 = vmatprep.subr.bf16.mxu1 %v5886_v39  ;;  %v623_v39 = vld [vmem:[%s8527_s3 + $0x248] sm:$0xff]  ;;  %v5604_v46 = vcombine.high %v720_v36, %v736_v38  ;;  %v5603_v24 = vcombine.low %v720_v36, %v736_v38  ;;  %v784_v36 = vld [vmem:[%s8527_s3 + $0x750] sm:$0xff] }
 0x350   : > { %4035 = vmatpush1.bf16.msra.mxu0 %v5475_v28  ;;  %v639_v28 = vld [vmem:[%s8527_s3 + $0x2c8] sm:$0xff]  ;;  %v800_v38 = vld [vmem:[%s8527_s3 + $0x7d0] sm:$0xff] }
 0x351   : > { %4036 = vmatprep.subr.bf16.mxu0 %v5508_v47  ;;  %v5473_v47 = vcombine.low %v591_v12, %v607_v13 }
 0x352   : > { %3938 = vmatpush1.bf16.msra.mxu1 %v5885_v48  ;;  %v752_v48 = vld [vmem:[%s8527_s3 + $0x650] sm:$0xff] }
 0x353   : > { %3939 = vmatprep.subr.bf16.mxu1 %v5918_v51  ;;  %v5506_v51 = vcombine.high %v623_v39, %v639_v28  ;;  %v5636_v12 = vcombine.high %v752_v48, %v768_v49 }
 0x354   : > { %4037 = vmatpush1.bf16.msra.mxu0 %v5507_v55  ;;  %v655_v55 = vld [vmem:[%s8527_s3 + $0x348] sm:$0xff] }
 0x355   : > { %4038 = vmatprep.subr.bf16.mxu0 %v5540_v21  ;;  %v4382_v21 = vrot.slane %v6336_v16, %v7239_v45 }
 0x356   : > { %3940 = vmatpush1.bf16.msra.mxu1 %v5917_v22  ;;  %v4645_v22 = vrot.slane %v6370_v54, %v7239_v45 }
 0x357   : > { %3991 = vmatprep.subr.bf16.mxu1 %v5442_v5  ;;  %v5173_v5 = vrot.slane %v6396_v63, %v7239_v45 }
 0x358   : > { %4039 = vmatpush1.bf16.msra.mxu0 %v5539_v6  ;;  %v5177_v6 = vrot.slane %v6393_v32, %v7239_v45 }
 0x359   : > { %3942 = vmatmul.mubr.bf16.vlgmr.msra.gmra.mrb[16].mxu1 %v6297_v57  ;;  %4040 = vmatprep.subr.bf16.mxu0 %v5572_v1  ;;  %v4914_v1 = vrot.slane %v6446_v27, %v7239_v45 }
 0x35a   : > { %3992 = vmatpush1.bf16.msra.mxu1 %v5441_v33  ;;  %4023 = vmatprep.mubr.bf16.mxu1 %v6299_v58  ;;  %v5505_v33 = vcombine.low %v623_v39, %v639_v28 }
 0x35b   : > { %3993 = vmatprep.subr.bf16.mxu1 %v5474_v42  ;;  %v5635_v42 = vcombine.low %v752_v48, %v768_v49 }
 0x35c   : > { %4041 = vmatpush1.bf16.msra.mxu0 %v5571_v44  ;;  %v5538_v44 = vcombine.high %v655_v55, %v671_v56 }
 0x35d   : > { %4042 = vmatprep.subr.bf16.mxu0 %v5604_v46 }
 0x35e   : > { %v3738_v13 = vpop.f32.mrb[28].mxu0  ;;  %3994 = vmatpush1.bf16.msra.mxu1 %v5473_v47 }
 0x35f   : > { %v7276_v26 = vmul.f32 %v4378_v50, %v3738_v13  ;;  %v7278_v46 = vmul.f32 %v4641_v61, %v3738_v13  ;;  %v7280_v25 = vmul.f32 %v4910_v43, %v3738_v13  ;;  %v7282_v8 = vmul.f32 %v5173_v5, %v3738_v13  ;;  %v3740_v47 = vpop.f32.mrb[29].mxu0  ;;  %3995 = vmatprep.subr.bf16.mxu1 %v5506_v51  ;;  %v687_v50 = vld [vmem:[%s8527_s3 + $0x448] sm:$0xff]  ;;  %v848_v13 = vld [vmem:[%s8527_s3 + $0x950] sm:$0xff] }
 0x360   : > { %v7284_v39 = vmul.f32 %v4382_v21, %v3740_v47  ;;  %v7286_v28 = vmul.f32 %v4645_v22, %v3740_v47  ;;  %v7288_v48 = vmul.f32 %v4914_v1, %v3740_v47  ;;  %v7290_v49 = vmul.f32 %v5177_v6, %v3740_v47  ;;  %v3742_v4 = vpop.f32.mrb[30].mxu0  ;;  %4043 = vmatpush1.bf16.msra.mxu0 %v5603_v24  ;;  %v703_v61 = vld [vmem:[%s8527_s3 + $0x4c8] sm:$0xff]  ;;  %v816_v22 = vld [vmem:[%s8527_s3 + $0x850] sm:$0xff] }
 0x361   : > { %8553 = vst [vmem:[#allocation14_spill] sm:$0xff] %v7278_v46  ;;  %8554 = vst [vmem:[#allocation15_spill] sm:$0xff] %v7280_v25  ;;  %v3743_v43 = vpop.f32.mrb[31].mxu0  ;;  %4044 = vmatprep.subr.bf16.mxu0 %v5636_v12  ;;  %v5668_v51 = vcombine.high %v784_v36, %v800_v38  ;;  %v5537_v21 = vcombine.low %v655_v55, %v671_v56  ;;  %v832_v4 = vld [vmem:[%s8527_s3 + $0x8d0] sm:$0xff]  ;;  %v5570_v24 = vcombine.high %v687_v50, %v703_v61  ;;  %v719_v6 = vld [vmem:[%s8527_s3 + $0x548] sm:$0xff] }
 0x362   : > { %8555 = vst [vmem:[#allocation16_spill] sm:$0xff] %v7282_v8  ;;  %8556 = vst [vmem:[#allocation17_spill] sm:$0xff] %v7286_v28  ;;  %3996 = vmatpush1.bf16.msra.mxu1 %v5505_v33  ;;  %v5667_v5 = vcombine.low %v784_v36, %v800_v38  ;;  %v735_v55 = vld [vmem:[%s8527_s3 + $0x5c8] sm:$0xff]  ;;  %v5700_v56 = vcombine.high %v816_v22, %v832_v4  ;;  %v5569_v12 = vcombine.low %v687_v50, %v703_v61  ;;  %v864_v1 = vld [vmem:[%s8527_s3 + $0x9d0] sm:$0xff] }
 0x363   : > { %8557 = vst [vmem:[#allocation18_spill] sm:$0xff] %v7288_v48  ;;  %8558 = vst [vmem:[#allocation19_spill] sm:$0xff] %v7290_v49  ;;  %3997 = vmatprep.subr.bf16.mxu1 %v5538_v44  ;;  %v5602_v33 = vcombine.high %v719_v6, %v735_v55  ;;  %v5699_v44 = vcombine.low %v816_v22, %v832_v4  ;;  %v751_v36 = vld [vmem:[%s8527_s3 + $0x648] sm:$0xff]  ;;  %v5732_v47 = vcombine.high %v848_v13, %v864_v1  ;;  %v880_v50 = vld [vmem:[%s8527_s3 + $0xa50] sm:$0xff] }
 0x364   : > { %4045 = vmatpush1.bf16.msra.mxu0 %v5635_v42  ;;  %v7317_v42 = vsub.s32 1, %v6996_v9  ;;  %v767_v38 = vld [vmem:[%s8527_s3 + $0x6c8] sm:$0xff]  ;;  %v896_v61 = vld [vmem:[%s8527_s3 + $0xad0] sm:$0xff] }
 0x365   : > { %4046 = vmatprep.subr.bf16.mxu0 %v5668_v51  ;;  %v5601_v51 = vcombine.low %v719_v6, %v735_v55  ;;  %v5633_v29 = vcombine.low %v751_v36, %v767_v38  ;;  %v5764_v30 = vcombine.high %v880_v50, %v896_v61  ;;  %v928_v25 = vld [vmem:[%s8527_s3 + $0xbd0] sm:$0xff] }
 0x366   : > { %3998 = vmatpush1.bf16.msra.mxu1 %v5537_v21  ;;  %v4366_v43 = vrot.slane %v6333_v37, %v7317_v42  ;;  %v4370_v21 = vrot.slane %v6336_v16, %v7317_v42  ;;  %v4629_v22 = vrot.slane %v6367_v52, %v7317_v42  ;;  %v4633_v4 = vrot.slane %v6370_v54, %v7317_v42 }
 0x367   : > { %3999 = vmatprep.subr.bf16.mxu1 %v5570_v24  ;;  %v5634_v24 = vcombine.high %v751_v36, %v767_v38  ;;  %v4898_v6 = vrot.slane %v6443_v40, %v7317_v42  ;;  %v4902_v18 = vrot.slane %v6446_v27, %v7317_v42  ;;  %v912_v38 = vld [vmem:[%s8527_s3 + $0xb50] sm:$0xff] }
 0x368   : > { %4047 = vmatpush1.bf16.msra.mxu0 %v5667_v5  ;;  %v5161_v5 = vrot.slane %v6396_v63, %v7317_v42 }
 0x369   : > { %4048 = vmatprep.subr.bf16.mxu0 %v5700_v56  ;;  %v5165_v56 = vrot.slane %v6393_v32, %v7317_v42 }
 0x36a   : > { %4000 = vmatpush1.bf16.msra.mxu1 %v5569_v12  ;;  %v5731_v12 = vcombine.low %v848_v13, %v864_v1 }
 0x36b   : > { %4001 = vmatprep.subr.bf16.mxu1 %v5602_v33  ;;  %v799_v33 = vld [vmem:[%s8527_s3 + $0x7c8] sm:$0xff] }
 0x36c   : > { %4049 = vmatpush1.bf16.msra.mxu0 %v5699_v44  ;;  %v3697_v55 = vpop.f32.mrb[4].mxu1 }
 0x36d   : > { %v3699_v17 = vpop.f32.mrb[5].mxu1  ;;  %4050 = vmatprep.subr.bf16.mxu0 %v5732_v47  ;;  %v7353_v48 = vmul.f32 %v4366_v43, %v3697_v55  ;;  %v7355_v44 = vmul.f32 %v4629_v22, %v3697_v55  ;;  %v7357_v13 = vmul.f32 %v5161_v5, %v3697_v55  ;;  %v7359_v1 = vmul.f32 %v4898_v6, %v3697_v55  ;;  %v815_v55 = vld [vmem:[%s8527_s3 + $0x848] sm:$0xff] }
 0x36e   : > { %v3701_v36 = vpop.f32.mrb[6].mxu1  ;;  %4002 = vmatpush1.bf16.msra.mxu1 %v5601_v51  ;;  %v7367_v15 = vmul.f32 %v4370_v21, %v3699_v17  ;;  %v7369_v47 = vmul.f32 %v4633_v4, %v3699_v17  ;;  %v7371_v43 = vmul.f32 %v5165_v56, %v3699_v17  ;;  %v7373_v22 = vmul.f32 %v4902_v18, %v3699_v17  ;;  %v831_v21 = vld [vmem:[%s8527_s3 + $0x8c8] sm:$0xff]  ;;  %v944_v17 = vld [vmem:[%s8527_s3 + $0xc50] sm:$0xff] }
 0x36f   : > { %8559 = vst [vmem:[#allocation20_spill] sm:$0xff] %v7355_v44  ;;  %8560 = vst [vmem:[#allocation21_spill] sm:$0xff] %v7357_v13  ;;  %v3702_v5 = vpop.f32.mrb[7].mxu1  ;;  %4003 = vmatprep.subr.bf16.mxu1 %v5634_v24  ;;  %v5666_v6 = vcombine.high %v783_v0, %v799_v33  ;;  %v5763_v51 = vcombine.low %v880_v50, %v896_v61  ;;  %v5796_v4 = vcombine.high %v912_v38, %v928_v25  ;;  %v960_v18 = vld [vmem:[%s8527_s3 + $0xcd0] sm:$0xff]  ;;  %v847_v24 = vld [vmem:[%s8527_s3 + $0x948] sm:$0xff] }
 0x370   : > { %8561 = vst [vmem:[#allocation22_spill] sm:$0xff] %v7359_v1  ;;  %8562 = vst [vmem:[#allocation23_spill] sm:$0xff] %v7369_v47  ;;  %4051 = vmatpush1.bf16.msra.mxu0 %v5731_v12  ;;  %v5665_v56 = vcombine.low %v783_v0, %v799_v33  ;;  %v5698_v50 = vcombine.high %v815_v55, %v831_v21  ;;  %v5795_v61 = vcombine.low %v912_v38, %v928_v25  ;;  %v863_v0 = vld [vmem:[%s8527_s3 + $0x9c8] sm:$0xff]  ;;  %v976_v12 = vld [vmem:[%s8527_s3 + $0xd50] sm:$0xff] }
 0x371   : > { %8563 = vst [vmem:[#allocation24_spill] sm:$0xff] %v7371_v43  ;;  %8564 = vst [vmem:[#allocation25_spill] sm:$0xff] %v7373_v22  ;;  %4052 = vmatprep.subr.bf16.mxu0 %v5764_v30  ;;  %v5828_v30 = vcombine.high %v944_v17, %v960_v18  ;;  %v992_v25 = vld [vmem:[%s8527_s3 + $0xdd0] sm:$0xff]  ;;  %v5730_v33 = vcombine.high %v847_v24, %v863_v0  ;;  %v5827_v36 = vcombine.low %v944_v17, %v960_v18  ;;  %v879_v38 = vld [vmem:[%s8527_s3 + $0xa48] sm:$0xff] }
 0x372   : > { %4004 = vmatpush1.bf16.msra.mxu1 %v5633_v29  ;;  %v5697_v29 = vcombine.low %v815_v55, %v831_v21  ;;  %v895_v5 = vld [vmem:[%s8527_s3 + $0xac8] sm:$0xff]  ;;  %v1008_v55 = vld [vmem:[%s8527_s3 + $0xe50] sm:$0xff] }
 0x373   : > { %4005 = vmatprep.subr.bf16.mxu1 %v5666_v6  ;;  %v5860_v6 = vcombine.high %v976_v12, %v992_v25  ;;  %v1024_v21 = vld [vmem:[%s8527_s3 + $0xed0] sm:$0xff]  ;;  %v911_v17 = vld [vmem:[%s8527_s3 + $0xb48] sm:$0xff] }
 0x374   : > { %4053 = vmatpush1.bf16.msra.mxu0 %v5763_v51  ;;  %v5729_v51 = vcombine.low %v847_v24, %v863_v0  ;;  %v927_v18 = vld [vmem:[%s8527_s3 + $0xbc8] sm:$0xff]  ;;  %v1040_v24 = vld [vmem:[%s8527_s3 + $0xf50] sm:$0xff] }
 0x375   : > { %4054 = vmatprep.subr.bf16.mxu0 %v5796_v4  ;;  %v5762_v4 = vcombine.high %v879_v38, %v895_v5  ;;  %v1056_v0 = vld [vmem:[%s8527_s3 + $0xfd0] sm:$0xff] }
 0x376   : > { %4006 = vmatpush1.bf16.msra.mxu1 %v5665_v56  ;;  %v5859_v56 = vcombine.low %v976_v12, %v992_v25  ;;  %v943_v12 = vld [vmem:[%s8527_s3 + $0xc48] sm:$0xff] }
 0x377   : > { %4007 = vmatprep.subr.bf16.mxu1 %v5698_v50  ;;  %v5892_v50 = vcombine.high %v1008_v55, %v1024_v21  ;;  %v959_v25 = vld [vmem:[%s8527_s3 + $0xcc8] sm:$0xff] }
 0x378   : > { %4055 = vmatpush1.bf16.msra.mxu0 %v5795_v61  ;;  %v5761_v61 = vcombine.low %v879_v38, %v895_v5  ;;  %v562_v38 = vld [vmem:[%s8527_s3 + $0x60] sm:$0xff] }
 0x379   : > { %4056 = vmatprep.subr.bf16.mxu0 %v5828_v30  ;;  %v5794_v30 = vcombine.high %v911_v17, %v927_v18  ;;  %v578_v5 = vld [vmem:[%s8527_s3 + $0xe0] sm:$0xff] }
 0x37a   : > { %4008 = vmatpush1.bf16.msra.mxu1 %v5697_v29  ;;  %v5891_v29 = vcombine.low %v1008_v55, %v1024_v21  ;;  %v975_v55 = vld [vmem:[%s8527_s3 + $0xd48] sm:$0xff] }
 0x37b   : > { %4009 = vmatprep.subr.bf16.mxu1 %v5730_v33  ;;  %v5924_v33 = vcombine.high %v1040_v24, %v1056_v0  ;;  %v991_v21 = vld [vmem:[%s8527_s3 + $0xdc8] sm:$0xff] }
 0x37c   : > { %4057 = vmatpush1.bf16.msra.mxu0 %v5827_v36  ;;  %v5793_v36 = vcombine.low %v911_v17, %v927_v18  ;;  %v594_v17 = vld [vmem:[%s8527_s3 + $0x160] sm:$0xff] }
 0x37d   : > { %4058 = vmatprep.subr.bf16.mxu0 %v5860_v6  ;;  %v5826_v6 = vcombine.high %v943_v12, %v959_v25  ;;  %v610_v18 = vld [vmem:[%s8527_s3 + $0x1e0] sm:$0xff] }
 0x37e   : > { %4010 = vmatpush1.bf16.msra.mxu1 %v5729_v51  ;;  %v5923_v51 = vcombine.low %v1040_v24, %v1056_v0  ;;  %v1007_v24 = vld [vmem:[%s8527_s3 + $0xe48] sm:$0xff] }
 0x37f   : > { %4011 = vmatprep.subr.bf16.mxu1 %v5762_v4  ;;  %v5448_v4 = vcombine.high %v562_v38, %v578_v5  ;;  %v1023_v0 = vld [vmem:[%s8527_s3 + $0xec8] sm:$0xff] }
 0x380   : > { %4059 = vmatpush1.bf16.msra.mxu0 %v5859_v56  ;;  %v5825_v56 = vcombine.low %v943_v12, %v959_v25  ;;  %v626_v12 = vld [vmem:[%s8527_s3 + $0x260] sm:$0xff] }
 0x381   : > { %4060 = vmatprep.subr.bf16.mxu0 %v5892_v50  ;;  %v5858_v50 = vcombine.high %v975_v55, %v991_v21  ;;  %v642_v25 = vld [vmem:[%s8527_s3 + $0x2e0] sm:$0xff] }
 0x382   : > { %4012 = vmatpush1.bf16.msra.mxu1 %v5761_v61  ;;  %v5447_v61 = vcombine.low %v562_v38, %v578_v5  ;;  %v1039_v38 = vld [vmem:[%s8527_s3 + $0xf48] sm:$0xff] }
 0x383   : > { %4013 = vmatprep.subr.bf16.mxu1 %v5794_v30  ;;  %v5480_v30 = vcombine.high %v594_v17, %v610_v18  ;;  %v1055_v5 = vld [vmem:[%s8527_s3 + $0xfc8] sm:$0xff] }
 0x384   : > { %4061 = vmatpush1.bf16.msra.mxu0 %v5891_v29  ;;  %v5857_v29 = vcombine.low %v975_v55, %v991_v21  ;;  %v658_v55 = vld [vmem:[%s8527_s3 + $0x360] sm:$0xff] }
 0x385   : > { %4062 = vmatprep.subr.bf16.mxu0 %v5924_v33  ;;  %v5890_v33 = vcombine.high %v1007_v24, %v1023_v0  ;;  %v674_v21 = vld [vmem:[%s8527_s3 + $0x3e0] sm:$0xff] }
 0x386   : > { %4014 = vmatpush1.bf16.msra.mxu1 %v5793_v36  ;;  %v5479_v36 = vcombine.low %v594_v17, %v610_v18  ;;  %v561_v17 = vld [vmem:[%s8527_s3 + $0x58] sm:$0xff] }
 0x387   : > { %4015 = vmatprep.subr.bf16.mxu1 %v5826_v6  ;;  %v5512_v6 = vcombine.high %v626_v12, %v642_v25  ;;  %v577_v18 = vld [vmem:[%s8527_s3 + $0xd8] sm:$0xff] }
 0x388   : > { %4063 = vmatpush1.bf16.msra.mxu0 %v5923_v51  ;;  %v5889_v51 = vcombine.low %v1007_v24, %v1023_v0  ;;  %v690_v24 = vld [vmem:[%s8527_s3 + $0x460] sm:$0xff] }
 0x389   : > { %4114 = vmatprep.subr.bf16.mxu0 %v5448_v4  ;;  %v5922_v4 = vcombine.high %v1039_v38, %v1055_v5  ;;  %v706_v0 = vld [vmem:[%s8527_s3 + $0x4e0] sm:$0xff] }
 0x38a   : > { %4016 = vmatpush1.bf16.msra.mxu1 %v5825_v56  ;;  %v5511_v56 = vcombine.low %v626_v12, %v642_v25  ;;  %v593_v12 = vld [vmem:[%s8527_s3 + $0x158] sm:$0xff] }
 0x38b   : > { %4065 = vmatmul.mubr.bf16.vlgmr.msra.gmra.mrb[44].mxu0 %v6297_v57  ;;  %4017 = vmatprep.subr.bf16.mxu1 %v5858_v50  ;;  %v5544_v50 = vcombine.high %v658_v55, %v674_v21  ;;  %v609_v25 = vld [vmem:[%s8527_s3 + $0x1d8] sm:$0xff] }
 0x38c   : > { %4115 = vmatpush1.bf16.msra.mxu0 %v5447_v61  ;;  %4146 = vmatprep.mubr.bf16.mxu0 %v6299_v58  ;;  %v5921_v61 = vcombine.low %v1039_v38, %v1055_v5  ;;  %v722_v38 = vld [vmem:[%s8527_s3 + $0x560] sm:$0xff] }
 0x38d   : > { %4116 = vmatprep.subr.bf16.mxu0 %v5480_v30  ;;  %v5446_v30 = vcombine.high %v561_v17, %v577_v18  ;;  %v738_v5 = vld [vmem:[%s8527_s3 + $0x5e0] sm:$0xff] }
 0x38e   : > { %4018 = vmatpush1.bf16.msra.mxu1 %v5857_v29  ;;  %v5543_v29 = vcombine.low %v658_v55, %v674_v21  ;;  %v625_v55 = vld [vmem:[%s8527_s3 + $0x258] sm:$0xff] }
 0x38f   : > { %4019 = vmatprep.subr.bf16.mxu1 %v5890_v33  ;;  %v5576_v33 = vcombine.high %v690_v24, %v706_v0  ;;  %v641_v21 = vld [vmem:[%s8527_s3 + $0x2d8] sm:$0xff] }
 0x390   : > { %4117 = vmatpush1.bf16.msra.mxu0 %v5479_v36  ;;  %v5445_v36 = vcombine.low %v561_v17, %v577_v18  ;;  %v5477_v17 = vcombine.low %v593_v12, %v609_v25  ;;  %v754_v18 = vld [vmem:[%s8527_s3 + $0x660] sm:$0xff]  ;;  %v5509_v49 = vcombine.low %v625_v55, %v641_v21 }
 0x391   : > { %4118 = vmatprep.subr.bf16.mxu0 %v5512_v6  ;;  %v5478_v6 = vcombine.high %v593_v12, %v609_v25 }
 0x392   : > { %4020 = vmatpush1.bf16.msra.mxu1 %v5889_v51  ;;  %v5575_v51 = vcombine.low %v690_v24, %v706_v0  ;;  %v5510_v24 = vcombine.high %v625_v55, %v641_v21  ;;  %v657_v0 = vld [vmem:[%s8527_s3 + $0x358] sm:$0xff] }
 0x393   : > { %4021 = vmatprep.subr.bf16.mxu1 %v5922_v4  ;;  %v7505_v4 = vsub.s32 4, %v6996_v9 }
 0x394   : > { %4119 = vmatpush1.bf16.msra.mxu0 %v5511_v56  ;;  %v5608_v56 = vcombine.high %v722_v38, %v738_v5 }
 0x395   : > { %4120 = vmatprep.subr.bf16.mxu0 %v5544_v50  ;;  %v770_v50 = vld [vmem:[%s8527_s3 + $0x6e0] sm:$0xff]  ;;  %v4406_v12 = vrot.slane %v6336_v16, %v7505_v4  ;;  %v4669_v25 = vrot.slane %v6370_v54, %v7505_v4  ;;  %v5201_v22 = vrot.slane %v6393_v32, %v7505_v4  ;;  %v4938_v3 = vrot.slane %v6446_v27, %v7505_v4 }
 0x396   : > { %4022 = vmatpush1.bf16.msra.mxu1 %v5921_v61  ;;  %v4402_v61 = vrot.slane %v6333_v37, %v7505_v4  ;;  %v5639_v8 = vcombine.low %v754_v18, %v770_v50 }
 0x397   : > { %4073 = vmatprep.subr.bf16.mxu1 %v5446_v30  ;;  %v673_v30 = vld [vmem:[%s8527_s3 + $0x3d8] sm:$0xff] }
 0x398   : > { %4121 = vmatpush1.bf16.msra.mxu0 %v5543_v29  ;;  %v4665_v29 = vrot.slane %v6367_v52, %v7505_v4  ;;  %v5542_v43 = vcombine.high %v657_v0, %v673_v30 }
 0x399   : > { %4024 = vmatmul.mubr.bf16.vlgmr.msra.gmra.mrb[20].mxu1 %v6297_v57  ;;  %4122 = vmatprep.subr.bf16.mxu0 %v5576_v33  ;;  %v5607_v33 = vcombine.low %v722_v38, %v738_v5  ;;  %v786_v38 = vld [vmem:[%s8527_s3 + $0x760] sm:$0xff] }
 0x39a   : > { %4074 = vmatpush1.bf16.msra.mxu1 %v5445_v36  ;;  %4105 = vmatprep.mubr.bf16.mxu1 %v6299_v58  ;;  %v4934_v36 = vrot.slane %v6443_v40, %v7505_v4  ;;  %v802_v5 = vld [vmem:[%s8527_s3 + $0x7e0] sm:$0xff] }
 0x39b   : > { %4075 = vmatprep.subr.bf16.mxu1 %v5478_v6  ;;  %v5197_v6 = vrot.slane %v6396_v63, %v7505_v4 }
 0x39c   : > { %4123 = vmatpush1.bf16.msra.mxu0 %v5575_v51  ;;  %v5640_v51 = vcombine.high %v754_v18, %v770_v50 }
 0x39d   : > { %4124 = vmatprep.subr.bf16.mxu0 %v5608_v56 }
 0x39e   : > { %v3820_v1 = vpop.f32.mrb[32].mxu0  ;;  %4076 = vmatpush1.bf16.msra.mxu1 %v5477_v17 }
 0x39f   : > { %v7542_v13 = vmul.f32 %v4402_v61, %v3820_v1  ;;  %v7544_v56 = vmul.f32 %v4665_v29, %v3820_v1  ;;  %v7546_v11 = vmul.f32 %v4934_v36, %v3820_v1  ;;  %v7548_v23 = vmul.f32 %v5197_v6, %v3820_v1  ;;  %v3822_v17 = vpop.f32.mrb[33].mxu0  ;;  %4077 = vmatprep.subr.bf16.mxu1 %v5510_v24  ;;  %v689_v61 = vld [vmem:[%s8527_s3 + $0x458] sm:$0xff]  ;;  %v850_v36 = vld [vmem:[%s8527_s3 + $0x960] sm:$0xff] }
 0x3a0   : > { %v7550_v55 = vmul.f32 %v4406_v12, %v3822_v17  ;;  %v7552_v21 = vmul.f32 %v4669_v25, %v3822_v17  ;;  %v7554_v18 = vmul.f32 %v4938_v3, %v3822_v17  ;;  %v7556_v50 = vmul.f32 %v5201_v22, %v3822_v17  ;;  %v3824_v28 = vpop.f32.mrb[34].mxu0  ;;  %4125 = vmatpush1.bf16.msra.mxu0 %v5607_v33  ;;  %v705_v1 = vld [vmem:[%s8527_s3 + $0x4d8] sm:$0xff]  ;;  %v818_v3 = vld [vmem:[%s8527_s3 + $0x860] sm:$0xff] }
 0x3a1   : > { %8565 = vst [vmem:[#allocation26_spill] sm:$0xff] %v7542_v13  ;;  %8566 = vst [vmem:[#allocation27_spill] sm:$0xff] %v7544_v56  ;;  %v3825_v29 = vpop.f32.mrb[35].mxu0  ;;  %4126 = vmatprep.subr.bf16.mxu0 %v5640_v51  ;;  %v5672_v24 = vcombine.high %v786_v38, %v802_v5  ;;  %v5541_v12 = vcombine.low %v657_v0, %v673_v30  ;;  %v834_v28 = vld [vmem:[%s8527_s3 + $0x8e0] sm:$0xff]  ;;  %v5574_v22 = vcombine.high %v689_v61, %v705_v1  ;;  %v721_v33 = vld [vmem:[%s8527_s3 + $0x558] sm:$0xff] }
 0x3a2   : > { %8567 = vst [vmem:[#allocation28_spill] sm:$0xff] %v7546_v11  ;;  %8568 = vst [vmem:[#allocation29_spill] sm:$0xff] %v7548_v23  ;;  %4078 = vmatpush1.bf16.msra.mxu1 %v5509_v49  ;;  %v5671_v25 = vcombine.low %v786_v38, %v802_v5  ;;  %v737_v49 = vld [vmem:[%s8527_s3 + $0x5d8] sm:$0xff]  ;;  %v5704_v0 = vcombine.high %v818_v3, %v834_v28  ;;  %v5573_v30 = vcombine.low %v689_v61, %v705_v1  ;;  %v882_v1 = vld [vmem:[%s8527_s3 + $0xa60] sm:$0xff] }
 0x3a3   : > { %8569 = vst [vmem:[#allocation30_spill] sm:$0xff] %v7550_v55  ;;  %8570 = vst [vmem:[#allocation31_spill] sm:$0xff] %v7552_v21  ;;  %4079 = vmatprep.subr.bf16.mxu1 %v5542_v43  ;;  %v7583_v43 = vsub.s32 3, %v6996_v9  ;;  %v5606_v6 = vcombine.high %v721_v33, %v737_v49  ;;  %v5703_v51 = vcombine.low %v818_v3, %v834_v28  ;;  %v753_v38 = vld [vmem:[%s8527_s3 + $0x658] sm:$0xff]  ;;  %v898_v29 = vld [vmem:[%s8527_s3 + $0xae0] sm:$0xff] }
 0x3a4   : > { %8571 = vst [vmem:[#allocation32_spill] sm:$0xff] %v7554_v18  ;;  %8572 = vst [vmem:[#allocation33_spill] sm:$0xff] %v7556_v50  ;;  %4127 = vmatpush1.bf16.msra.mxu0 %v5639_v8  ;;  %v866_v8 = vld [vmem:[%s8527_s3 + $0x9e0] sm:$0xff]  ;;  %v769_v5 = vld [vmem:[%s8527_s3 + $0x6d8] sm:$0xff]  ;;  %v5605_v28 = vcombine.low %v721_v33, %v737_v49  ;;  %v5768_v21 = vcombine.high %v882_v1, %v898_v29 }
 0x3a5   : > { %4128 = vmatprep.subr.bf16.mxu0 %v5672_v24  ;;  %v4390_v17 = vrot.slane %v6333_v37, %v7583_v43  ;;  %v5736_v61 = vcombine.high %v850_v36, %v866_v8  ;;  %v4653_v24 = vrot.slane %v6367_v52, %v7583_v43  ;;  %v4657_v3 = vrot.slane %v6370_v54, %v7583_v43  ;;  %v785_v33 = vld [vmem:[%s8527_s3 + $0x758] sm:$0xff] }
 0x3a6   : > { %4080 = vmatpush1.bf16.msra.mxu1 %v5541_v12  ;;  %v4394_v12 = vrot.slane %v6336_v16, %v7583_v43  ;;  %v4926_v11 = vrot.slane %v6446_v27, %v7583_v43  ;;  %v5735_v50 = vcombine.low %v850_v36, %v866_v8  ;;  %v5637_v23 = vcombine.low %v753_v38, %v769_v5  ;;  %v801_v49 = vld [vmem:[%s8527_s3 + $0x7d8] sm:$0xff] }
 0x3a7   : > { %4081 = vmatprep.subr.bf16.mxu1 %v5574_v22  ;;  %v4922_v22 = vrot.slane %v6443_v40, %v7583_v43 }
 0x3a8   : > { %4129 = vmatpush1.bf16.msra.mxu0 %v5671_v25  ;;  %v5185_v25 = vrot.slane %v6396_v63, %v7583_v43 }
 0x3a9   : > { %4130 = vmatprep.subr.bf16.mxu0 %v5704_v0  ;;  %v5189_v0 = vrot.slane %v6393_v32, %v7583_v43 }
 0x3aa   : > { %4082 = vmatpush1.bf16.msra.mxu1 %v5573_v30  ;;  %v5638_v30 = vcombine.high %v753_v38, %v769_v5 }
 0x3ab   : > { %4083 = vmatprep.subr.bf16.mxu1 %v5606_v6 }
 0x3ac   : > { %4131 = vmatpush1.bf16.msra.mxu0 %v5703_v51  ;;  %v3779_v18 = vpop.f32.mrb[8].mxu1 }
 0x3ad   : > { %v7619_v56 = vmul.f32 %v4390_v17, %v3779_v18  ;;  %v7621_v6 = vmul.f32 %v4653_v24, %v3779_v18  ;;  %v7623_v51 = vmul.f32 %v4922_v22, %v3779_v18  ;;  %v7625_v55 = vmul.f32 %v5185_v25, %v3779_v18  ;;  %v3781_v46 = vpop.f32.mrb[9].mxu1  ;;  %4132 = vmatprep.subr.bf16.mxu0 %v5736_v61  ;;  %v914_v17 = vld [vmem:[%s8527_s3 + $0xb60] sm:$0xff]  ;;  %v849_v22 = vld [vmem:[%s8527_s3 + $0x958] sm:$0xff] }
 0x3ae   : > { %v7627_v36 = vmul.f32 %v4394_v12, %v3781_v46  ;;  %v7629_v8 = vmul.f32 %v4657_v3, %v3781_v46  ;;  %v7631_v38 = vmul.f32 %v4926_v11, %v3781_v46  ;;  %v7633_v5 = vmul.f32 %v5189_v0, %v3781_v46  ;;  %v3783_v13 = vpop.f32.mrb[10].mxu1  ;;  %4084 = vmatpush1.bf16.msra.mxu1 %v5605_v28  ;;  %v930_v18 = vld [vmem:[%s8527_s3 + $0xbe0] sm:$0xff]  ;;  %v817_v11 = vld [vmem:[%s8527_s3 + $0x858] sm:$0xff] }
 0x3af   : > { %8573 = vst [vmem:[#allocation34_spill] sm:$0xff] %v7619_v56  ;;  %8574 = vst [vmem:[#allocation35_spill] sm:$0xff] %v7621_v6  ;;  %v3784_v24 = vpop.f32.mrb[11].mxu1  ;;  %4085 = vmatprep.subr.bf16.mxu1 %v5638_v30  ;;  %v5670_v61 = vcombine.high %v785_v33, %v801_v49  ;;  %v5767_v12 = vcombine.low %v882_v1, %v898_v29  ;;  %v833_v46 = vld [vmem:[%s8527_s3 + $0x8d8] sm:$0xff]  ;;  %v5800_v13 = vcombine.high %v914_v17, %v930_v18  ;;  %v946_v28 = vld [vmem:[%s8527_s3 + $0xc60] sm:$0xff] }
 0x3b0   : > { %8575 = vst [vmem:[#allocation36_spill] sm:$0xff] %v7623_v51  ;;  %8576 = vst [vmem:[#allocation37_spill] sm:$0xff] %v7625_v55  ;;  %4133 = vmatpush1.bf16.msra.mxu0 %v5735_v50  ;;  %v5669_v3 = vcombine.low %v785_v33, %v801_v49  ;;  %v962_v50 = vld [vmem:[%s8527_s3 + $0xce0] sm:$0xff]  ;;  %v5702_v1 = vcombine.high %v817_v11, %v833_v46  ;;  %v5799_v29 = vcombine.low %v914_v17, %v930_v18  ;;  %v881_v17 = vld [vmem:[%s8527_s3 + $0xa58] sm:$0xff] }
 0x3b1   : > { %8577 = vst [vmem:[#allocation38_spill] sm:$0xff] %v7627_v36  ;;  %8578 = vst [vmem:[#allocation39_spill] sm:$0xff] %v7629_v8  ;;  %4134 = vmatprep.subr.bf16.mxu0 %v5768_v21  ;;  %v5832_v21 = vcombine.high %v946_v28, %v962_v50  ;;  %v5701_v25 = vcombine.low %v817_v11, %v833_v46  ;;  %v978_v0 = vld [vmem:[%s8527_s3 + $0xd60] sm:$0xff]  ;;  %v5831_v49 = vcombine.low %v946_v28, %v962_v50  ;;  %v897_v18 = vld [vmem:[%s8527_s3 + $0xad8] sm:$0xff] }
 0x3b2   : > { %8579 = vst [vmem:[#allocation40_spill] sm:$0xff] %v7631_v38  ;;  %8580 = vst [vmem:[#allocation41_spill] sm:$0xff] %v7633_v5  ;;  %4086 = vmatpush1.bf16.msra.mxu1 %v5637_v23  ;;  %v865_v23 = vld [vmem:[%s8527_s3 + $0x9d8] sm:$0xff]  ;;  %v994_v30 = vld [vmem:[%s8527_s3 + $0xde0] sm:$0xff]  ;;  %v5766_v46 = vcombine.high %v881_v17, %v897_v18 }
 0x3b3   : > { %4087 = vmatprep.subr.bf16.mxu1 %v5670_v61  ;;  %v5734_v33 = vcombine.high %v849_v22, %v865_v23  ;;  %v5864_v24 = vcombine.high %v978_v0, %v994_v30  ;;  %v5733_v61 = vcombine.low %v849_v22, %v865_v23  ;;  %v1026_v11 = vld [vmem:[%s8527_s3 + $0xee0] sm:$0xff]  ;;  %v929_v28 = vld [vmem:[%s8527_s3 + $0xbd8] sm:$0xff] }
 0x3b4   : > { %4135 = vmatpush1.bf16.msra.mxu0 %v5767_v12  ;;  %v1010_v12 = vld [vmem:[%s8527_s3 + $0xe60] sm:$0xff] }
 0x3b5   : > { %4136 = vmatprep.subr.bf16.mxu0 %v5800_v13  ;;  %v5863_v13 = vcombine.low %v978_v0, %v994_v30  ;;  %v5896_v50 = vcombine.high %v1010_v12, %v1026_v11  ;;  %v1058_v22 = vld [vmem:[%s8527_s3 + $0xfe0] sm:$0xff]  ;;  %v961_v0 = vld [vmem:[%s8527_s3 + $0xcd8] sm:$0xff] }
 0x3b6   : > { %4088 = vmatpush1.bf16.msra.mxu1 %v5669_v3  ;;  %v913_v3 = vld [vmem:[%s8527_s3 + $0xb58] sm:$0xff] }
 0x3b7   : > { %4089 = vmatprep.subr.bf16.mxu1 %v5702_v1  ;;  %v5765_v1 = vcombine.low %v881_v17, %v897_v18  ;;  %v5798_v23 = vcombine.high %v913_v3, %v929_v28  ;;  %v580_v17 = vld [vmem:[%s8527_s3 + $0xf0] sm:$0xff] }
 0x3b8   : > { %4137 = vmatpush1.bf16.msra.mxu0 %v5799_v29  ;;  %v1042_v29 = vld [vmem:[%s8527_s3 + $0xf60] sm:$0xff] }
 0x3b9   : > { %4138 = vmatprep.subr.bf16.mxu0 %v5832_v21  ;;  %v5895_v21 = vcombine.low %v1010_v12, %v1026_v11  ;;  %v5928_v30 = vcombine.high %v1042_v29, %v1058_v22  ;;  %v993_v12 = vld [vmem:[%s8527_s3 + $0xdd8] sm:$0xff] }
 0x3ba   : > { %4090 = vmatpush1.bf16.msra.mxu1 %v5701_v25  ;;  %v945_v25 = vld [vmem:[%s8527_s3 + $0xc58] sm:$0xff] }
 0x3bb   : > { %4091 = vmatprep.subr.bf16.mxu1 %v5734_v33  ;;  %v5797_v33 = vcombine.low %v913_v3, %v929_v28  ;;  %v5830_v18 = vcombine.high %v945_v25, %v961_v0  ;;  %v612_v3 = vld [vmem:[%s8527_s3 + $0x1f0] sm:$0xff] }
 0x3bc   : > { %4139 = vmatpush1.bf16.msra.mxu0 %v5831_v49  ;;  %v564_v49 = vld [vmem:[%s8527_s3 + $0x70] sm:$0xff] }
 0x3bd   : > { %4140 = vmatprep.subr.bf16.mxu0 %v5864_v24  ;;  %v5927_v24 = vcombine.low %v1042_v29, %v1058_v22  ;;  %v5452_v11 = vcombine.high %v564_v49, %v580_v17  ;;  %v1025_v29 = vld [vmem:[%s8527_s3 + $0xed8] sm:$0xff] }
 0x3be   : > { %4092 = vmatpush1.bf16.msra.mxu1 %v5733_v61  ;;  %v977_v61 = vld [vmem:[%s8527_s3 + $0xd58] sm:$0xff] }
 0x3bf   : > { %4093 = vmatprep.subr.bf16.mxu1 %v5766_v46  ;;  %v5829_v46 = vcombine.low %v945_v25, %v961_v0  ;;  %v5862_v28 = vcombine.high %v977_v61, %v993_v12  ;;  %v644_v25 = vld [vmem:[%s8527_s3 + $0x2f0] sm:$0xff] }
 0x3c0   : > { %4141 = vmatpush1.bf16.msra.mxu0 %v5863_v13  ;;  %v596_v13 = vld [vmem:[%s8527_s3 + $0x170] sm:$0xff] }
 0x3c1   : > { %4142 = vmatprep.subr.bf16.mxu0 %v5896_v50  ;;  %v5451_v50 = vcombine.low %v564_v49, %v580_v17  ;;  %v5484_v22 = vcombine.high %v596_v13, %v612_v3  ;;  %v1057_v49 = vld [vmem:[%s8527_s3 + $0xfd8] sm:$0xff] }
 0x3c2   : > { %4094 = vmatpush1.bf16.msra.mxu1 %v5765_v1  ;;  %v1009_v1 = vld [vmem:[%s8527_s3 + $0xe58] sm:$0xff] }
 0x3c3   : > { %4095 = vmatprep.subr.bf16.mxu1 %v5798_v23  ;;  %v5861_v23 = vcombine.low %v977_v61, %v993_v12  ;;  %v5894_v0 = vcombine.high %v1009_v1, %v1025_v29  ;;  %v676_v61 = vld [vmem:[%s8527_s3 + $0x3f0] sm:$0xff] }
 0x3c4   : > { %4143 = vmatpush1.bf16.msra.mxu0 %v5895_v21  ;;  %v628_v21 = vld [vmem:[%s8527_s3 + $0x270] sm:$0xff] }
 0x3c5   : > { %4144 = vmatprep.subr.bf16.mxu0 %v5928_v30  ;;  %v5483_v30 = vcombine.low %v596_v13, %v612_v3  ;;  %v5516_v17 = vcombine.high %v628_v21, %v644_v25  ;;  %v579_v13 = vld [vmem:[%s8527_s3 + $0xe8] sm:$0xff] }
 0x3c6   : > { %4096 = vmatpush1.bf16.msra.mxu1 %v5797_v33  ;;  %v1041_v33 = vld [vmem:[%s8527_s3 + $0xf58] sm:$0xff] }
 0x3c7   : > { %4097 = vmatprep.subr.bf16.mxu1 %v5830_v18  ;;  %v5893_v18 = vcombine.low %v1009_v1, %v1025_v29  ;;  %v5926_v12 = vcombine.high %v1041_v33, %v1057_v49  ;;  %v708_v1 = vld [vmem:[%s8527_s3 + $0x4f0] sm:$0xff] }
 0x3c8   : > { %4145 = vmatpush1.bf16.msra.mxu0 %v5927_v24  ;;  %v660_v24 = vld [vmem:[%s8527_s3 + $0x370] sm:$0xff] }
 0x3c9   : > { %4196 = vmatprep.subr.bf16.mxu0 %v5452_v11  ;;  %v5515_v11 = vcombine.low %v628_v21, %v644_v25  ;;  %v5548_v3 = vcombine.high %v660_v24, %v676_v61  ;;  %v611_v21 = vld [vmem:[%s8527_s3 + $0x1e8] sm:$0xff] }
 0x3ca   : > { %4098 = vmatpush1.bf16.msra.mxu1 %v5829_v46  ;;  %v563_v46 = vld [vmem:[%s8527_s3 + $0x68] sm:$0xff] }
 0x3cb   : > { %4147 = vmatmul.mubr.bf16.vlgmr.msra.gmra.mrb[48].mxu0 %v6297_v57  ;;  %4099 = vmatprep.subr.bf16.mxu1 %v5862_v28  ;;  %v5925_v28 = vcombine.low %v1041_v33, %v1057_v49  ;;  %v5450_v29 = vcombine.high %v563_v46, %v579_v13  ;;  %v740_v33 = vld [vmem:[%s8527_s3 + $0x5f0] sm:$0xff] }
 0x3cc   : > { %4197 = vmatpush1.bf16.msra.mxu0 %v5451_v50  ;;  %4228 = vmatprep.mubr.bf16.mxu0 %v6299_v58  ;;  %v692_v50 = vld [vmem:[%s8527_s3 + $0x470] sm:$0xff] }
 0x3cd   : > { %4198 = vmatprep.subr.bf16.mxu0 %v5484_v22  ;;  %v5547_v22 = vcombine.low %v660_v24, %v676_v61  ;;  %v5580_v25 = vcombine.high %v692_v50, %v708_v1  ;;  %v643_v24 = vld [vmem:[%s8527_s3 + $0x2e8] sm:$0xff]  ;;  %v7771_v61 = vsub.s32 6, %v6996_v9 }
 0x3ce   : > { %4100 = vmatpush1.bf16.msra.mxu1 %v5861_v23  ;;  %v595_v23 = vld [vmem:[%s8527_s3 + $0x168] sm:$0xff] }
 0x3cf   : > { %4101 = vmatprep.subr.bf16.mxu1 %v5894_v0  ;;  %v5449_v0 = vcombine.low %v563_v46, %v579_v13  ;;  %v5482_v49 = vcombine.high %v595_v23, %v611_v21  ;;  %v756_v46 = vld [vmem:[%s8527_s3 + $0x670] sm:$0xff]  ;;  %v4962_v51 = vrot.slane %v6446_v27, %v7771_v61 }
 0x3d0   : > { %4199 = vmatpush1.bf16.msra.mxu0 %v5483_v30  ;;  %v724_v30 = vld [vmem:[%s8527_s3 + $0x570] sm:$0xff] }
 0x3d1   : > { %4200 = vmatprep.subr.bf16.mxu0 %v5516_v17  ;;  %v5579_v17 = vcombine.low %v692_v50, %v708_v1  ;;  %v772_v13 = vld [vmem:[%s8527_s3 + $0x6f0] sm:$0xff]  ;;  %v659_v50 = vld [vmem:[%s8527_s3 + $0x368] sm:$0xff] }
 0x3d2   : > { %4102 = vmatpush1.bf16.msra.mxu1 %v5893_v18  ;;  %v627_v18 = vld [vmem:[%s8527_s3 + $0x268] sm:$0xff]  ;;  %v5643_v55 = vcombine.low %v756_v46, %v772_v13 }
 0x3d3   : > { %4103 = vmatprep.subr.bf16.mxu1 %v5926_v12  ;;  %v5612_v12 = vcombine.high %v724_v30, %v740_v33  ;;  %v675_v1 = vld [vmem:[%s8527_s3 + $0x3e8] sm:$0xff]  ;;  %v5513_v5 = vcombine.low %v627_v18, %v643_v24 }
 0x3d4   : > { %4201 = vmatpush1.bf16.msra.mxu0 %v5515_v11  ;;  %v5481_v11 = vcombine.low %v595_v23, %v611_v21  ;;  %v4693_v23 = vrot.slane %v6370_v54, %v7771_v61  ;;  %v5611_v21 = vcombine.low %v724_v30, %v740_v33  ;;  %v5546_v8 = vcombine.high %v659_v50, %v675_v1  ;;  %v788_v30 = vld [vmem:[%s8527_s3 + $0x770] sm:$0xff] }
 0x3d5   : > { %4202 = vmatprep.subr.bf16.mxu0 %v5548_v3  ;;  %v4426_v3 = vrot.slane %v6333_v37, %v7771_v61  ;;  %v804_v33 = vld [vmem:[%s8527_s3 + $0x7f0] sm:$0xff] }
 0x3d6   : > { %4104 = vmatpush1.bf16.msra.mxu1 %v5925_v28  ;;  %v5514_v28 = vcombine.high %v627_v18, %v643_v24 }
 0x3d7   : > { %4155 = vmatprep.subr.bf16.mxu1 %v5450_v29  ;;  %v4689_v29 = vrot.slane %v6367_v52, %v7771_v61 }
 0x3d8   : > { %4203 = vmatpush1.bf16.msra.mxu0 %v5547_v22  ;;  %v4430_v22 = vrot.slane %v6336_v16, %v7771_v61 }
 0x3d9   : > { %4106 = vmatmul.mubr.bf16.vlgmr.msra.gmra.mrb[24].mxu1 %v6297_v57  ;;  %4204 = vmatprep.subr.bf16.mxu0 %v5580_v25  ;;  %v4958_v25 = vrot.slane %v6443_v40, %v7771_v61 }
 0x3da   : > { %4156 = vmatpush1.bf16.msra.mxu1 %v5449_v0  ;;  %4187 = vmatprep.mubr.bf16.mxu1 %v6299_v58  ;;  %v5221_v0 = vrot.slane %v6396_v63, %v7771_v61 }
 0x3db   : > { %4157 = vmatprep.subr.bf16.mxu1 %v5482_v49  ;;  %v5225_v49 = vrot.slane %v6393_v32, %v7771_v61 }
 0x3dc   : > { %4205 = vmatpush1.bf16.msra.mxu0 %v5579_v17  ;;  %v5644_v17 = vcombine.high %v756_v46, %v772_v13 }
 0x3dd   : > { %4206 = vmatprep.subr.bf16.mxu0 %v5612_v12 }
 0x3de   : > { %v3902_v38 = vpop.f32.mrb[36].mxu0  ;;  %4158 = vmatpush1.bf16.msra.mxu1 %v5481_v11 }
 0x3df   : > { %v7808_v6 = vmul.f32 %v4426_v3, %v3902_v38  ;;  %v7810_v12 = vmul.f32 %v4689_v29, %v3902_v38  ;;  %v7812_v47 = vmul.f32 %v4958_v25, %v3902_v38  ;;  %v7814_v36 = vmul.f32 %v5221_v0, %v3902_v38  ;;  %v3904_v11 = vpop.f32.mrb[37].mxu0  ;;  %4159 = vmatprep.subr.bf16.mxu1 %v5514_v28  ;;  %v691_v3 = vld [vmem:[%s8527_s3 + $0x468] sm:$0xff]  ;;  %v852_v0 = vld [vmem:[%s8527_s3 + $0x970] sm:$0xff] }
 0x3e0   : > { %v7816_v18 = vmul.f32 %v4430_v22, %v3904_v11  ;;  %v7818_v24 = vmul.f32 %v4693_v23, %v3904_v11  ;;  %v7820_v46 = vmul.f32 %v4962_v51, %v3904_v11  ;;  %v7822_v13 = vmul.f32 %v5225_v49, %v3904_v11  ;;  %v3906_v44 = vpop.f32.mrb[38].mxu0  ;;  %4207 = vmatpush1.bf16.msra.mxu0 %v5611_v21  ;;  %v707_v38 = vld [vmem:[%s8527_s3 + $0x4e8] sm:$0xff]  ;;  %v820_v51 = vld [vmem:[%s8527_s3 + $0x870] sm:$0xff] }
 0x3e1   : > { %8581 = vst [vmem:[#allocation42_spill] sm:$0xff] %v7808_v6  ;;  %8582 = vst [vmem:[#allocation43_spill] sm:$0xff] %v7810_v12  ;;  %v3907_v29 = vpop.f32.mrb[39].mxu0  ;;  %4208 = vmatprep.subr.bf16.mxu0 %v5644_v17  ;;  %v5676_v28 = vcombine.high %v788_v30, %v804_v33  ;;  %v5545_v22 = vcombine.low %v659_v50, %v675_v1  ;;  %v836_v44 = vld [vmem:[%s8527_s3 + $0x8f0] sm:$0xff]  ;;  %v5578_v23 = vcombine.high %v691_v3, %v707_v38  ;;  %v723_v25 = vld [vmem:[%s8527_s3 + $0x568] sm:$0xff] }
 0x3e2   : > { %8583 = vst [vmem:[#allocation44_spill] sm:$0xff] %v7812_v47  ;;  %8584 = vst [vmem:[#allocation45_spill] sm:$0xff] %v7814_v36  ;;  %4160 = vmatpush1.bf16.msra.mxu1 %v5513_v5  ;;  %v5675_v21 = vcombine.low %v788_v30, %v804_v33  ;;  %v739_v5 = vld [vmem:[%s8527_s3 + $0x5e8] sm:$0xff]  ;;  %v5708_v50 = vcombine.high %v820_v51, %v836_v44  ;;  %v5577_v1 = vcombine.low %v691_v3, %v707_v38  ;;  %v884_v38 = vld [vmem:[%s8527_s3 + $0xa70] sm:$0xff] }
 0x3e3   : > { %8585 = vst [vmem:[#allocation46_spill] sm:$0xff] %v7816_v18  ;;  %8586 = vst [vmem:[#allocation47_spill] sm:$0xff] %v7818_v24  ;;  %4161 = vmatprep.subr.bf16.mxu1 %v5546_v8  ;;  %v7849_v8 = vsub.s32 5, %v6996_v9  ;;  %v5610_v49 = vcombine.high %v723_v25, %v739_v5  ;;  %v5707_v17 = vcombine.low %v820_v51, %v836_v44  ;;  %v755_v30 = vld [vmem:[%s8527_s3 + $0x668] sm:$0xff]  ;;  %v900_v29 = vld [vmem:[%s8527_s3 + $0xaf0] sm:$0xff] }
 0x3e4   : > { %8587 = vst [vmem:[#allocation48_spill] sm:$0xff] %v7820_v46  ;;  %8588 = vst [vmem:[#allocation49_spill] sm:$0xff] %v7822_v13  ;;  %4209 = vmatpush1.bf16.msra.mxu0 %v5643_v55  ;;  %v868_v55 = vld [vmem:[%s8527_s3 + $0x9f0] sm:$0xff]  ;;  %v771_v33 = vld [vmem:[%s8527_s3 + $0x6e8] sm:$0xff]  ;;  %v5609_v44 = vcombine.low %v723_v25, %v739_v5  ;;  %v5772_v24 = vcombine.high %v884_v38, %v900_v29 }
 0x3e5   : > { %4210 = vmatprep.subr.bf16.mxu0 %v5676_v28  ;;  %v4414_v11 = vrot.slane %v6333_v37, %v7849_v8  ;;  %v5740_v3 = vcombine.high %v852_v0, %v868_v55  ;;  %v4677_v28 = vrot.slane %v6367_v52, %v7849_v8  ;;  %v4681_v51 = vrot.slane %v6370_v54, %v7849_v8  ;;  %v787_v25 = vld [vmem:[%s8527_s3 + $0x768] sm:$0xff] }
 0x3e6   : > { %4162 = vmatpush1.bf16.msra.mxu1 %v5545_v22  ;;  %v4418_v22 = vrot.slane %v6336_v16, %v7849_v8  ;;  %v4950_v47 = vrot.slane %v6446_v27, %v7849_v8  ;;  %v5739_v13 = vcombine.low %v852_v0, %v868_v55  ;;  %v5641_v36 = vcombine.low %v755_v30, %v771_v33  ;;  %v803_v5 = vld [vmem:[%s8527_s3 + $0x7e8] sm:$0xff] }
 0x3e7   : > { %4163 = vmatprep.subr.bf16.mxu1 %v5578_v23  ;;  %v4946_v23 = vrot.slane %v6443_v40, %v7849_v8 }
 0x3e8   : > { %4211 = vmatpush1.bf16.msra.mxu0 %v5675_v21  ;;  %v5209_v21 = vrot.slane %v6396_v63, %v7849_v8 }
 0x3e9   : > { %4212 = vmatprep.subr.bf16.mxu0 %v5708_v50  ;;  %v5213_v50 = vrot.slane %v6393_v32, %v7849_v8 }
 0x3ea   : > { %4164 = vmatpush1.bf16.msra.mxu1 %v5577_v1  ;;  %v5642_v1 = vcombine.high %v755_v30, %v771_v33 }
 0x3eb   : > { %4165 = vmatprep.subr.bf16.mxu1 %v5610_v49 }
 0x3ec   : > { %4213 = vmatpush1.bf16.msra.mxu0 %v5707_v17  ;;  %v3861_v46 = vpop.f32.mrb[12].mxu1 }
 0x3ed   : > { %v7885_v12 = vmul.f32 %v4414_v11, %v3861_v46  ;;  %v7887_v49 = vmul.f32 %v4677_v28, %v3861_v46  ;;  %v7889_v17 = vmul.f32 %v4946_v23, %v3861_v46  ;;  %v7891_v18 = vmul.f32 %v5209_v21, %v3861_v46  ;;  %v3863_v6 = vpop.f32.mrb[13].mxu1  ;;  %4214 = vmatprep.subr.bf16.mxu0 %v5740_v3  ;;  %v916_v11 = vld [vmem:[%s8527_s3 + $0xb70] sm:$0xff]  ;;  %v851_v23 = vld [vmem:[%s8527_s3 + $0x968] sm:$0xff] }
 0x3ee   : > { %v7893_v0 = vmul.f32 %v4418_v22, %v3863_v6  ;;  %v7895_v55 = vmul.f32 %v4681_v51, %v3863_v6  ;;  %v7897_v30 = vmul.f32 %v4950_v47, %v3863_v6  ;;  %v7899_v33 = vmul.f32 %v5213_v50, %v3863_v6  ;;  %v3865_v56 = vpop.f32.mrb[14].mxu1  ;;  %4166 = vmatpush1.bf16.msra.mxu1 %v5609_v44  ;;  %v932_v46 = vld [vmem:[%s8527_s3 + $0xbf0] sm:$0xff]  ;;  %v819_v47 = vld [vmem:[%s8527_s3 + $0x868] sm:$0xff] }
 0x3ef   : > { %8589 = vst [vmem:[#allocation50_spill] sm:$0xff] %v7889_v17  ;;  %8590 = vst [vmem:[#allocation51_spill] sm:$0xff] %v7891_v18  ;;  %v3866_v28 = vpop.f32.mrb[15].mxu1  ;;  %4167 = vmatprep.subr.bf16.mxu1 %v5642_v1  ;;  %v5674_v3 = vcombine.high %v787_v25, %v803_v5  ;;  %v5771_v22 = vcombine.low %v884_v38, %v900_v29  ;;  %v835_v56 = vld [vmem:[%s8527_s3 + $0x8e8] sm:$0xff]  ;;  %v5804_v6 = vcombine.high %v916_v11, %v932_v46  ;;  %v948_v44 = vld [vmem:[%s8527_s3 + $0xc70] sm:$0xff] }
 0x3f0   : > { %8591 = vst [vmem:[#allocation52_spill] sm:$0xff] %v7897_v30  ;;  %8592 = vst [vmem:[#allocation53_spill] sm:$0xff] %v7899_v33  ;;  %4215 = vmatpush1.bf16.msra.mxu0 %v5739_v13  ;;  %v5673_v51 = vcombine.low %v787_v25, %v803_v5  ;;  %v964_v13 = vld [vmem:[%s8527_s3 + $0xcf0] sm:$0xff]  ;;  %v5706_v38 = vcombine.high %v819_v47, %v835_v56  ;;  %v5803_v29 = vcombine.low %v916_v11, %v932_v46  ;;  %v883_v11 = vld [vmem:[%s8527_s3 + $0xa68] sm:$0xff] }
 0x3f1   : > { %4216 = vmatprep.subr.bf16.mxu0 %v5772_v24  ;;  %v5836_v24 = vcombine.high %v948_v44, %v964_v13  ;;  %v5705_v21 = vcombine.low %v819_v47, %v835_v56  ;;  %v980_v50 = vld [vmem:[%s8527_s3 + $0xd70] sm:$0xff]  ;;  %v5835_v5 = vcombine.low %v948_v44, %v964_v13  ;;  %v899_v46 = vld [vmem:[%s8527_s3 + $0xae8] sm:$0xff] }
 0x3f2   : > { %4168 = vmatpush1.bf16.msra.mxu1 %v5641_v36  ;;  %v867_v36 = vld [vmem:[%s8527_s3 + $0x9e8] sm:$0xff]  ;;  %v996_v1 = vld [vmem:[%s8527_s3 + $0xdf0] sm:$0xff]  ;;  %v5770_v56 = vcombine.high %v883_v11, %v899_v46 }
 0x3f3   : > { %4169 = vmatprep.subr.bf16.mxu1 %v5674_v3  ;;  %v5738_v25 = vcombine.high %v851_v23, %v867_v36  ;;  %v5868_v28 = vcombine.high %v980_v50, %v996_v1  ;;  %v5737_v3 = vcombine.low %v851_v23, %v867_v36  ;;  %v1028_v47 = vld [vmem:[%s8527_s3 + $0xef0] sm:$0xff]  ;;  %v931_v44 = vld [vmem:[%s8527_s3 + $0xbe8] sm:$0xff] }
 0x3f4   : > { %4217 = vmatpush1.bf16.msra.mxu0 %v5771_v22  ;;  %v1012_v22 = vld [vmem:[%s8527_s3 + $0xe70] sm:$0xff] }
 0x3f5   : > { %4218 = vmatprep.subr.bf16.mxu0 %v5804_v6  ;;  %v5867_v6 = vcombine.low %v980_v50, %v996_v1  ;;  %v5900_v13 = vcombine.high %v1012_v22, %v1028_v47  ;;  %v1060_v23 = vld [vmem:[%s8527_s3 + $0xff0] sm:$0xff]  ;;  %v963_v50 = vld [vmem:[%s8527_s3 + $0xce8] sm:$0xff] }
 0x3f6   : > { %4170 = vmatpush1.bf16.msra.mxu1 %v5673_v51  ;;  %v915_v51 = vld [vmem:[%s8527_s3 + $0xb68] sm:$0xff] }
 0x3f7   : > { %4171 = vmatprep.subr.bf16.mxu1 %v5706_v38  ;;  %v5769_v38 = vcombine.low %v883_v11, %v899_v46  ;;  %v5802_v36 = vcombine.high %v915_v51, %v931_v44  ;;  %v979_v46 = vld [vmem:[%s8527_s3 + $0xd68] sm:$0xff] }
 0x3f8   : > { %4219 = vmatpush1.bf16.msra.mxu0 %v5803_v29  ;;  %v1044_v29 = vld [vmem:[%s8527_s3 + $0xf70] sm:$0xff] }
 0x3f9   : > { %4220 = vmatprep.subr.bf16.mxu0 %v5836_v24  ;;  %v5899_v24 = vcombine.low %v1012_v22, %v1028_v47  ;;  %v5932_v1 = vcombine.high %v1044_v29, %v1060_v23  ;;  %v5931_v11 = vcombine.low %v1044_v29, %v1060_v23  ;;  %v1011_v47 = vld [vmem:[%s8527_s3 + $0xe68] sm:$0xff] }
 0x3fa   : > { %4172 = vmatpush1.bf16.msra.mxu1 %v5705_v21  ;;  %v947_v21 = vld [vmem:[%s8527_s3 + $0xc68] sm:$0xff] }
 0x3fb   : > { %4173 = vmatprep.subr.bf16.mxu1 %v5738_v25  ;;  %v5801_v25 = vcombine.low %v915_v51, %v931_v44  ;;  %v1043_v29 = vld [vmem:[%s8527_s3 + $0xf68] sm:$0xff] }
 0x3fc   : > { %4221 = vmatpush1.bf16.msra.mxu0 %v5835_v5  ;;  %v5834_v5 = vcombine.high %v947_v21, %v963_v50  ;;  %v1059_v23 = vld [vmem:[%s8527_s3 + $0xfe8] sm:$0xff] }
 0x3fd   : > { %4222 = vmatprep.subr.bf16.mxu0 %v5868_v28  ;;  %v995_v28 = vld [vmem:[%s8527_s3 + $0xde8] sm:$0xff] }
 0x3fe   : > { %4174 = vmatpush1.bf16.msra.mxu1 %v5737_v3  ;;  %v5833_v3 = vcombine.low %v947_v21, %v963_v50  ;;  %v5866_v22 = vcombine.high %v979_v46, %v995_v28  ;;  %v5865_v51 = vcombine.low %v979_v46, %v995_v28  ;;  %v5930_v21 = vcombine.high %v1043_v29, %v1059_v23  ;;  %v565_v50 = vld [vmem:[%s8527_s3 + $0x78] sm:$0xff] }
 0x3ff   : > { %4175 = vmatprep.subr.bf16.mxu1 %v5770_v56  ;;  %v1027_v56 = vld [vmem:[%s8527_s3 + $0xee8] sm:$0xff]  ;;  %v597_v46 = vld [vmem:[%s8527_s3 + $0x178] sm:$0xff] }
 0x400   : > { %4223 = vmatpush1.bf16.msra.mxu0 %v5867_v6  ;;  %v8593_v6 = vpack.c.bf16 %v6330_v2, %v6336_v16  ;;  %v5898_v44 = vcombine.high %v1011_v47, %v1027_v56  ;;  %v613_v28 = vld [vmem:[%s8527_s3 + $0x1f8] sm:$0xff] }
 0x401   : > { %4224 = vmatprep.subr.bf16.mxu0 %v5900_v13  ;;  %v8594_v13 = vpack.c.bf16 %v6327_v14, %v6333_v37 }
 0x402   : > { %4176 = vmatpush1.bf16.msra.mxu1 %v5769_v38  ;;  %v8595_v38 = vmov 0.0  }
 0x403   : > { %4177 = vmatprep.subr.bf16.mxu1 %v5802_v36  ;;  %v8596_v36 = vpack.c.bf16 %v6390_v31, %v6370_v54 }
 0x404   : > { %4225 = vmatpush1.bf16.msra.mxu0 %v5899_v24  ;;  %v5897_v24 = vcombine.low %v1011_v47, %v1027_v56  ;;  %v5486_v47 = vcombine.high %v597_v46, %v613_v28  ;;  %v8599_v56 = vpack.c.bf16 %v6374_v59, %v6396_v63 }
 0x405   : > { %4226 = vmatprep.subr.bf16.mxu0 %v5932_v1  ;;  %v581_v1 = vld [vmem:[%s8527_s3 + $0xf8] sm:$0xff] }
 0x406   : > { %4178 = vmatpush1.bf16.msra.mxu1 %v5801_v25  ;;  %v5929_v25 = vcombine.low %v1043_v29, %v1059_v23  ;;  %v661_v29 = vld [vmem:[%s8527_s3 + $0x378] sm:$0xff] }
 0x407   : > { %4179 = vmatprep.subr.bf16.mxu1 %v5834_v5  ;;  %v5454_v5 = vcombine.high %v565_v50, %v581_v1  ;;  %v677_v23 = vld [vmem:[%s8527_s3 + $0x3f8] sm:$0xff] }
 0x408   : > { %4227 = vmatpush1.bf16.msra.mxu0 %v5931_v11  ;;  %v8597_v11 = vpack.c.bf16 %v6387_v53, %v6367_v52 }
 0x409   : > { %5948 = vmatprep.subr.bf16.mxu0 %v8593_v6  ;;  %v629_v6 = vld [vmem:[%s8527_s3 + $0x278] sm:$0xff] }
 0x40a   : > { %4180 = vmatpush1.bf16.msra.mxu1 %v5833_v3  ;;  %v8598_v3 = vpack.c.bf16 %v6377_v60, %v6393_v32 }
 0x40b   : > { %4229 = vmatmul.mubr.bf16.vlgmr.msra.gmra.mrb[52].mxu0 %v6297_v57  ;;  %4181 = vmatprep.subr.bf16.mxu1 %v5866_v22  ;;  %v5453_v22 = vcombine.low %v565_v50, %v581_v1  ;;  %v5245_v50 = vrot.slane %v6374_v59, %v7013_v20  ;;  %v4454_v1 = vrot.slane %v6330_v2, %v7013_v20 }
 0x40c   : > { %5950 = vmatpush1.bf16.msra.mxu0 %v8594_v13  ;;  %4356 = vmatprep.mubr.f32.mxu0 %v8595_v38 }
 0x40d   : > { %5952 = vmatprep.subr.bf16.mxu0 %v8596_v36  ;;  %v4713_v36 = vrot.slane %v6387_v53, %v7013_v20 }
 0x40e   : > { %4182 = vmatpush1.bf16.msra.mxu1 %v5865_v51  ;;  %v645_v51 = vld [vmem:[%s8527_s3 + $0x2f8] sm:$0xff] }
 0x40f   : > { %4183 = vmatprep.subr.bf16.mxu1 %v5898_v44  ;;  %v5485_v44 = vcombine.low %v597_v46, %v613_v28  ;;  %v5518_v13 = vcombine.high %v629_v6, %v645_v51  ;;  %v5517_v46 = vcombine.low %v629_v6, %v645_v51  ;;  %v5550_v28 = vcombine.high %v661_v29, %v677_v23  ;;  %v693_v51 = vld [vmem:[%s8527_s3 + $0x478] sm:$0xff] }
 0x412   : > { %4184 = vmatpush1.bf16.msra.mxu1 %v5897_v24  ;;  %v4450_v24 = vrot.slane %v6327_v14, %v7013_v20 }
 0x413   : > { %5935 = vmatmul.mubr.msk.f32.vlgmr.msra.gmra.mrb[22].mxu0 %vm4288_vm2, %v7095_v62  ;;  %4185 = vmatprep.subr.bf16.mxu1 %v5930_v21  ;;  %v4982_v21 = vrot.slane %v6431_v34, %v7013_v20 }
 0x414   : > { %5954 = vmatpush1.bf16.msra.mxu0 %v8597_v11  ;;  %4619 = vmatprep.mubr.f32.mxu0 %v8595_v38  ;;  %v5249_v11 = vrot.slane %v6377_v60, %v7013_v20 }
 0x415   : > { %5960 = vmatprep.subr.bf16.mxu0 %v8598_v3 }
 0x416   : > { %4186 = vmatpush1.bf16.msra.mxu1 %v5929_v25 }
 0x417   : > { %5936 = vmatmul.mubr.msk.f32.vlgmr.msra.gmra.mrb[56].mxu0 %vm4288_vm2, %v7095_v62  ;;  %4237 = vmatprep.subr.bf16.mxu1 %v5454_v5  ;;  %v4986_v5 = vrot.slane %v6434_v19, %v7013_v20 }
 0x418   : > { %5962 = vmatpush1.bf16.msra.mxu0 %v8599_v56  ;;  %5151 = vmatprep.mubr.f32.mxu0 %v8595_v38 }
 0x419   : > { %4188 = vmatmul.mubr.bf16.vlgmr.msra.gmra.mrb[28].mxu1 %v6297_v57 }
 0x41a   : > { %4238 = vmatpush1.bf16.msra.mxu1 %v5453_v22  ;;  %4269 = vmatprep.mubr.bf16.mxu1 %v6299_v58  ;;  %v4717_v58 = vrot.slane %v6390_v31, %v7013_v20 }
 0x41b   : > { %5938 = vmatmul.mubr.msk.f32.vlgmr.msra.gmra.mrb[58].mxu0 %vm4288_vm2, %v7095_v62  ;;  %4239 = vmatprep.subr.bf16.mxu1 %v5486_v47 }
 0x41e   : > { %v3984_v25 = vpop.f32.mrb[40].mxu0  ;;  %4240 = vmatpush1.bf16.msra.mxu1 %v5485_v44  ;;  %v709_v44 = vld [vmem:[%s8527_s3 + $0x4f8] sm:$0xff] }
 0x41f   : > { %v8049_v3 = vmul.f32 %v4450_v24, %v3984_v25  ;;  %v8051_v22 = vmul.f32 %v4713_v36, %v3984_v25  ;;  %v8053_v47 = vmul.f32 %v4982_v21, %v3984_v25  ;;  %v8055_v56 = vmul.f32 %v5245_v50, %v3984_v25  ;;  %v3986_v30 = vpop.f32.mrb[41].mxu0  ;;  %4241 = vmatprep.subr.bf16.mxu1 %v5518_v13 }
 0x420   : > { %v8057_v17 = vmul.f32 %v4454_v1, %v3986_v30  ;;  %v8059_v33 = vmul.f32 %v4717_v58, %v3986_v30  ;;  %v8061_v18 = vmul.f32 %v4986_v5, %v3986_v30  ;;  %v8063_v20 = vmul.f32 %v5249_v11, %v3986_v30  ;;  %v3988_v6 = vpop.f32.mrb[42].mxu0  ;;  %v725_v58 = vld [vmem:[%s8527_s3 + $0x578] sm:$0xff] }
 0x421   : > { %8600 = vst [vmem:[#allocation54_spill] sm:$0xff] %v8053_v47  ;;  %8601 = vst [vmem:[#allocation55_spill] sm:$0xff] %v8055_v56  ;;  %v3989_v36 = vpop.f32.mrb[43].mxu0  ;;  %v5549_v13 = vcombine.low %v661_v29, %v677_v23  ;;  %v5582_v24 = vcombine.high %v693_v51, %v709_v44  ;;  %v741_v30 = vld [vmem:[%s8527_s3 + $0x5f8] sm:$0xff]  ;;  %v5581_v21 = vcombine.low %v693_v51, %v709_v44  ;;  %v8078_v1 = vsub.s32 7, %v6996_v9 }
 0x422   : > { %8602 = vst [vmem:[#allocation56_spill] sm:$0xff] %v8061_v18  ;;  %8603 = vst [vmem:[#allocation57_spill] sm:$0xff] %v8063_v20  ;;  %4242 = vmatpush1.bf16.msra.mxu1 %v5517_v46  ;;  %v5614_v50 = vcombine.high %v725_v58, %v741_v30  ;;  %v757_v29 = vld [vmem:[%s8527_s3 + $0x678] sm:$0xff]  ;;  %v5613_v11 = vcombine.low %v725_v58, %v741_v30 }
 0x423   : > { %4243 = vmatprep.subr.bf16.mxu1 %v5550_v28  ;;  %8604 = vst [vmem:[#allocation58_spill] sm:$0xff] %v8078_v1  ;;  %v773_v23 = vld [vmem:[%s8527_s3 + $0x6f8] sm:$0xff]  ;;  %v4438_v25 = vrot.slane %v6333_v37, %v8078_v1  ;;  %v4701_v5 = vrot.slane %v6367_v52, %v8078_v1  ;;  %v4970_v9 = vrot.slane %v6443_v40, %v8078_v1 }
 0x424   : > { %v5233_v46 = vrot.slane %v6396_v63, %v8078_v1  ;;  %v4442_v28 = vrot.slane %v6336_v16, %v8078_v1  ;;  %v5646_v6 = vcombine.high %v757_v29, %v773_v23  ;;  %v4705_v44 = vrot.slane %v6370_v54, %v8078_v1  ;;  %v789_v63 = vld [vmem:[%s8527_s3 + $0x778] sm:$0xff] }
 0x425   : > { %v4974_v37 = vrot.slane %v6446_v27, %v8078_v1  ;;  %v5237_v52 = vrot.slane %v6393_v32, %v8078_v1  ;;  %v5645_v36 = vcombine.low %v757_v29, %v773_v23  ;;  %v805_v16 = vld [vmem:[%s8527_s3 + $0x7f8] sm:$0xff] }
 0x426   : > { %4244 = vmatpush1.bf16.msra.mxu1 %v5549_v13 }
 0x427   : > { %4245 = vmatprep.subr.bf16.mxu1 %v5582_v24 }
 0x42a   : > { %4246 = vmatpush1.bf16.msra.mxu1 %v5581_v21 }
 0x42b   : > { %4247 = vmatprep.subr.bf16.mxu1 %v5614_v50 }
 0x42c   : > { %v3943_v51 = vpop.f32.mrb[16].mxu1 }
 0x42d   : > { %v8108_v13 = vmul.f32 %v4438_v25, %v3943_v51  ;;  %v8110_v24 = vmul.f32 %v4701_v5, %v3943_v51  ;;  %v8112_v54 = vmul.f32 %v4970_v9, %v3943_v51  ;;  %v8114_v58 = vmul.f32 %v5233_v46, %v3943_v51  ;;  %v3945_v30 = vpop.f32.mrb[17].mxu1  ;;  %v821_v5 = vld [vmem:[%s8527_s3 + $0x878] sm:$0xff] }
 0x42e   : > { %v8116_v21 = vmul.f32 %v4442_v28, %v3945_v30  ;;  %v8118_v32 = vmul.f32 %v4705_v44, %v3945_v30  ;;  %v8120_v50 = vmul.f32 %v4974_v37, %v3945_v30  ;;  %v8122_v29 = vmul.f32 %v5237_v52, %v3945_v30  ;;  %v3947_v23 = vpop.f32.mrb[18].mxu1  ;;  %4248 = vmatpush1.bf16.msra.mxu1 %v5613_v11  ;;  %v837_v9 = vld [vmem:[%s8527_s3 + $0x8f8] sm:$0xff] }
 0x42f   : > { %8605 = vst [vmem:[#allocation59_spill] sm:$0xff] %v8112_v54  ;;  %v3948_v18 = vpop.f32.mrb[19].mxu1  ;;  %4249 = vmatprep.subr.bf16.mxu1 %v5646_v6  ;;  %v5678_v25 = vcombine.high %v789_v63, %v805_v16  ;;  %v5677_v46 = vcombine.low %v789_v63, %v805_v16  ;;  %v5710_v28 = vcombine.high %v821_v5, %v837_v9  ;;  %v853_v51 = vld [vmem:[%s8527_s3 + $0x978] sm:$0xff] }
 0x430   : > { %8606 = vst [vmem:[#allocation60_spill] sm:$0xff] %v8120_v50  ;;  %v869_v18 = vld [vmem:[%s8527_s3 + $0x9f8] sm:$0xff]  ;;  %v5709_v11 = vcombine.low %v821_v5, %v837_v9 }
 0x431   : > { %v5742_v6 = vcombine.high %v853_v51, %v869_v18  ;;  %v885_v44 = vld [vmem:[%s8527_s3 + $0xa78] sm:$0xff]  ;;  %v5741_v52 = vcombine.low %v853_v51, %v869_v18 }
 0x432   : > { %4250 = vmatpush1.bf16.msra.mxu1 %v5645_v36  ;;  %v901_v37 = vld [vmem:[%s8527_s3 + $0xaf8] sm:$0xff] }
 0x433   : > { %4251 = vmatprep.subr.bf16.mxu1 %v5678_v25  ;;  %v5774_v36 = vcombine.high %v885_v44, %v901_v37  ;;  %v917_v63 = vld [vmem:[%s8527_s3 + $0xb78] sm:$0xff]  ;;  %v5773_v30 = vcombine.low %v885_v44, %v901_v37 }
 0x434   : > { %v933_v16 = vld [vmem:[%s8527_s3 + $0xbf8] sm:$0xff] }
 0x435   : > { %v5806_v23 = vcombine.high %v917_v63, %v933_v16  ;;  %v949_v25 = vld [vmem:[%s8527_s3 + $0xc78] sm:$0xff]  ;;  %v5805_v9 = vcombine.low %v917_v63, %v933_v16 }
 0x436   : > { %4252 = vmatpush1.bf16.msra.mxu1 %v5677_v46  ;;  %v965_v5 = vld [vmem:[%s8527_s3 + $0xcf8] sm:$0xff] }
 0x437   : > { %4253 = vmatprep.subr.bf16.mxu1 %v5710_v28  ;;  %v5838_v46 = vcombine.high %v949_v25, %v965_v5  ;;  %v981_v28 = vld [vmem:[%s8527_s3 + $0xd78] sm:$0xff]  ;;  %v5837_v18 = vcombine.low %v949_v25, %v965_v5  ;;  %v8607_v25 = vpack.c.bf16 %v6434_v19, %v6446_v27  ;;  %v8608_v5 = vpack.c.bf16 %v6431_v34, %v6443_v40 }
 0x438   : > { %v997_v51 = vld [vmem:[%s8527_s3 + $0xdf8] sm:$0xff]  ;;  %v5269_v27 = vrot.slane %v6374_v59, %v7239_v45  ;;  %v4741_v40 = vrot.slane %v6390_v31, %v7239_v45 }
 0x439   : > { %v1029_v44 = vld [vmem:[%s8527_s3 + $0xef8] sm:$0xff]  ;;  %v5869_v37 = vcombine.low %v981_v28, %v997_v51 }
 0x43a   : > { %4254 = vmatpush1.bf16.msra.mxu1 %v5709_v11  ;;  %v5870_v11 = vcombine.high %v981_v28, %v997_v51  ;;  %v1061_v63 = vld [vmem:[%s8527_s3 + $0xff8] sm:$0xff]  ;;  %v5006_v28 = vrot.slane %v6431_v34, %v7239_v45 }
 0x43b   : > { %4255 = vmatprep.subr.bf16.mxu1 %v5742_v6  ;;  %v1013_v6 = vld [vmem:[%s8527_s3 + $0xe78] sm:$0xff] }
 0x43c   : > { %v5901_v16 = vcombine.low %v1013_v6, %v1029_v44 }
 0x43e   : > { %4256 = vmatpush1.bf16.msra.mxu1 %v5741_v52  ;;  %v5902_v52 = vcombine.high %v1013_v6, %v1029_v44 }
 0x43f   : > { %4257 = vmatprep.subr.bf16.mxu1 %v5774_v36  ;;  %v1045_v36 = vld [vmem:[%s8527_s3 + $0xf78] sm:$0xff] }
 0x442   : > { %4258 = vmatpush1.bf16.msra.mxu1 %v5773_v30  ;;  %v5934_v30 = vcombine.high %v1045_v36, %v1061_v63 }
 0x443   : > { %4259 = vmatprep.subr.bf16.mxu1 %v5806_v23  ;;  %v5933_v23 = vcombine.low %v1045_v36, %v1061_v63 }
 0x446   : > { %4260 = vmatpush1.bf16.msra.mxu1 %v5805_v9  ;;  %v4474_v9 = vrot.slane %v6327_v14, %v7239_v45 }
 0x447   : > { %4261 = vmatprep.subr.bf16.mxu1 %v5838_v46  ;;  %v4737_v46 = vrot.slane %v6387_v53, %v7239_v45 }
 0x44a   : > { %4262 = vmatpush1.bf16.msra.mxu1 %v5837_v18  ;;  %v5273_v18 = vrot.slane %v6377_v60, %v7239_v45 }
 0x44b   : > { %4263 = vmatprep.subr.bf16.mxu1 %v5870_v11 }
 0x44e   : > { %4264 = vmatpush1.bf16.msra.mxu1 %v5869_v37 }
 0x44f   : > { %4265 = vmatprep.subr.bf16.mxu1 %v5902_v52 }
 0x452   : > { %4266 = vmatpush1.bf16.msra.mxu1 %v5901_v16 }
 0x453   : > { %4267 = vmatprep.subr.bf16.mxu1 %v5934_v30 }
 0x456   : > { %4268 = vmatpush1.bf16.msra.mxu1 %v5933_v23 }
 0x457   : > { %5956 = vmatprep.subr.bf16.mxu1 %v8607_v25 }
 0x459   : > { %4270 = vmatmul.mubr.bf16.vlgmr.msra.gmra.mrb[32].mxu1 %v6297_v57  ;;  %v4478_v57 = vrot.slane %v6330_v2, %v7239_v45 }
 0x45a   : > { %5958 = vmatpush1.bf16.msra.mxu1 %v8608_v5  ;;  %4888 = vmatprep.mubr.f32.mxu1 %v8595_v38  ;;  %v5010_v38 = vrot.slane %v6434_v19, %v7239_v45  ;;  %v4462_v45 = vrot.slane %v6327_v14, %v7317_v42  ;;  %v4725_v5 = vrot.slane %v6387_v53, %v7317_v42 }
 0x45e   : > { %v4066_v51 = vpop.f32.mrb[44].mxu0 }
 0x45f   : > { %v8196_v11 = vmul.f32 %v4474_v9, %v4066_v51  ;;  %v8198_v6 = vmul.f32 %v4737_v46, %v4066_v51  ;;  %v8200_v44 = vmul.f32 %v5006_v28, %v4066_v51  ;;  %v8202_v37 = vmul.f32 %v5269_v27, %v4066_v51  ;;  %v4068_v52 = vpop.f32.mrb[45].mxu0 }
 0x460   : > { %v8204_v36 = vmul.f32 %v4478_v57, %v4068_v52  ;;  %v8206_v63 = vmul.f32 %v4741_v40, %v4068_v52  ;;  %v8208_v16 = vmul.f32 %v5010_v38, %v4068_v52  ;;  %v8210_v30 = vmul.f32 %v5273_v18, %v4068_v52  ;;  %v4070_v23 = vpop.f32.mrb[46].mxu0 }
 0x461   : > { %8609 = vst [vmem:[#allocation61_spill] sm:$0xff] %v8200_v44  ;;  %8610 = vst [vmem:[#allocation62_spill] sm:$0xff] %v8202_v37  ;;  %v4071_v25 = vpop.f32.mrb[47].mxu0  ;;  %5937 = vmatmul.mubr.msk.f32.vlgmr.msra.gmra.mrb[2].mxu1 %vm4288_vm2, %v7095_v62  ;;  %v4994_v9 = vrot.slane %v6431_v34, %v7317_v42  ;;  %v5257_v46 = vrot.slane %v6374_v59, %v7317_v42  ;;  %v4466_v27 = vrot.slane %v6330_v2, %v7317_v42 }
 0x462   : > { %8611 = vst [vmem:[#allocation63_spill] sm:$0xff] %v8208_v16  ;;  %8612 = vst [vmem:[#allocation64_spill] sm:$0xff] %v8210_v30  ;;  %v4729_v51 = vrot.slane %v6390_v31, %v7317_v42  ;;  %v4998_v62 = vrot.slane %v6434_v19, %v7317_v42  ;;  %v5261_v57 = vrot.slane %v6377_v60, %v7317_v42 }
 0x463   : > { %v4498_v42 = vrot.slane %v6327_v14, %v7505_v4 }
 0x46c   : > { %v4025_v28 = vpop.f32.mrb[20].mxu1 }
 0x46d   : > { %v8230_v40 = vmul.f32 %v4462_v45, %v4025_v28  ;;  %v8232_v38 = vmul.f32 %v4725_v5, %v4025_v28  ;;  %v8234_v18 = vmul.f32 %v4994_v9, %v4025_v28  ;;  %v8236_v52 = vmul.f32 %v5257_v46, %v4025_v28  ;;  %v4027_v23 = vpop.f32.mrb[21].mxu1 }
 0x46e   : > { %v8238_v25 = vmul.f32 %v4466_v27, %v4027_v23  ;;  %v8240_v16 = vmul.f32 %v4729_v51, %v4027_v23  ;;  %v8242_v44 = vmul.f32 %v4998_v62, %v4027_v23  ;;  %v8244_v47 = vmul.f32 %v5261_v57, %v4027_v23  ;;  %v4029_v50 = vpop.f32.mrb[22].mxu1 }
 0x46f   : > { %8613 = vst [vmem:[#allocation65_spill] sm:$0xff] %v8234_v18  ;;  %8614 = vst [vmem:[#allocation66_spill] sm:$0xff] %v8236_v52  ;;  %v4030_v54 = vpop.f32.mrb[23].mxu1  ;;  %v4761_v45 = vrot.slane %v6387_v53, %v7505_v4  ;;  %v5030_v5 = vrot.slane %v6431_v34, %v7505_v4  ;;  %v5293_v9 = vrot.slane %v6374_v59, %v7505_v4 }
 0x470   : > { %8615 = vst [vmem:[#allocation67_spill] sm:$0xff] %v8242_v44  ;;  %8616 = vst [vmem:[#allocation68_spill] sm:$0xff] %v8244_v47  ;;  %v4502_v28 = vrot.slane %v6330_v2, %v7505_v4  ;;  %v4765_v50 = vrot.slane %v6390_v31, %v7505_v4  ;;  %v5034_v54 = vrot.slane %v6434_v19, %v7505_v4 }
 0x471   : > { %v5297_v27 = vrot.slane %v6377_v60, %v7505_v4  ;;  %v4486_v4 = vrot.slane %v6327_v14, %v7583_v43 }
 0x49e   : > { %v4148_v46 = vpop.f32.mrb[48].mxu0 }
 0x49f   : > { %v8262_v51 = vmul.f32 %v4498_v42, %v4148_v46  ;;  %v8264_v62 = vmul.f32 %v4761_v45, %v4148_v46  ;;  %v8266_v57 = vmul.f32 %v5030_v5, %v4148_v46  ;;  %v8268_v23 = vmul.f32 %v5293_v9, %v4148_v46  ;;  %v4150_v44 = vpop.f32.mrb[49].mxu0 }
 0x4a0   : > { %v8270_v18 = vmul.f32 %v4502_v28, %v4150_v44  ;;  %v8272_v1 = vmul.f32 %v4765_v50, %v4150_v44  ;;  %v8274_v30 = vmul.f32 %v5034_v54, %v4150_v44  ;;  %v8276_v37 = vmul.f32 %v5297_v27, %v4150_v44  ;;  %v4152_v47 = vpop.f32.mrb[50].mxu0 }
 0x4a1   : > { %8617 = vst [vmem:[#allocation69_spill] sm:$0xff] %v8264_v62  ;;  %8618 = vst [vmem:[#allocation70_spill] sm:$0xff] %v8266_v57  ;;  %v4153_v52 = vpop.f32.mrb[51].mxu0  ;;  %v4749_v42 = vrot.slane %v6387_v53, %v7583_v43  ;;  %v5018_v45 = vrot.slane %v6431_v34, %v7583_v43  ;;  %v5281_v5 = vrot.slane %v6374_v59, %v7583_v43 }
 0x4a2   : > { %8619 = vst [vmem:[#allocation71_spill] sm:$0xff] %v8268_v23  ;;  %8620 = vst [vmem:[#allocation72_spill] sm:$0xff] %v8272_v1  ;;  %v4490_v46 = vrot.slane %v6330_v2, %v7583_v43  ;;  %v4753_v47 = vrot.slane %v6390_v31, %v7583_v43  ;;  %v5022_v44 = vrot.slane %v6434_v19, %v7583_v43 }
 0x4a3   : > { %8621 = vst [vmem:[#allocation73_spill] sm:$0xff] %v8274_v30  ;;  %8622 = vst [vmem:[#allocation74_spill] sm:$0xff] %v8276_v37  ;;  %v5285_v52 = vrot.slane %v6377_v60, %v7583_v43  ;;  %v4522_v43 = vrot.slane %v6327_v14, %v7771_v61 }
 0x4ac   : > { %v4107_v9 = vpop.f32.mrb[24].mxu1 }
 0x4ad   : > { %v8294_v28 = vmul.f32 %v4486_v4, %v4107_v9  ;;  %v8296_v50 = vmul.f32 %v4749_v42, %v4107_v9  ;;  %v8298_v54 = vmul.f32 %v5018_v45, %v4107_v9  ;;  %v8300_v27 = vmul.f32 %v5281_v5, %v4107_v9  ;;  %v4109_v30 = vpop.f32.mrb[25].mxu1 }
 0x4ae   : > { %v8302_v57 = vmul.f32 %v4490_v46, %v4109_v30  ;;  %v8304_v37 = vmul.f32 %v4753_v47, %v4109_v30  ;;  %v8306_v23 = vmul.f32 %v5022_v44, %v4109_v30  ;;  %v8308_v1 = vmul.f32 %v5285_v52, %v4109_v30  ;;  %v4111_v62 = vpop.f32.mrb[26].mxu1 }
 0x4af   : > { %8623 = vst [vmem:[#allocation75_spill] sm:$0xff] %v8296_v50  ;;  %8624 = vst [vmem:[#allocation76_spill] sm:$0xff] %v8298_v54  ;;  %v4112_v20 = vpop.f32.mrb[27].mxu1  ;;  %v4785_v4 = vrot.slane %v6387_v53, %v7771_v61  ;;  %v5054_v42 = vrot.slane %v6431_v34, %v7771_v61  ;;  %v5317_v45 = vrot.slane %v6374_v59, %v7771_v61 }
 0x4b0   : > { %8625 = vst [vmem:[#allocation77_spill] sm:$0xff] %v8300_v27  ;;  %8626 = vst [vmem:[#allocation78_spill] sm:$0xff] %v8304_v37  ;;  %v4526_v9 = vrot.slane %v6330_v2, %v7771_v61  ;;  %v4789_v30 = vrot.slane %v6390_v31, %v7771_v61  ;;  %v5058_v20 = vrot.slane %v6434_v19, %v7771_v61 }
 0x4b1   : > { %8627 = vst [vmem:[#allocation79_spill] sm:$0xff] %v8306_v23  ;;  %8628 = vst [vmem:[#allocation80_spill] sm:$0xff] %v8308_v1  ;;  %v5321_v62 = vrot.slane %v6377_v60, %v7771_v61 }
 0x4de   : > { %v4230_v5 = vpop.f32.mrb[52].mxu0 }
 0x4df   : > { %v8326_v46 = vmul.f32 %v4522_v43, %v4230_v5  ;;  %v8328_v47 = vmul.f32 %v4785_v4, %v4230_v5  ;;  %v8330_v44 = vmul.f32 %v5054_v42, %v4230_v5  ;;  %v8332_v52 = vmul.f32 %v5317_v45, %v4230_v5  ;;  %v4232_v23 = vpop.f32.mrb[53].mxu0 }
 0x4e0   : > { %v8334_v54 = vmul.f32 %v4526_v9, %v4232_v23  ;;  %v8336_v1 = vmul.f32 %v4789_v30, %v4232_v23  ;;  %v8338_v27 = vmul.f32 %v5058_v20, %v4232_v23  ;;  %v8340_v37 = vmul.f32 %v5321_v62, %v4232_v23  ;;  %v4234_v56 = vpop.f32.mrb[54].mxu0 }
 0x4e1   : > { %8629 = vst [vmem:[#allocation81_spill] sm:$0xff] %v8330_v44  ;;  %v4235_v50 = vpop.f32.mrb[55].mxu0  ;;  %v4510_v5 = vrot.slane %v6327_v14, %v7849_v8  ;;  %v4773_v23 = vrot.slane %v6387_v53, %v7849_v8  ;;  %v5042_v56 = vrot.slane %v6431_v34, %v7849_v8  ;;  %v4514_v20 = vrot.slane %v6330_v2, %v7849_v8  ;;  %v8633_v2 = vld [vmem:[#allocation38_spill] sm:$0xff] }
 0x4e2   : > { %8630 = vst [vmem:[#allocation82_spill] sm:$0xff] %v8338_v27  ;;  %v8637_v53 = vld [vmem:[#allocation30_spill] sm:$0xff] }
 0x4e6   : > { %v4358_v61 = vpop.f32.mrb[22].mxu0 }
 0x4e7   : > { %v4359_v43 = vadd.f32 %v4358_v61, %v7043_v35  ;;  %v4360_v4 = vpop.f32.mrb[23].mxu0  ;;  %v5305_v35 = vrot.slane %v6374_v59, %v7849_v8 }
 0x4e8   : > { %v4361_v42 = vadd.f32 %v4360_v4, %v7055_v7  ;;  %v5046_v4 = vrot.slane %v6434_v19, %v7849_v8 }
 0x4e9   : > { %v4373_v45 = vadd.f32 %v7353_v48, %v4359_v43 }
 0x4ea   : > { %v4374_v9 = vadd.f32 %v7367_v15, %v4361_v42  ;;  %v4621_v30 = vpop.f32.mrb[56].mxu0  ;;  %v4777_v15 = vrot.slane %v6390_v31, %v7849_v8  ;;  %v8631_v42 = vld [vmem:[#allocation34_spill] sm:$0xff] }
 0x4eb   : > { %v4385_v50 = vadd.f32 %v7276_v26, %v4373_v45  ;;  %v4622_v7 = vadd.f32 %v4621_v30, %v7045_v41  ;;  %v4623_v48 = vpop.f32.mrb[57].mxu0  ;;  %v5309_v26 = vrot.slane %v6377_v60, %v7849_v8  ;;  %v8632_v45 = vld [vmem:[#allocation20_spill] sm:$0xff]  ;;  %v8635_v8 = vld [vmem:[#allocation26_spill] sm:$0xff] }
 0x4ec   : > { %v4386_v62 = vadd.f32 %v7284_v39, %v4374_v9  ;;  %v4624_v61 = vadd.f32 %v4623_v48, %v7057_v10  ;;  %v4189_v43 = vpop.f32.mrb[28].mxu1  ;;  %v8634_v9 = vld [vmem:[#allocation23_spill] sm:$0xff] }
 0x4ed   : > { %v4397_v41 = vadd.f32 %v8631_v42, %v4385_v50  ;;  %v4636_v30 = vadd.f32 %v8632_v45, %v4622_v7  ;;  %v8368_v27 = vmul.f32 %v4510_v5, %v4189_v43  ;;  %v8370_v44 = vmul.f32 %v4773_v23, %v4189_v43  ;;  %v4191_v31 = vpop.f32.mrb[29].mxu1  ;;  %v8636_v50 = vld [vmem:[#allocation14_spill] sm:$0xff] }
 0x4ee   : > { %v4398_v39 = vadd.f32 %v8633_v2, %v4386_v62  ;;  %v4637_v10 = vadd.f32 %v8634_v9, %v4624_v61  ;;  %v8374_v48 = vmul.f32 %v5042_v56, %v4189_v43  ;;  %v8376_v59 = vmul.f32 %v5305_v35, %v4189_v43  ;;  %v5153_v19 = vpop.f32.mrb[58].mxu0  ;;  %v4193_v34 = vpop.f32.mrb[30].mxu1  ;;  %v8638_v2 = vld [vmem:[#allocation17_spill] sm:$0xff] }
 0x4ef   : > { %v4409_v60 = vadd.f32 %v8635_v8, %v4397_v41  ;;  %v4648_v42 = vadd.f32 %v8636_v50, %v4636_v30  ;;  %v4516_v7 = vmul.f32 %v4514_v20, %v4191_v31  ;;  %v8380_v5 = vmul.f32 %v4777_v15, %v4191_v31  ;;  %v5155_v23 = vpop.f32.mrb[59].mxu0  ;;  %v4194_v45 = vpop.f32.mrb[31].mxu1  ;;  %v8640_v34 = vld [vmem:[#allocation35_spill] sm:$0xff]  ;;  %v8641_v41 = vld [vmem:[#allocation10_spill] sm:$0xff] }
 0x4f0   : > { %v4410_v14 = vadd.f32 %v8637_v53, %v4398_v39  ;;  %v4649_v62 = vadd.f32 %v8638_v2, %v4637_v10  ;;  %v8384_v61 = vmul.f32 %v5046_v4, %v4191_v31  ;;  %v8386_v56 = vmul.f32 %v5309_v26, %v4191_v31  ;;  %v8642_v30 = vld [vmem:[#allocation11_spill] sm:$0xff]  ;;  %v8644_v45 = vld [vmem:[#allocation42_spill] sm:$0xff]  ;;  %v8646_v4 = vld [vmem:[#allocation21_spill] sm:$0xff] }
 0x4f1   : > { %v4421_v35 = vadd.f32 %v7885_v12, %v4409_v60  ;;  %v4660_v43 = vadd.f32 %v8640_v34, %v4648_v42  ;;  %v5154_v9 = vadd.f32 %v5153_v19, %v8641_v41  ;;  %v5156_v20 = vadd.f32 %v5155_v23, %v8642_v30  ;;  %v8643_v8 = vld [vmem:[#allocation39_spill] sm:$0xff]  ;;  %v8647_v31 = vld [vmem:[#allocation24_spill] sm:$0xff] }
 0x4f2   : > { %8639 = vst [vmem:[#allocation34_spill] sm:$0xff] %v8384_v61  ;;  %v4422_v15 = vadd.f32 %v7893_v0, %v4410_v14  ;;  %v4661_v50 = vadd.f32 %v8643_v8, %v4649_v62  ;;  %v8645_v39 = vld [vmem:[#allocation27_spill] sm:$0xff]  ;;  %v8648_v61 = vld [vmem:[#allocation46_spill] sm:$0xff]  ;;  %v8650_v34 = vld [vmem:[#allocation16_spill] sm:$0xff] }
 0x4f3   : > { %v4433_v53 = vadd.f32 %v8644_v45, %v4421_v35  ;;  %v4672_v10 = vadd.f32 %v8645_v39, %v4660_v43  ;;  %v5168_v2 = vadd.f32 %v8646_v4, %v5154_v9  ;;  %v5169_v26 = vadd.f32 %v8647_v31, %v5156_v20  ;;  %v8649_v12 = vld [vmem:[#allocation31_spill] sm:$0xff]  ;;  %v8653_v20 = vld [vmem:[#allocation37_spill] sm:$0xff] }
 0x4f4   : > { %v4434_v60 = vadd.f32 %v8648_v61, %v4422_v15  ;;  %v4673_v42 = vadd.f32 %v8649_v12, %v4661_v50  ;;  %v8651_v0 = vld [vmem:[#allocation19_spill] sm:$0xff]  ;;  %v8654_v15 = vld [vmem:[#allocation41_spill] sm:$0xff] }
 0x4f5   : > { %v4445_v19 = vadd.f32 %v8108_v13, %v4433_v53  ;;  %v4684_v23 = vadd.f32 %v7887_v49, %v4672_v10  ;;  %v5180_v14 = vadd.f32 %v8650_v34, %v5168_v2  ;;  %v5181_v62 = vadd.f32 %v8651_v0, %v5169_v26  ;;  %v8652_v9 = vld [vmem:[#allocation43_spill] sm:$0xff]  ;;  %v8656_v39 = vld [vmem:[#allocation29_spill] sm:$0xff] }
 0x4f6   : > { %v4446_v35 = vadd.f32 %v8116_v21, %v4434_v60  ;;  %v4685_v43 = vadd.f32 %v7895_v55, %v4673_v42  ;;  %v8655_v50 = vld [vmem:[#allocation47_spill] sm:$0xff]  ;;  %v8657_v10 = vld [vmem:[#allocation33_spill] sm:$0xff] }
 0x4f7   : > { %v4457_v41 = vadd.f32 %v8049_v3, %v4445_v19  ;;  %v4696_v30 = vadd.f32 %v8652_v9, %v4684_v23  ;;  %v5192_v61 = vadd.f32 %v8653_v20, %v5180_v14  ;;  %v5193_v8 = vadd.f32 %v8654_v15, %v5181_v62  ;;  %v8658_v26 = vld [vmem:[#allocation51_spill] sm:$0xff]  ;;  %v8659_v60 = vld [vmem:[#allocation53_spill] sm:$0xff] }
 0x4f8   : > { %v4458_v13 = vadd.f32 %v8057_v17, %v4446_v35  ;;  %v4697_v49 = vadd.f32 %v8655_v50, %v4685_v43  ;;  %v8660_v23 = vld [vmem:[#allocation45_spill] sm:$0xff]  ;;  %v8662_v35 = vld [vmem:[#allocation75_spill] sm:$0xff] }
 0x4f9   : > { %v4708_v45 = vadd.f32 %v8110_v24, %v4696_v30  ;;  %v4469_v53 = vadd.f32 %v8230_v40, %v4457_v41  ;;  %v5204_v21 = vadd.f32 %v8656_v39, %v5192_v61  ;;  %v5205_v55 = vadd.f32 %v8657_v10, %v5193_v8  ;;  %v8661_v34 = vld [vmem:[#allocation49_spill] sm:$0xff]  ;;  %v8663_v41 = vld [vmem:[#allocation55_spill] sm:$0xff] }
 0x4fa   : > { %v4709_v3 = vadd.f32 %v8118_v32, %v4697_v49  ;;  %v4470_v4 = vadd.f32 %v8238_v25, %v4458_v13  ;;  %v8664_v9 = vld [vmem:[#allocation57_spill] sm:$0xff]  ;;  %v8670_v49 = vld [vmem:[#allocation62_spill] sm:$0xff] }
 0x4fb   : > { %v4720_v2 = vadd.f32 %v8051_v22, %v4708_v45  ;;  %v4481_v31 = vadd.f32 %v8196_v11, %v4469_v53  ;;  %v5216_v17 = vadd.f32 %v8658_v26, %v5204_v21  ;;  %v5217_v12 = vadd.f32 %v8659_v60, %v5205_v55  ;;  %v8672_v10 = vld [vmem:[#allocation77_spill] sm:$0xff]  ;;  %v8675_v26 = vld [vmem:[#allocation74_spill] sm:$0xff] }
 0x4fc   : > { %v4721_v24 = vadd.f32 %v8059_v33, %v4709_v3  ;;  %v4482_v40 = vadd.f32 %v8204_v36, %v4470_v4  ;;  %v8673_v3 = vld [vmem:[#allocation80_spill] sm:$0xff] }
 0x4fd   : > { %v4493_v42 = vadd.f32 %v8294_v28, %v4481_v31  ;;  %v4732_v19 = vadd.f32 %v8232_v38, %v4720_v2  ;;  %v5228_v32 = vadd.f32 %v8660_v23, %v5216_v17  ;;  %v5229_v25 = vadd.f32 %v8661_v34, %v5217_v12  ;;  %v8674_v2 = vld [vmem:[#allocation71_spill] sm:$0xff]  ;;  %v8677_v12 = vld [vmem:[#allocation2_spill] sm:$0xff]  ;;  %v8680_v23 = vld [vmem:[#allocation4_spill] sm:$0xff] }
 0x4fe   : > { %v4494_v22 = vadd.f32 %v8302_v57, %v4482_v40  ;;  %v4733_v11 = vadd.f32 %v8240_v16, %v4721_v24  ;;  %v8678_v40 = vld [vmem:[#allocation6_spill] sm:$0xff] }
 0x4ff   : > { %v4505_v14 = vadd.f32 %v8262_v51, %v4493_v42  ;;  %v4744_v0 = vadd.f32 %v8198_v6, %v4732_v19  ;;  %v5240_v33 = vadd.f32 %v8114_v58, %v5228_v32  ;;  %v5241_v36 = vadd.f32 %v8122_v29, %v5229_v25  ;;  %v8665_v51 = vld [vmem:[#allocation78_spill] sm:$0xff]  ;;  %v8666_v6 = vld [vmem:[#allocation69_spill] sm:$0xff]  ;;  %v8668_v29 = vld [vmem:[#allocation68_spill] sm:$0xff] }
 0x500   : > { %v4506_v28 = vadd.f32 %v8270_v18, %v4494_v22  ;;  %v4745_v38 = vadd.f32 %v8206_v63, %v4733_v11  ;;  %v8667_v58 = vld [vmem:[#allocation66_spill] sm:$0xff]  ;;  %v8669_v63 = vld [vmem:[#allocation72_spill] sm:$0xff]  ;;  %v8683_v25 = vld [vmem:[#allocation9_spill] sm:$0xff] }
 0x501   : > { %v4517_v62 = vadd.f32 %v8368_v27, %v4505_v14  ;;  %v4756_v43 = vadd.f32 %v8662_v35, %v4744_v0  ;;  %v5252_v57 = vadd.f32 %v8663_v41, %v5240_v33  ;;  %v5253_v16 = vadd.f32 %v8664_v9, %v5241_v36  ;;  %v8684_v11 = vld [vmem:[#allocation5_spill] sm:$0xff] }
 0x502   : > { %v4518_v30 = vadd.f32 %v4516_v7, %v4506_v28  ;;  %v4757_v20 = vadd.f32 %v8665_v51, %v4745_v38  ;;  %v8671_v7 = vld [vmem:[#allocation64_spill] sm:$0xff] }
 0x503   : > { %v4768_v61 = vadd.f32 %v8666_v6, %v4756_v43  ;;  %v5264_v15 = vadd.f32 %v8667_v58, %v5252_v57  ;;  %v5265_v8 = vadd.f32 %v8668_v29, %v5253_v16  ;;  %v4529_v18 = vadd.f32 %v8326_v46, %v4517_v62 }
 0x504   : > { %v4769_v13 = vadd.f32 %v8669_v63, %v4757_v20  ;;  %v4530_v27 = vadd.f32 %v8334_v54, %v4518_v30 }
 0x505   : > { %v4780_v50 = vadd.f32 %v8370_v44, %v4768_v61  ;;  %v5276_v45 = vadd.f32 %v8670_v49, %v5264_v15  ;;  %v5277_v53 = vadd.f32 %v8671_v7, %v5265_v8  ;;  %v8686_v49 = vld [vmem:[#allocation13_spill] sm:$0xff]  ;;  %v8687_v7 = vld [vmem:[#allocation22_spill] sm:$0xff] }
 0x506   : > { %v4781_v39 = vadd.f32 %v8380_v5, %v4769_v13  ;;  %v8685_v13 = vld [vmem:[#allocation12_spill] sm:$0xff] }
 0x507   : > { %v4792_v21 = vadd.f32 %v8328_v47, %v4780_v50  ;;  %v5288_v55 = vadd.f32 %v8672_v10, %v5276_v45  ;;  %v5289_v4 = vadd.f32 %v8673_v3, %v5277_v53  ;;  %v8676_v47 = vld [vmem:[#allocation58_spill] sm:$0xff]  ;;  %v8688_v53 = vld [vmem:[#allocation25_spill] sm:$0xff] }
 0x508   : > { %v4793_v46 = vadd.f32 %v8336_v1, %v4781_v39  ;;  %v4534_v24 = vrot.slane %v8677_v12, %v8676_v47  ;;  %v4797_v42 = vrot.slane %v8678_v40, %v8676_v47  ;;  %v8679_v1 = vld [vmem:[#allocation8_spill] sm:$0xff]  ;;  %v5329_v32 = vrot.slane %v8680_v23, %v8676_v47 }
 0x509   : > { %v5300_v31 = vadd.f32 %v8674_v2, %v5288_v55  ;;  %v5301_v54 = vadd.f32 %v8675_v26, %v5289_v4  ;;  %v5066_v19 = vrot.slane %v8679_v1, %v8676_v47  ;;  %v5070_v22 = vrot.slane %v8683_v25, %v8676_v47  ;;  %v8690_v55 = vld [vmem:[#allocation18_spill] sm:$0xff]  ;;  %v8691_v4 = vld [vmem:[#allocation36_spill] sm:$0xff]  ;;  %v8703_v25 = vld [vmem:[#allocation65_spill] sm:$0xff] }
 0x50a   : > { %v5333_v14 = vrot.slane %v8684_v11, %v8676_v47  ;;  %v8692_v2 = vld [vmem:[#allocation40_spill] sm:$0xff]  ;;  %v8704_v11 = vld [vmem:[#allocation67_spill] sm:$0xff] }
 0x50b   : > { %v5312_v44 = vadd.f32 %v8376_v59, %v5300_v31  ;;  %v5313_v17 = vadd.f32 %v8386_v56, %v5301_v54  ;;  %v8681_v56 = vld [vmem:[#allocation3_spill] sm:$0xff]  ;;  %v8693_v26 = vld [vmem:[#allocation28_spill] sm:$0xff] }
 0x50c   : > { %v4538_v34 = vrot.slane %v8681_v56, %v8676_v47  ;;  %v8701_v56 = vld [vmem:[#allocation54_spill] sm:$0xff] }
 0x50d   : > { %v5324_v60 = vadd.f32 %v8332_v52, %v5312_v44  ;;  %v5325_v5 = vadd.f32 %v8340_v37, %v5313_v17  ;;  %v8682_v52 = vld [vmem:[#allocation7_spill] sm:$0xff]  ;;  %v8694_v44 = vld [vmem:[#allocation32_spill] sm:$0xff] }
 0x50e   : > { %v4801_v37 = vrot.slane %v8682_v52, %v8676_v47  ;;  %v8696_v47 = vld [vmem:[#allocation52_spill] sm:$0xff] }
 0x50f   : > { %v8702_v52 = vld [vmem:[#allocation56_spill] sm:$0xff] }
 0x52c   : > { %v4271_v59 = vpop.f32.mrb[32].mxu1 }
 0x52d   : > { %v4539_v0 = vmul.f32 %v4534_v24, %v4271_v59  ;;  %v4802_v33 = vmul.f32 %v4797_v42, %v4271_v59  ;;  %v5071_v36 = vmul.f32 %v5066_v19, %v4271_v59  ;;  %v5334_v28 = vmul.f32 %v5329_v32, %v4271_v59  ;;  %v4273_v38 = vpop.f32.mrb[33].mxu1  ;;  %v8697_v24 = vld [vmem:[#allocation44_spill] sm:$0xff]  ;;  %v8699_v19 = vld [vmem:[#allocation59_spill] sm:$0xff] }
 0x52e   : > { %v4540_v62 = vmul.f32 %v4538_v34, %v4273_v38  ;;  %v4803_v35 = vmul.f32 %v4801_v37, %v4273_v38  ;;  %v5072_v43 = vmul.f32 %v5070_v22, %v4273_v38  ;;  %v5335_v41 = vmul.f32 %v5333_v14, %v4273_v38  ;;  %v4275_v57 = vpop.f32.mrb[34].mxu1  ;;  %v8698_v42 = vld [vmem:[#allocation48_spill] sm:$0xff] }
 0x52f   : > { %v4541_v9 = vadd.f32 %v4539_v0, %v4529_v18  ;;  %v4804_v16 = vadd.f32 %v4802_v33, %v4792_v21  ;;  %v5336_v30 = vadd.f32 %v5334_v28, %v5324_v60  ;;  %v4276_v51 = vpop.f32.mrb[35].mxu1  ;;  %v8689_v21 = vld [vmem:[#allocation15_spill] sm:$0xff]  ;;  %v8695_v60 = vld [vmem:[#allocation50_spill] sm:$0xff]  ;;  %v8700_v32 = vld [vmem:[#allocation60_spill] sm:$0xff] }
 0x530   : > { %v4542_v20 = vadd.f32 %v4540_v62, %v4530_v27  ;;  %v4805_v6 = vadd.f32 %v4803_v35, %v4793_v46  ;;  %v5337_v61 = vadd.f32 %v5335_v41, %v5325_v5  ;;  %v8705_v0 = vld [vmem:[#allocation61_spill] sm:$0xff]  ;;  %v8706_v28 = vld [vmem:[#allocation63_spill] sm:$0xff]  ;;  %v8707_v62 = vld [vmem:[#allocation76_spill] sm:$0xff] }
 0x531   : > { %4543 = vst [vmem:[%s8481_s9] sm:$0xf] %v4541_v9  ;;  %v4808_v58 = vrot.slane %v4804_v16, 4  ;;  %v5340_v15 = vrot.slane %v5336_v30, 4  ;;  %v8708_v41 = vld [vmem:[#allocation79_spill] sm:$0xff]  ;;  %v8709_v9 = vld [vmem:[#allocation70_spill] sm:$0xff]  ;;  %v8710_v30 = vld [vmem:[#allocation73_spill] sm:$0xff] }
 0x532   : > { %4544 = vst [vmem:[%s8481_s9 + $0x8] sm:$0xf] %v4542_v20  ;;  %v4809_v29 = vrot.slane %v4805_v6, 4  ;;  %v5341_v8 = vrot.slane %v5337_v61, 4  ;;  %v8711_v6 = vld [vmem:[#allocation34_spill] sm:$0xff] }
 0x533   : > { %4812 = vst [vmem:[%s8481_s9] sm:$0xf0] %v4808_v58  ;;  %5344 = vst [vmem:[%s8481_s9 + $0x10] sm:$0xf0] %v5340_v15  ;;  %v8712_v58 = vld [vmem:[#allocation81_spill] sm:$0xff] }
 0x534   : > { %4813 = vst [vmem:[%s8481_s9 + $0x8] sm:$0xf0] %v4809_v29  ;;  %5345 = vst [vmem:[%s8481_s9 + $0x18] sm:$0xf0] %v5341_v8  ;;  %v4890_v63 = vpop.f32.mrb[2].mxu1  ;;  %v8713_v29 = vld [vmem:[#allocation82_spill] sm:$0xff] }
 0x535   : > { %v4891_v18 = vadd.f32 %v4890_v63, %v8685_v13  ;;  %v4892_v50 = vpop.f32.mrb[3].mxu1 }
 0x536   : > { %v4893_v45 = vadd.f32 %v4892_v50, %v8686_v49 }
 0x537   : > { %v4905_v27 = vadd.f32 %v8687_v7, %v4891_v18 }
 0x538   : > { %v4906_v39 = vadd.f32 %v8688_v53, %v4893_v45 }
 0x539   : > { %v4917_v10 = vadd.f32 %v8689_v21, %v4905_v27 }
 0x53a   : > { %v4918_v3 = vadd.f32 %v8690_v55, %v4906_v39 }
 0x53b   : > { %v4929_v46 = vadd.f32 %v8691_v4, %v4917_v10 }
 0x53c   : > { %v4930_v31 = vadd.f32 %v8692_v2, %v4918_v3 }
 0x53d   : > { %v4941_v54 = vadd.f32 %v8693_v26, %v4929_v46 }
 0x53e   : > { %v4942_v17 = vadd.f32 %v8694_v44, %v4930_v31 }
 0x53f   : > { %v4953_v5 = vadd.f32 %v8695_v60, %v4941_v54 }
 0x540   : > { %v4954_v12 = vadd.f32 %v8696_v47, %v4942_v17 }
 0x541   : > { %v4965_v40 = vadd.f32 %v8697_v24, %v4953_v5 }
 0x542   : > { %v4966_v1 = vadd.f32 %v8698_v42, %v4954_v12 }
 0x543   : > { %v4977_v23 = vadd.f32 %v8699_v19, %v4965_v40 }
 0x544   : > { %v4978_v59 = vadd.f32 %v8700_v32, %v4966_v1 }
 0x545   : > { %v4989_v34 = vadd.f32 %v8701_v56, %v4977_v23 }
 0x546   : > { %v4990_v37 = vadd.f32 %v8702_v52, %v4978_v59 }
 0x547   : > { %v5001_v22 = vadd.f32 %v8703_v25, %v4989_v34 }
 0x548   : > { %v5002_v14 = vadd.f32 %v8704_v11, %v4990_v37 }
 0x549   : > { %v5013_v33 = vadd.f32 %v8705_v0, %v5001_v22 }
 0x54a   : > { %v5014_v38 = vadd.f32 %v8706_v28, %v5002_v14 }
 0x54b   : > { %v5025_v35 = vadd.f32 %v8707_v62, %v5013_v33 }
 0x54c   : > { %v5026_v57 = vadd.f32 %v8708_v41, %v5014_v38 }
 0x54d   : > { %v5037_v16 = vadd.f32 %v8709_v9, %v5025_v35 }
 0x54e   : > { %v5038_v51 = vadd.f32 %v8710_v30, %v5026_v57 }
 0x54f   : > { %v5049_v20 = vadd.f32 %v8374_v48, %v5037_v16 }
 0x550   : > { %v5050_v61 = vadd.f32 %v8711_v6, %v5038_v51 }
 0x551   : > { %v5061_v15 = vadd.f32 %v8712_v58, %v5049_v20 }
 0x552   : > { %v5062_v8 = vadd.f32 %v8713_v29, %v5050_v61 }
 0x553   : > { %v5073_v63 = vadd.f32 %v5071_v36, %v5061_v15 }
 0x554   : > { %v5074_v13 = vadd.f32 %v5072_v43, %v5062_v8 }
 0x555   : > { %5075 = vst [vmem:[%s8481_s9 + $0x10] sm:$0xf] %v5073_v63 }
 0x556   : > { %5076 = vst [vmem:[%s8481_s9 + $0x18] sm:$0xf] %v5074_v13 }
 0x557 PF: > { %s14_s15 = sadd.s32 1, %s5994_s15  }
 0x558   : > { %p11_p4 = scmp.ge.s32.totalorder %s14_s15, 4  }
 0x55a   :  { %13 = sbr.rel (!%p11_p4) target bundleno = 1 (0x1), region = 66 }

</bundles_post_ra>
